<compile_context>
chip_gen: v5e
topology: v5e:2x2
jax: 0.10.0
libtpu: 0.0.40
codegen_flags: <defaults>
</compile_context>

<pallas_src>
import functools
import math

import jax
import jax.numpy as jnp
from jax.experimental import pallas as pl
from jax.experimental.pallas import tpu as pltpu

jax.config.update("jax_default_matmul_precision", "float32")


# ---------------------------------------------------------------------------
# Relative-embedding window selection (== _get_relative_embeddings in torch).
# ---------------------------------------------------------------------------
def get_used_rel_emb(emb, length, window_size):
    """emb: [1, 2*window_size+1, KC] -> used embeddings [2*length-1, KC]."""
    pad_len = max(length - (window_size + 1), 0)
    start = max(window_size + 1 - length, 0)
    padded = jnp.pad(emb[0], ((pad_len, pad_len), (0, 0)))
    return padded[start:start + 2 * length - 1]


# ---------------------------------------------------------------------------
# Pallas kernel: full multi-head attention forward in one grid step.
# ---------------------------------------------------------------------------
def make_mha_kernel(B, T, n_heads, k_channels):
    H, KC = n_heads, k_channels
    C = H * KC
    inv_sqrt = 1.0 / math.sqrt(KC)
    nt = (((1,), (1,)), ((), ()))     # contract lhs dim1 with rhs dim1 (A @ B^T)

    def rel_to_abs(rel):
        """rel: [T, 2T-1] -> abs [T, T];  abs[i, j] = rel[i, j - i + T - 1]."""
        rows = [rel[i:i + 1, T - 1 - i: 2 * T - 1 - i] for i in range(T)]
        return jnp.concatenate(rows, axis=0)

    def abs_to_rel(p):
        """p: [T, T] -> relw [T, 2T-1];  relw[i, m] = p[i, m - (T-1) + i] (else 0)."""
        rows = []
        for i in range(T):
            pieces = []
            if T - 1 - i > 0:
                pieces.append(jnp.zeros((1, T - 1 - i), p.dtype))
            pieces.append(p[i:i + 1, :])
            if i > 0:
                pieces.append(jnp.zeros((1, i), p.dtype))
            rows.append(pieces[0] if len(pieces) == 1
                        else jnp.concatenate(pieces, axis=1))
        return jnp.concatenate(rows, axis=0)

    def kernel(x_ref, c_ref, mq_ref, mk_ref,
               wq_ref, bq_ref, wkv_ref, bkv_ref, wo_ref, bo_ref,
               ekt_ref, ev_ref, out_ref):
        x2d = x_ref[...]                                  # [B*T, C]  query source
        c2d = c_ref[...]                                  # [B*T, C]  key/value source
        mq = mq_ref[...]                                  # [B*T, 1]  query-pos mask
        mk = mk_ref[...]                                  # [B, T]    key-pos mask
        ekt = ekt_ref[...]                                # [KC, 2T-1]
        ev = ev_ref[...]                                  # [2T-1, KC]

        # ---- fused full-width projections (single MXU matmuls) ----
        q2d = (jnp.dot(x2d, wq_ref[...], preferred_element_type=jnp.float32)
               + bq_ref[...]) * inv_sqrt                  # [B*T, C], pre-scaled
        kv2d = (jnp.dot(c2d, wkv_ref[...], preferred_element_type=jnp.float32)
                + bkv_ref[...])                           # [B*T, 2C] -> [K | V]

        batch_outs = []
        for b in range(B):
            r0 = b * T
            # mask condition, computed once per batch (hoisted out of head loop)
            nmask = (mq[r0:r0 + T, :] * mk[b:b + 1, :]) == 0.0        # [T, T]
            head_outs = []
            for h in range(H):
                c0 = h * KC
                qh = q2d[r0:r0 + T, c0:c0 + KC]                        # [T, KC]
                kh = kv2d[r0:r0 + T, c0:c0 + KC]                       # [T, KC]
                vh = kv2d[r0:r0 + T, C + c0:C + c0 + KC]               # [T, KC]

                # content scores + relative-key scores (both on the MXU)
                scores = jax.lax.dot_general(qh, kh, nt,
                                             preferred_element_type=jnp.float32)
                rel_logits = jnp.dot(qh, ekt,
                                     preferred_element_type=jnp.float32)  # [T, 2T-1]
                scores = scores + rel_to_abs(rel_logits)
                scores = jnp.where(nmask, -1e4, scores)   # masked_fill semantics

                # softmax (EUP reciprocal + one Newton refinement)
                smax = jnp.max(scores, axis=-1, keepdims=True)
                e = jnp.exp(scores - smax)
                denom = jnp.sum(e, axis=-1, keepdims=True)
                inv = pl.reciprocal(denom, approx=True)
                inv = inv * (2.0 - denom * inv)
                p = e * inv                                            # [T, T]

                # content values + relative-value contribution (MXU)
                oh = jnp.dot(p, vh, preferred_element_type=jnp.float32)
                oh = oh + jnp.dot(abs_to_rel(p), ev,
                                  preferred_element_type=jnp.float32)  # [T, KC]
                head_outs.append(oh)
            batch_outs.append(jnp.concatenate(head_outs, axis=1))      # [T, C]

        o_all = jnp.concatenate(batch_outs, axis=0)                    # [B*T, C]
        out_ref[...] = (jnp.dot(o_all, wo_ref[...],
                                preferred_element_type=jnp.float32)
                        + bo_ref[...])

    return kernel


# ---------------------------------------------------------------------------
# Wrapper: layout plumbing + pallas_call.
# ---------------------------------------------------------------------------
@functools.partial(jax.jit, static_argnames=("n_heads", "window_size"))
def multi_head_attention_pallas(x, c, q_mask, k_mask, params, n_heads, window_size):
    """x, c: [B, C, T] (NCT, as in the PyTorch module).
    q_mask, k_mask: [B, T] 0/1 floats; attn_mask == q_mask[:,:,None]*k_mask[:,None,:].
    Returns [B, out_channels, T]."""
    B, C, T = x.shape
    out_ch = params["wo"].shape[0]
    KC = C // n_heads

    x2d = jnp.transpose(x, (0, 2, 1)).reshape(B * T, C)
    c2d = jnp.transpose(c, (0, 2, 1)).reshape(B * T, C)
    mq = q_mask.astype(jnp.float32).reshape(B * T, 1)
    mk = k_mask.astype(jnp.float32)                                   # [B, T]

    wq_t = params["wq"].T                                             # [C, C]
    wkv_t = jnp.concatenate([params["wk"].T, params["wv"].T], axis=1)  # [C, 2C]
    wo_t = params["wo"].T                                             # [C, out_ch]
    bq = params["bq"].reshape(1, C)
    bkv = jnp.concatenate([params["bk"], params["bv"]]).reshape(1, 2 * C)
    bo = params["bo"].reshape(1, out_ch)
    ekt = get_used_rel_emb(params["emb_k"], T, window_size).T         # [KC, 2T-1]
    ev = get_used_rel_emb(params["emb_v"], T, window_size)            # [2T-1, KC]

    args = (x2d, c2d, mq, mk, wq_t, bq, wkv_t, bkv, wo_t, bo, ekt, ev)

    def _full_block(a):
        n = a.ndim
        return pl.BlockSpec(a.shape, lambda i, n=n: (0,) * n)

    out2d = pl.pallas_call(
        make_mha_kernel(B, T, n_heads, KC),
        out_shape=jax.ShapeDtypeStruct((B * T, out_ch), jnp.float32),
        grid=(1,),
        in_specs=[_full_block(a) for a in args],
        out_specs=pl.BlockSpec((B * T, out_ch), lambda i: (0, 0)),
        compiler_params=pltpu.CompilerParams(
            dimension_semantics=("arbitrary",)),
    )(*args)

    return jnp.transpose(out2d.reshape(B, T, out_ch), (0, 2, 1))


# ---------------------------------------------------------------------------
# Pure-JAX reference (mirrors the PyTorch math) for the correctness check.
# ---------------------------------------------------------------------------
def mha_reference(x, c, q_mask, k_mask, params, n_heads, window_size):
    B, C, T = x.shape
    H, KC = n_heads, C // n_heads
    xb = jnp.transpose(x, (0, 2, 1))
    cb = jnp.transpose(c, (0, 2, 1))
    q = jnp.einsum("btc,oc->bto", xb, params["wq"]) + params["bq"]
    k = jnp.einsum("btc,oc->bto", cb, params["wk"]) + params["bk"]
    v = jnp.einsum("btc,oc->bto", cb, params["wv"]) + params["bv"]
    qh = q.reshape(B, T, H, KC).transpose(0, 2, 1, 3) / math.sqrt(KC)
    kh = k.reshape(B, T, H, KC).transpose(0, 2, 1, 3)
    vh = v.reshape(B, T, H, KC).transpose(0, 2, 1, 3)

    ek = get_used_rel_emb(params["emb_k"], T, window_size)            # [2T-1, KC]
    ev = get_used_rel_emb(params["emb_v"], T, window_size)
    idx = (jnp.arange(T)[None, :] - jnp.arange(T)[:, None]) + (T - 1)
    relk, relv = ek[idx], ev[idx]                                     # [T, T, KC]

    scores = jnp.einsum("bhtd,bhsd->bhts", qh, kh)
    scores = scores + jnp.einsum("bhtd,tsd->bhts", qh, relk)
    amask = q_mask[:, None, :, None] * k_mask[:, None, None, :]
    scores = jnp.where(amask == 0, -1e4, scores)
    p = jax.nn.softmax(scores, axis=-1)
    o = jnp.einsum("bhts,bhsd->bhtd", p, vh)
    o = o + jnp.einsum("bhts,tsd->bhtd", p, relv)
    o = o.transpose(0, 2, 1, 3).reshape(B, T, C)
    out = jnp.einsum("btc,oc->bto", o, params["wo"]) + params["bo"]
    return jnp.transpose(out, (0, 2, 1))


# ---------------------------------------------------------------------------
# Deterministic parameter init (shapes match the PyTorch module's __init__).
# ---------------------------------------------------------------------------
def init_params(key, C, out_channels, n_heads, window_size):
    KC = C // n_heads
    ks = jax.random.split(key, 10)
    xav = math.sqrt(2.0 / (C + C))
    return dict(
        wq=jax.random.normal(ks[0], (C, C), jnp.float32) * xav,
        wk=jax.random.normal(ks[1], (C, C), jnp.float32) * xav,
        wv=jax.random.normal(ks[2], (C, C), jnp.float32) * xav,
        wo=jax.random.normal(ks[3], (out_channels, C), jnp.float32) / math.sqrt(C),
        bq=jax.random.normal(ks[4], (C,), jnp.float32) * 0.01,
        bk=jax.random.normal(ks[5], (C,), jnp.float32) * 0.01,
        bv=jax.random.normal(ks[6], (C,), jnp.float32) * 0.01,
        bo=jax.random.normal(ks[7], (out_channels,), jnp.float32) * 0.01,
        emb_k=jax.random.normal(ks[8], (1, 2 * window_size + 1, KC), jnp.float32) * KC ** -0.5,
        emb_v=jax.random.normal(ks[9], (1, 2 * window_size + 1, KC), jnp.float32) * KC ** -0.5,
    )


if __name__ == "__main__":
    B, C, T = 2, 32, 8            # batch, channels, sequence length
    H, ws, out_ch = 4, 4, 32      # n_heads, window_size, out_channels

    key = jax.random.PRNGKey(0)
    kx, kp = jax.random.split(key)
    x = jax.random.normal(kx, (B, C, T), jnp.float32)
    lengths = jnp.array([T, T - 3], dtype=jnp.int32)
    x_mask = (jnp.arange(T)[None, :] < lengths[:, None]).astype(jnp.float32)   # [B, T]
    params = init_params(kp, C, out_ch, H, ws)

    # self-attention: x == c; attn_mask == x_mask ⊗ x_mask
    out = multi_head_attention_pallas(x, x, x_mask, x_mask, params, H, ws)
    out = jax.block_until_ready(out)

    ref = mha_reference(x, x, x_mask, x_mask, params, H, ws)
    err = float(jnp.max(jnp.abs(out - ref)))
    assert jnp.allclose(out, ref, atol=2e-3, rtol=2e-3), f"max abs err {err}"
    print("KERNEL_OK")
</pallas_src>

<mosaic_0001>
module attributes {stable_mosaic.version = 11 : i64} {
  func.func @kernel(%arg0: i32, %arg1: memref<16x32xf32, #tpu.memory_space<vmem>>, %arg2: memref<16x32xf32, #tpu.memory_space<vmem>>, %arg3: memref<16x1xf32, #tpu.memory_space<vmem>>, %arg4: memref<2x8xf32, #tpu.memory_space<vmem>>, %arg5: memref<32x32xf32, #tpu.memory_space<vmem>>, %arg6: memref<1x32xf32, #tpu.memory_space<vmem>>, %arg7: memref<32x64xf32, #tpu.memory_space<vmem>>, %arg8: memref<1x64xf32, #tpu.memory_space<vmem>>, %arg9: memref<32x32xf32, #tpu.memory_space<vmem>>, %arg10: memref<1x32xf32, #tpu.memory_space<vmem>>, %arg11: memref<8x15xf32, #tpu.memory_space<vmem>>, %arg12: memref<15x8xf32, #tpu.memory_space<vmem>>, %arg13: memref<16x32xf32, #tpu.memory_space<vmem>>) attributes {dimension_semantics = [#tpu.dimension_semantics<arbitrary>], iteration_bounds = array<i64: 1>, scalar_prefetch = 0 : i64, scratch_operands = 0 : i64, tpu.core_type = #tpu.core_type<tc>, window_params = [{pipeline_mode = #tpu.pipeline_mode<synchronous>, transform_indices = @transform_0, window_bounds = array<i64: 16, 32>}, {pipeline_mode = #tpu.pipeline_mode<synchronous>, transform_indices = @transform_1, window_bounds = array<i64: 16, 32>}, {pipeline_mode = #tpu.pipeline_mode<synchronous>, transform_indices = @transform_2, window_bounds = array<i64: 16, 1>}, {pipeline_mode = #tpu.pipeline_mode<synchronous>, transform_indices = @transform_3, window_bounds = array<i64: 2, 8>}, {pipeline_mode = #tpu.pipeline_mode<synchronous>, transform_indices = @transform_4, window_bounds = array<i64: 32, 32>}, {pipeline_mode = #tpu.pipeline_mode<synchronous>, transform_indices = @transform_5, window_bounds = array<i64: 1, 32>}, {pipeline_mode = #tpu.pipeline_mode<synchronous>, transform_indices = @transform_6, window_bounds = array<i64: 32, 64>}, {pipeline_mode = #tpu.pipeline_mode<synchronous>, transform_indices = @transform_7, window_bounds = array<i64: 1, 64>}, {pipeline_mode = #tpu.pipeline_mode<synchronous>, transform_indices = @transform_8, window_bounds = array<i64: 32, 32>}, {pipeline_mode = #tpu.pipeline_mode<synchronous>, transform_indices = @transform_9, window_bounds = array<i64: 1, 32>}, {pipeline_mode = #tpu.pipeline_mode<synchronous>, transform_indices = @transform_10, window_bounds = array<i64: 8, 15>}, {pipeline_mode = #tpu.pipeline_mode<synchronous>, transform_indices = @transform_11, window_bounds = array<i64: 15, 8>}, {pipeline_mode = #tpu.pipeline_mode<synchronous>, transform_indices = @transform_12, window_bounds = array<i64: 16, 32>}]} {
    %c0 = arith.constant 0 : index
    %c0_0 = arith.constant 0 : index
    %0 = vector.load %arg1[%c0, %c0_0] : memref<16x32xf32, #tpu.memory_space<vmem>>, vector<16x32xf32>
    %c0_1 = arith.constant 0 : index
    %c0_2 = arith.constant 0 : index
    %1 = vector.load %arg2[%c0_1, %c0_2] : memref<16x32xf32, #tpu.memory_space<vmem>>, vector<16x32xf32>
    %c0_3 = arith.constant 0 : index
    %c0_4 = arith.constant 0 : index
    %2 = vector.load %arg3[%c0_3, %c0_4] : memref<16x1xf32, #tpu.memory_space<vmem>>, vector<16x1xf32>
    %c0_5 = arith.constant 0 : index
    %c0_6 = arith.constant 0 : index
    %3 = vector.load %arg4[%c0_5, %c0_6] : memref<2x8xf32, #tpu.memory_space<vmem>>, vector<2x8xf32>
    %c0_7 = arith.constant 0 : index
    %c0_8 = arith.constant 0 : index
    %4 = vector.load %arg11[%c0_7, %c0_8] : memref<8x15xf32, #tpu.memory_space<vmem>>, vector<8x15xf32>
    %c0_9 = arith.constant 0 : index
    %c0_10 = arith.constant 0 : index
    %5 = vector.load %arg12[%c0_9, %c0_10] : memref<15x8xf32, #tpu.memory_space<vmem>>, vector<15x8xf32>
    %c0_11 = arith.constant 0 : index
    %c0_12 = arith.constant 0 : index
    %6 = vector.load %arg5[%c0_11, %c0_12] : memref<32x32xf32, #tpu.memory_space<vmem>>, vector<32x32xf32>
    %cst = arith.constant dense<0.000000e+00> : vector<16x32xf32>
    %7 = tpu.matmul %0, %6, %cst {dimension_numbers = #tpu.dot_dimension_numbers<[1], [0], [0], [1], [0, 0, 1, 1], [], []>, precision = #tpu.contract_precision<fp32>} : vector<16x32xf32>, vector<32x32xf32>, vector<16x32xf32> -> vector<16x32xf32>
    %c0_13 = arith.constant 0 : index
    %c0_14 = arith.constant 0 : index
    %8 = vector.load %arg6[%c0_13, %c0_14] : memref<1x32xf32, #tpu.memory_space<vmem>>, vector<1x32xf32>
    %9 = vector.broadcast %8 : vector<1x32xf32> to vector<16x32xf32>
    %10 = arith.addf %7, %9 : vector<16x32xf32>
    %cst_15 = arith.constant 0.353553385 : f32
    %11 = vector.broadcast %cst_15 : f32 to vector<16x32xf32>
    %12 = arith.mulf %10, %11 : vector<16x32xf32>
    %c0_16 = arith.constant 0 : index
    %c0_17 = arith.constant 0 : index
    %13 = vector.load %arg7[%c0_16, %c0_17] : memref<32x64xf32, #tpu.memory_space<vmem>>, vector<32x64xf32>
    %cst_18 = arith.constant dense<0.000000e+00> : vector<16x64xf32>
    %14 = tpu.matmul %1, %13, %cst_18 {dimension_numbers = #tpu.dot_dimension_numbers<[1], [0], [0], [1], [0, 0, 1, 1], [], []>, precision = #tpu.contract_precision<fp32>} : vector<16x32xf32>, vector<32x64xf32>, vector<16x64xf32> -> vector<16x64xf32>
    %c0_19 = arith.constant 0 : index
    %c0_20 = arith.constant 0 : index
    %15 = vector.load %arg8[%c0_19, %c0_20] : memref<1x64xf32, #tpu.memory_space<vmem>>, vector<1x64xf32>
    %16 = vector.broadcast %15 : vector<1x64xf32> to vector<16x64xf32>
    %17 = arith.addf %14, %16 : vector<16x64xf32>
    %18 = vector.extract_strided_slice %2 {offsets = [0, 0], sizes = [8, 1], strides = [1, 1]} : vector<16x1xf32> to vector<8x1xf32>
    %19 = vector.extract_strided_slice %3 {offsets = [0, 0], sizes = [1, 8], strides = [1, 1]} : vector<2x8xf32> to vector<1x8xf32>
    %20 = vector.broadcast %18 : vector<8x1xf32> to vector<8x8xf32>
    %21 = vector.broadcast %19 : vector<1x8xf32> to vector<8x8xf32>
    %22 = arith.mulf %20, %21 : vector<8x8xf32>
    %cst_21 = arith.constant 0.000000e+00 : f32
    %23 = vector.broadcast %cst_21 : f32 to vector<8x8xf32>
    %24 = arith.cmpf oeq, %22, %23 : vector<8x8xf32>
    %25 = vector.extract_strided_slice %12 {offsets = [0, 0], sizes = [8, 8], strides = [1, 1]} : vector<16x32xf32> to vector<8x8xf32>
    %26 = vector.extract_strided_slice %17 {offsets = [0, 0], sizes = [8, 8], strides = [1, 1]} : vector<16x64xf32> to vector<8x8xf32>
    %27 = vector.extract_strided_slice %17 {offsets = [0, 32], sizes = [8, 8], strides = [1, 1]} : vector<16x64xf32> to vector<8x8xf32>
    %cst_22 = arith.constant dense<0.000000e+00> : vector<8x8xf32>
    %28 = tpu.matmul %25, %26, %cst_22 {dimension_numbers = #tpu.dot_dimension_numbers<[1], [1], [0], [0], [0, 0, 1, 0], [], []>, precision = #tpu.contract_precision<fp32>} : vector<8x8xf32>, vector<8x8xf32>, vector<8x8xf32> -> vector<8x8xf32>
    %cst_23 = arith.constant dense<0.000000e+00> : vector<8x15xf32>
    %29 = tpu.matmul %25, %4, %cst_23 {dimension_numbers = #tpu.dot_dimension_numbers<[1], [0], [0], [1], [0, 0, 1, 1], [], []>, precision = #tpu.contract_precision<fp32>} : vector<8x8xf32>, vector<8x15xf32>, vector<8x15xf32> -> vector<8x15xf32>
    %30 = vector.extract_strided_slice %29 {offsets = [0, 7], sizes = [1, 8], strides = [1, 1]} : vector<8x15xf32> to vector<1x8xf32>
    %31 = vector.extract_strided_slice %29 {offsets = [1, 6], sizes = [1, 8], strides = [1, 1]} : vector<8x15xf32> to vector<1x8xf32>
    %32 = vector.extract_strided_slice %29 {offsets = [2, 5], sizes = [1, 8], strides = [1, 1]} : vector<8x15xf32> to vector<1x8xf32>
    %33 = vector.extract_strided_slice %29 {offsets = [3, 4], sizes = [1, 8], strides = [1, 1]} : vector<8x15xf32> to vector<1x8xf32>
    %34 = vector.extract_strided_slice %29 {offsets = [4, 3], sizes = [1, 8], strides = [1, 1]} : vector<8x15xf32> to vector<1x8xf32>
    %35 = vector.extract_strided_slice %29 {offsets = [5, 2], sizes = [1, 8], strides = [1, 1]} : vector<8x15xf32> to vector<1x8xf32>
    %36 = vector.extract_strided_slice %29 {offsets = [6, 1], sizes = [1, 8], strides = [1, 1]} : vector<8x15xf32> to vector<1x8xf32>
    %37 = vector.extract_strided_slice %29 {offsets = [7, 0], sizes = [1, 8], strides = [1, 1]} : vector<8x15xf32> to vector<1x8xf32>
    %38 = tpu.concatenate %30, %31, %32, %33, %34, %35, %36, %37 in 0 : vector<1x8xf32>, vector<1x8xf32>, vector<1x8xf32>, vector<1x8xf32>, vector<1x8xf32>, vector<1x8xf32>, vector<1x8xf32>, vector<1x8xf32> -> vector<8x8xf32>
    %39 = arith.addf %28, %38 : vector<8x8xf32>
    %cst_24 = arith.constant -1.000000e+04 : f32
    %40 = vector.broadcast %cst_24 : f32 to vector<8x8xf32>
    %41 = arith.select %24, %40, %39 : vector<8x8xi1>, vector<8x8xf32>
    %cst_25 = arith.constant dense<0xFF800000> : vector<8xf32>
    %42 = vector.multi_reduction <maximumf>, %41, %cst_25 [1] : vector<8x8xf32> to vector<8xf32>
    %43 = vector.shape_cast %42 : vector<8xf32> to vector<8x1xf32>
    %44 = vector.broadcast %43 : vector<8x1xf32> to vector<8x8xf32>
    %45 = arith.subf %41, %44 : vector<8x8xf32>
    %46 = math.exp %45 : vector<8x8xf32>
    %cst_26 = arith.constant dense<0.000000e+00> : vector<8xf32>
    %47 = vector.multi_reduction <add>, %46, %cst_26 [1] : vector<8x8xf32> to vector<8xf32>
    %48 = vector.shape_cast %47 : vector<8xf32> to vector<8x1xf32>
    %49 = tpu.reciprocal %48 {approx = true} : vector<8x1xf32> -> vector<8x1xf32>
    %50 = arith.mulf %48, %49 : vector<8x1xf32>
    %cst_27 = arith.constant 2.000000e+00 : f32
    %51 = vector.broadcast %cst_27 : f32 to vector<8x1xf32>
    %52 = arith.subf %51, %50 : vector<8x1xf32>
    %53 = arith.mulf %49, %52 : vector<8x1xf32>
    %54 = vector.broadcast %53 : vector<8x1xf32> to vector<8x8xf32>
    %55 = arith.mulf %46, %54 : vector<8x8xf32>
    %cst_28 = arith.constant dense<0.000000e+00> : vector<8x8xf32>
    %56 = tpu.matmul %55, %27, %cst_28 {dimension_numbers = #tpu.dot_dimension_numbers<[1], [0], [0], [1], [0, 0, 1, 1], [], []>, precision = #tpu.contract_precision<fp32>} : vector<8x8xf32>, vector<8x8xf32>, vector<8x8xf32> -> vector<8x8xf32>
    %cst_29 = arith.constant 0.000000e+00 : f32
    %57 = vector.broadcast %cst_29 : f32 to vector<1x7xf32>
    %58 = vector.extract_strided_slice %55 {offsets = [0, 0], sizes = [1, 8], strides = [1, 1]} : vector<8x8xf32> to vector<1x8xf32>
    %59 = tpu.concatenate %57, %58 in 1 : vector<1x7xf32>, vector<1x8xf32> -> vector<1x15xf32>
    %cst_30 = arith.constant 0.000000e+00 : f32
    %60 = vector.broadcast %cst_30 : f32 to vector<1x6xf32>
    %61 = vector.extract_strided_slice %55 {offsets = [1, 0], sizes = [1, 8], strides = [1, 1]} : vector<8x8xf32> to vector<1x8xf32>
    %cst_31 = arith.constant 0.000000e+00 : f32
    %62 = vector.broadcast %cst_31 : f32 to vector<1x1xf32>
    %63 = tpu.concatenate %60, %61, %62 in 1 : vector<1x6xf32>, vector<1x8xf32>, vector<1x1xf32> -> vector<1x15xf32>
    %cst_32 = arith.constant 0.000000e+00 : f32
    %64 = vector.broadcast %cst_32 : f32 to vector<1x5xf32>
    %65 = vector.extract_strided_slice %55 {offsets = [2, 0], sizes = [1, 8], strides = [1, 1]} : vector<8x8xf32> to vector<1x8xf32>
    %cst_33 = arith.constant 0.000000e+00 : f32
    %66 = vector.broadcast %cst_33 : f32 to vector<1x2xf32>
    %67 = tpu.concatenate %64, %65, %66 in 1 : vector<1x5xf32>, vector<1x8xf32>, vector<1x2xf32> -> vector<1x15xf32>
    %cst_34 = arith.constant 0.000000e+00 : f32
    %68 = vector.broadcast %cst_34 : f32 to vector<1x4xf32>
    %69 = vector.extract_strided_slice %55 {offsets = [3, 0], sizes = [1, 8], strides = [1, 1]} : vector<8x8xf32> to vector<1x8xf32>
    %cst_35 = arith.constant 0.000000e+00 : f32
    %70 = vector.broadcast %cst_35 : f32 to vector<1x3xf32>
    %71 = tpu.concatenate %68, %69, %70 in 1 : vector<1x4xf32>, vector<1x8xf32>, vector<1x3xf32> -> vector<1x15xf32>
    %cst_36 = arith.constant 0.000000e+00 : f32
    %72 = vector.broadcast %cst_36 : f32 to vector<1x3xf32>
    %73 = vector.extract_strided_slice %55 {offsets = [4, 0], sizes = [1, 8], strides = [1, 1]} : vector<8x8xf32> to vector<1x8xf32>
    %cst_37 = arith.constant 0.000000e+00 : f32
    %74 = vector.broadcast %cst_37 : f32 to vector<1x4xf32>
    %75 = tpu.concatenate %72, %73, %74 in 1 : vector<1x3xf32>, vector<1x8xf32>, vector<1x4xf32> -> vector<1x15xf32>
    %cst_38 = arith.constant 0.000000e+00 : f32
    %76 = vector.broadcast %cst_38 : f32 to vector<1x2xf32>
    %77 = vector.extract_strided_slice %55 {offsets = [5, 0], sizes = [1, 8], strides = [1, 1]} : vector<8x8xf32> to vector<1x8xf32>
    %cst_39 = arith.constant 0.000000e+00 : f32
    %78 = vector.broadcast %cst_39 : f32 to vector<1x5xf32>
    %79 = tpu.concatenate %76, %77, %78 in 1 : vector<1x2xf32>, vector<1x8xf32>, vector<1x5xf32> -> vector<1x15xf32>
    %cst_40 = arith.constant 0.000000e+00 : f32
    %80 = vector.broadcast %cst_40 : f32 to vector<1x1xf32>
    %81 = vector.extract_strided_slice %55 {offsets = [6, 0], sizes = [1, 8], strides = [1, 1]} : vector<8x8xf32> to vector<1x8xf32>
    %cst_41 = arith.constant 0.000000e+00 : f32
    %82 = vector.broadcast %cst_41 : f32 to vector<1x6xf32>
    %83 = tpu.concatenate %80, %81, %82 in 1 : vector<1x1xf32>, vector<1x8xf32>, vector<1x6xf32> -> vector<1x15xf32>
    %84 = vector.extract_strided_slice %55 {offsets = [7, 0], sizes = [1, 8], strides = [1, 1]} : vector<8x8xf32> to vector<1x8xf32>
    %cst_42 = arith.constant 0.000000e+00 : f32
    %85 = vector.broadcast %cst_42 : f32 to vector<1x7xf32>
    %86 = tpu.concatenate %84, %85 in 1 : vector<1x8xf32>, vector<1x7xf32> -> vector<1x15xf32>
    %87 = tpu.concatenate %59, %63, %67, %71, %75, %79, %83, %86 in 0 : vector<1x15xf32>, vector<1x15xf32>, vector<1x15xf32>, vector<1x15xf32>, vector<1x15xf32>, vector<1x15xf32>, vector<1x15xf32>, vector<1x15xf32> -> vector<8x15xf32>
    %cst_43 = arith.constant dense<0.000000e+00> : vector<8x8xf32>
    %88 = tpu.matmul %87, %5, %cst_43 {dimension_numbers = #tpu.dot_dimension_numbers<[1], [0], [0], [1], [0, 0, 1, 1], [], []>, precision = #tpu.contract_precision<fp32>} : vector<8x15xf32>, vector<15x8xf32>, vector<8x8xf32> -> vector<8x8xf32>
    %89 = arith.addf %56, %88 : vector<8x8xf32>
    %90 = vector.extract_strided_slice %12 {offsets = [0, 8], sizes = [8, 8], strides = [1, 1]} : vector<16x32xf32> to vector<8x8xf32>
    %91 = vector.extract_strided_slice %17 {offsets = [0, 8], sizes = [8, 8], strides = [1, 1]} : vector<16x64xf32> to vector<8x8xf32>
    %92 = vector.extract_strided_slice %17 {offsets = [0, 40], sizes = [8, 8], strides = [1, 1]} : vector<16x64xf32> to vector<8x8xf32>
    %cst_44 = arith.constant dense<0.000000e+00> : vector<8x8xf32>
    %93 = tpu.matmul %90, %91, %cst_44 {dimension_numbers = #tpu.dot_dimension_numbers<[1], [1], [0], [0], [0, 0, 1, 0], [], []>, precision = #tpu.contract_precision<fp32>} : vector<8x8xf32>, vector<8x8xf32>, vector<8x8xf32> -> vector<8x8xf32>
    %cst_45 = arith.constant dense<0.000000e+00> : vector<8x15xf32>
    %94 = tpu.matmul %90, %4, %cst_45 {dimension_numbers = #tpu.dot_dimension_numbers<[1], [0], [0], [1], [0, 0, 1, 1], [], []>, precision = #tpu.contract_precision<fp32>} : vector<8x8xf32>, vector<8x15xf32>, vector<8x15xf32> -> vector<8x15xf32>
    %95 = vector.extract_strided_slice %94 {offsets = [0, 7], sizes = [1, 8], strides = [1, 1]} : vector<8x15xf32> to vector<1x8xf32>
    %96 = vector.extract_strided_slice %94 {offsets = [1, 6], sizes = [1, 8], strides = [1, 1]} : vector<8x15xf32> to vector<1x8xf32>
    %97 = vector.extract_strided_slice %94 {offsets = [2, 5], sizes = [1, 8], strides = [1, 1]} : vector<8x15xf32> to vector<1x8xf32>
    %98 = vector.extract_strided_slice %94 {offsets = [3, 4], sizes = [1, 8], strides = [1, 1]} : vector<8x15xf32> to vector<1x8xf32>
    %99 = vector.extract_strided_slice %94 {offsets = [4, 3], sizes = [1, 8], strides = [1, 1]} : vector<8x15xf32> to vector<1x8xf32>
    %100 = vector.extract_strided_slice %94 {offsets = [5, 2], sizes = [1, 8], strides = [1, 1]} : vector<8x15xf32> to vector<1x8xf32>
    %101 = vector.extract_strided_slice %94 {offsets = [6, 1], sizes = [1, 8], strides = [1, 1]} : vector<8x15xf32> to vector<1x8xf32>
    %102 = vector.extract_strided_slice %94 {offsets = [7, 0], sizes = [1, 8], strides = [1, 1]} : vector<8x15xf32> to vector<1x8xf32>
    %103 = tpu.concatenate %95, %96, %97, %98, %99, %100, %101, %102 in 0 : vector<1x8xf32>, vector<1x8xf32>, vector<1x8xf32>, vector<1x8xf32>, vector<1x8xf32>, vector<1x8xf32>, vector<1x8xf32>, vector<1x8xf32> -> vector<8x8xf32>
    %104 = arith.addf %93, %103 : vector<8x8xf32>
    %cst_46 = arith.constant -1.000000e+04 : f32
    %105 = vector.broadcast %cst_46 : f32 to vector<8x8xf32>
    %106 = arith.select %24, %105, %104 : vector<8x8xi1>, vector<8x8xf32>
    %cst_47 = arith.constant dense<0xFF800000> : vector<8xf32>
    %107 = vector.multi_reduction <maximumf>, %106, %cst_47 [1] : vector<8x8xf32> to vector<8xf32>
    %108 = vector.shape_cast %107 : vector<8xf32> to vector<8x1xf32>
    %109 = vector.broadcast %108 : vector<8x1xf32> to vector<8x8xf32>
    %110 = arith.subf %106, %109 : vector<8x8xf32>
    %111 = math.exp %110 : vector<8x8xf32>
    %cst_48 = arith.constant dense<0.000000e+00> : vector<8xf32>
    %112 = vector.multi_reduction <add>, %111, %cst_48 [1] : vector<8x8xf32> to vector<8xf32>
    %113 = vector.shape_cast %112 : vector<8xf32> to vector<8x1xf32>
    %114 = tpu.reciprocal %113 {approx = true} : vector<8x1xf32> -> vector<8x1xf32>
    %115 = arith.mulf %113, %114 : vector<8x1xf32>
    %cst_49 = arith.constant 2.000000e+00 : f32
    %116 = vector.broadcast %cst_49 : f32 to vector<8x1xf32>
    %117 = arith.subf %116, %115 : vector<8x1xf32>
    %118 = arith.mulf %114, %117 : vector<8x1xf32>
    %119 = vector.broadcast %118 : vector<8x1xf32> to vector<8x8xf32>
    %120 = arith.mulf %111, %119 : vector<8x8xf32>
    %cst_50 = arith.constant dense<0.000000e+00> : vector<8x8xf32>
    %121 = tpu.matmul %120, %92, %cst_50 {dimension_numbers = #tpu.dot_dimension_numbers<[1], [0], [0], [1], [0, 0, 1, 1], [], []>, precision = #tpu.contract_precision<fp32>} : vector<8x8xf32>, vector<8x8xf32>, vector<8x8xf32> -> vector<8x8xf32>
    %cst_51 = arith.constant 0.000000e+00 : f32
    %122 = vector.broadcast %cst_51 : f32 to vector<1x7xf32>
    %123 = vector.extract_strided_slice %120 {offsets = [0, 0], sizes = [1, 8], strides = [1, 1]} : vector<8x8xf32> to vector<1x8xf32>
    %124 = tpu.concatenate %122, %123 in 1 : vector<1x7xf32>, vector<1x8xf32> -> vector<1x15xf32>
    %cst_52 = arith.constant 0.000000e+00 : f32
    %125 = vector.broadcast %cst_52 : f32 to vector<1x6xf32>
    %126 = vector.extract_strided_slice %120 {offsets = [1, 0], sizes = [1, 8], strides = [1, 1]} : vector<8x8xf32> to vector<1x8xf32>
    %cst_53 = arith.constant 0.000000e+00 : f32
    %127 = vector.broadcast %cst_53 : f32 to vector<1x1xf32>
    %128 = tpu.concatenate %125, %126, %127 in 1 : vector<1x6xf32>, vector<1x8xf32>, vector<1x1xf32> -> vector<1x15xf32>
    %cst_54 = arith.constant 0.000000e+00 : f32
    %129 = vector.broadcast %cst_54 : f32 to vector<1x5xf32>
    %130 = vector.extract_strided_slice %120 {offsets = [2, 0], sizes = [1, 8], strides = [1, 1]} : vector<8x8xf32> to vector<1x8xf32>
    %cst_55 = arith.constant 0.000000e+00 : f32
    %131 = vector.broadcast %cst_55 : f32 to vector<1x2xf32>
    %132 = tpu.concatenate %129, %130, %131 in 1 : vector<1x5xf32>, vector<1x8xf32>, vector<1x2xf32> -> vector<1x15xf32>
    %cst_56 = arith.constant 0.000000e+00 : f32
    %133 = vector.broadcast %cst_56 : f32 to vector<1x4xf32>
    %134 = vector.extract_strided_slice %120 {offsets = [3, 0], sizes = [1, 8], strides = [1, 1]} : vector<8x8xf32> to vector<1x8xf32>
    %cst_57 = arith.constant 0.000000e+00 : f32
    %135 = vector.broadcast %cst_57 : f32 to vector<1x3xf32>
    %136 = tpu.concatenate %133, %134, %135 in 1 : vector<1x4xf32>, vector<1x8xf32>, vector<1x3xf32> -> vector<1x15xf32>
    %cst_58 = arith.constant 0.000000e+00 : f32
    %137 = vector.broadcast %cst_58 : f32 to vector<1x3xf32>
    %138 = vector.extract_strided_slice %120 {offsets = [4, 0], sizes = [1, 8], strides = [1, 1]} : vector<8x8xf32> to vector<1x8xf32>
    %cst_59 = arith.constant 0.000000e+00 : f32
    %139 = vector.broadcast %cst_59 : f32 to vector<1x4xf32>
    %140 = tpu.concatenate %137, %138, %139 in 1 : vector<1x3xf32>, vector<1x8xf32>, vector<1x4xf32> -> vector<1x15xf32>
    %cst_60 = arith.constant 0.000000e+00 : f32
    %141 = vector.broadcast %cst_60 : f32 to vector<1x2xf32>
    %142 = vector.extract_strided_slice %120 {offsets = [5, 0], sizes = [1, 8], strides = [1, 1]} : vector<8x8xf32> to vector<1x8xf32>
    %cst_61 = arith.constant 0.000000e+00 : f32
    %143 = vector.broadcast %cst_61 : f32 to vector<1x5xf32>
    %144 = tpu.concatenate %141, %142, %143 in 1 : vector<1x2xf32>, vector<1x8xf32>, vector<1x5xf32> -> vector<1x15xf32>
    %cst_62 = arith.constant 0.000000e+00 : f32
    %145 = vector.broadcast %cst_62 : f32 to vector<1x1xf32>
    %146 = vector.extract_strided_slice %120 {offsets = [6, 0], sizes = [1, 8], strides = [1, 1]} : vector<8x8xf32> to vector<1x8xf32>
    %cst_63 = arith.constant 0.000000e+00 : f32
    %147 = vector.broadcast %cst_63 : f32 to vector<1x6xf32>
    %148 = tpu.concatenate %145, %146, %147 in 1 : vector<1x1xf32>, vector<1x8xf32>, vector<1x6xf32> -> vector<1x15xf32>
    %149 = vector.extract_strided_slice %120 {offsets = [7, 0], sizes = [1, 8], strides = [1, 1]} : vector<8x8xf32> to vector<1x8xf32>
    %cst_64 = arith.constant 0.000000e+00 : f32
    %150 = vector.broadcast %cst_64 : f32 to vector<1x7xf32>
    %151 = tpu.concatenate %149, %150 in 1 : vector<1x8xf32>, vector<1x7xf32> -> vector<1x15xf32>
    %152 = tpu.concatenate %124, %128, %132, %136, %140, %144, %148, %151 in 0 : vector<1x15xf32>, vector<1x15xf32>, vector<1x15xf32>, vector<1x15xf32>, vector<1x15xf32>, vector<1x15xf32>, vector<1x15xf32>, vector<1x15xf32> -> vector<8x15xf32>
    %cst_65 = arith.constant dense<0.000000e+00> : vector<8x8xf32>
    %153 = tpu.matmul %152, %5, %cst_65 {dimension_numbers = #tpu.dot_dimension_numbers<[1], [0], [0], [1], [0, 0, 1, 1], [], []>, precision = #tpu.contract_precision<fp32>} : vector<8x15xf32>, vector<15x8xf32>, vector<8x8xf32> -> vector<8x8xf32>
    %154 = arith.addf %121, %153 : vector<8x8xf32>
    %155 = vector.extract_strided_slice %12 {offsets = [0, 16], sizes = [8, 8], strides = [1, 1]} : vector<16x32xf32> to vector<8x8xf32>
    %156 = vector.extract_strided_slice %17 {offsets = [0, 16], sizes = [8, 8], strides = [1, 1]} : vector<16x64xf32> to vector<8x8xf32>
    %157 = vector.extract_strided_slice %17 {offsets = [0, 48], sizes = [8, 8], strides = [1, 1]} : vector<16x64xf32> to vector<8x8xf32>
    %cst_66 = arith.constant dense<0.000000e+00> : vector<8x8xf32>
    %158 = tpu.matmul %155, %156, %cst_66 {dimension_numbers = #tpu.dot_dimension_numbers<[1], [1], [0], [0], [0, 0, 1, 0], [], []>, precision = #tpu.contract_precision<fp32>} : vector<8x8xf32>, vector<8x8xf32>, vector<8x8xf32> -> vector<8x8xf32>
    %cst_67 = arith.constant dense<0.000000e+00> : vector<8x15xf32>
    %159 = tpu.matmul %155, %4, %cst_67 {dimension_numbers = #tpu.dot_dimension_numbers<[1], [0], [0], [1], [0, 0, 1, 1], [], []>, precision = #tpu.contract_precision<fp32>} : vector<8x8xf32>, vector<8x15xf32>, vector<8x15xf32> -> vector<8x15xf32>
    %160 = vector.extract_strided_slice %159 {offsets = [0, 7], sizes = [1, 8], strides = [1, 1]} : vector<8x15xf32> to vector<1x8xf32>
    %161 = vector.extract_strided_slice %159 {offsets = [1, 6], sizes = [1, 8], strides = [1, 1]} : vector<8x15xf32> to vector<1x8xf32>
    %162 = vector.extract_strided_slice %159 {offsets = [2, 5], sizes = [1, 8], strides = [1, 1]} : vector<8x15xf32> to vector<1x8xf32>
    %163 = vector.extract_strided_slice %159 {offsets = [3, 4], sizes = [1, 8], strides = [1, 1]} : vector<8x15xf32> to vector<1x8xf32>
    %164 = vector.extract_strided_slice %159 {offsets = [4, 3], sizes = [1, 8], strides = [1, 1]} : vector<8x15xf32> to vector<1x8xf32>
    %165 = vector.extract_strided_slice %159 {offsets = [5, 2], sizes = [1, 8], strides = [1, 1]} : vector<8x15xf32> to vector<1x8xf32>
    %166 = vector.extract_strided_slice %159 {offsets = [6, 1], sizes = [1, 8], strides = [1, 1]} : vector<8x15xf32> to vector<1x8xf32>
    %167 = vector.extract_strided_slice %159 {offsets = [7, 0], sizes = [1, 8], strides = [1, 1]} : vector<8x15xf32> to vector<1x8xf32>
    %168 = tpu.concatenate %160, %161, %162, %163, %164, %165, %166, %167 in 0 : vector<1x8xf32>, vector<1x8xf32>, vector<1x8xf32>, vector<1x8xf32>, vector<1x8xf32>, vector<1x8xf32>, vector<1x8xf32>, vector<1x8xf32> -> vector<8x8xf32>
    %169 = arith.addf %158, %168 : vector<8x8xf32>
    %cst_68 = arith.constant -1.000000e+04 : f32
    %170 = vector.broadcast %cst_68 : f32 to vector<8x8xf32>
    %171 = arith.select %24, %170, %169 : vector<8x8xi1>, vector<8x8xf32>
    %cst_69 = arith.constant dense<0xFF800000> : vector<8xf32>
    %172 = vector.multi_reduction <maximumf>, %171, %cst_69 [1] : vector<8x8xf32> to vector<8xf32>
    %173 = vector.shape_cast %172 : vector<8xf32> to vector<8x1xf32>
    %174 = vector.broadcast %173 : vector<8x1xf32> to vector<8x8xf32>
    %175 = arith.subf %171, %174 : vector<8x8xf32>
    %176 = math.exp %175 : vector<8x8xf32>
    %cst_70 = arith.constant dense<0.000000e+00> : vector<8xf32>
    %177 = vector.multi_reduction <add>, %176, %cst_70 [1] : vector<8x8xf32> to vector<8xf32>
    %178 = vector.shape_cast %177 : vector<8xf32> to vector<8x1xf32>
    %179 = tpu.reciprocal %178 {approx = true} : vector<8x1xf32> -> vector<8x1xf32>
    %180 = arith.mulf %178, %179 : vector<8x1xf32>
    %cst_71 = arith.constant 2.000000e+00 : f32
    %181 = vector.broadcast %cst_71 : f32 to vector<8x1xf32>
    %182 = arith.subf %181, %180 : vector<8x1xf32>
    %183 = arith.mulf %179, %182 : vector<8x1xf32>
    %184 = vector.broadcast %183 : vector<8x1xf32> to vector<8x8xf32>
    %185 = arith.mulf %176, %184 : vector<8x8xf32>
    %cst_72 = arith.constant dense<0.000000e+00> : vector<8x8xf32>
    %186 = tpu.matmul %185, %157, %cst_72 {dimension_numbers = #tpu.dot_dimension_numbers<[1], [0], [0], [1], [0, 0, 1, 1], [], []>, precision = #tpu.contract_precision<fp32>} : vector<8x8xf32>, vector<8x8xf32>, vector<8x8xf32> -> vector<8x8xf32>
    %cst_73 = arith.constant 0.000000e+00 : f32
    %187 = vector.broadcast %cst_73 : f32 to vector<1x7xf32>
    %188 = vector.extract_strided_slice %185 {offsets = [0, 0], sizes = [1, 8], strides = [1, 1]} : vector<8x8xf32> to vector<1x8xf32>
    %189 = tpu.concatenate %187, %188 in 1 : vector<1x7xf32>, vector<1x8xf32> -> vector<1x15xf32>
    %cst_74 = arith.constant 0.000000e+00 : f32
    %190 = vector.broadcast %cst_74 : f32 to vector<1x6xf32>
    %191 = vector.extract_strided_slice %185 {offsets = [1, 0], sizes = [1, 8], strides = [1, 1]} : vector<8x8xf32> to vector<1x8xf32>
    %cst_75 = arith.constant 0.000000e+00 : f32
    %192 = vector.broadcast %cst_75 : f32 to vector<1x1xf32>
    %193 = tpu.concatenate %190, %191, %192 in 1 : vector<1x6xf32>, vector<1x8xf32>, vector<1x1xf32> -> vector<1x15xf32>
    %cst_76 = arith.constant 0.000000e+00 : f32
    %194 = vector.broadcast %cst_76 : f32 to vector<1x5xf32>
    %195 = vector.extract_strided_slice %185 {offsets = [2, 0], sizes = [1, 8], strides = [1, 1]} : vector<8x8xf32> to vector<1x8xf32>
    %cst_77 = arith.constant 0.000000e+00 : f32
    %196 = vector.broadcast %cst_77 : f32 to vector<1x2xf32>
    %197 = tpu.concatenate %194, %195, %196 in 1 : vector<1x5xf32>, vector<1x8xf32>, vector<1x2xf32> -> vector<1x15xf32>
    %cst_78 = arith.constant 0.000000e+00 : f32
    %198 = vector.broadcast %cst_78 : f32 to vector<1x4xf32>
    %199 = vector.extract_strided_slice %185 {offsets = [3, 0], sizes = [1, 8], strides = [1, 1]} : vector<8x8xf32> to vector<1x8xf32>
    %cst_79 = arith.constant 0.000000e+00 : f32
    %200 = vector.broadcast %cst_79 : f32 to vector<1x3xf32>
    %201 = tpu.concatenate %198, %199, %200 in 1 : vector<1x4xf32>, vector<1x8xf32>, vector<1x3xf32> -> vector<1x15xf32>
    %cst_80 = arith.constant 0.000000e+00 : f32
    %202 = vector.broadcast %cst_80 : f32 to vector<1x3xf32>
    %203 = vector.extract_strided_slice %185 {offsets = [4, 0], sizes = [1, 8], strides = [1, 1]} : vector<8x8xf32> to vector<1x8xf32>
    %cst_81 = arith.constant 0.000000e+00 : f32
    %204 = vector.broadcast %cst_81 : f32 to vector<1x4xf32>
    %205 = tpu.concatenate %202, %203, %204 in 1 : vector<1x3xf32>, vector<1x8xf32>, vector<1x4xf32> -> vector<1x15xf32>
    %cst_82 = arith.constant 0.000000e+00 : f32
    %206 = vector.broadcast %cst_82 : f32 to vector<1x2xf32>
    %207 = vector.extract_strided_slice %185 {offsets = [5, 0], sizes = [1, 8], strides = [1, 1]} : vector<8x8xf32> to vector<1x8xf32>
    %cst_83 = arith.constant 0.000000e+00 : f32
    %208 = vector.broadcast %cst_83 : f32 to vector<1x5xf32>
    %209 = tpu.concatenate %206, %207, %208 in 1 : vector<1x2xf32>, vector<1x8xf32>, vector<1x5xf32> -> vector<1x15xf32>
    %cst_84 = arith.constant 0.000000e+00 : f32
    %210 = vector.broadcast %cst_84 : f32 to vector<1x1xf32>
    %211 = vector.extract_strided_slice %185 {offsets = [6, 0], sizes = [1, 8], strides = [1, 1]} : vector<8x8xf32> to vector<1x8xf32>
    %cst_85 = arith.constant 0.000000e+00 : f32
    %212 = vector.broadcast %cst_85 : f32 to vector<1x6xf32>
    %213 = tpu.concatenate %210, %211, %212 in 1 : vector<1x1xf32>, vector<1x8xf32>, vector<1x6xf32> -> vector<1x15xf32>
    %214 = vector.extract_strided_slice %185 {offsets = [7, 0], sizes = [1, 8], strides = [1, 1]} : vector<8x8xf32> to vector<1x8xf32>
    %cst_86 = arith.constant 0.000000e+00 : f32
    %215 = vector.broadcast %cst_86 : f32 to vector<1x7xf32>
    %216 = tpu.concatenate %214, %215 in 1 : vector<1x8xf32>, vector<1x7xf32> -> vector<1x15xf32>
    %217 = tpu.concatenate %189, %193, %197, %201, %205, %209, %213, %216 in 0 : vector<1x15xf32>, vector<1x15xf32>, vector<1x15xf32>, vector<1x15xf32>, vector<1x15xf32>, vector<1x15xf32>, vector<1x15xf32>, vector<1x15xf32> -> vector<8x15xf32>
    %cst_87 = arith.constant dense<0.000000e+00> : vector<8x8xf32>
    %218 = tpu.matmul %217, %5, %cst_87 {dimension_numbers = #tpu.dot_dimension_numbers<[1], [0], [0], [1], [0, 0, 1, 1], [], []>, precision = #tpu.contract_precision<fp32>} : vector<8x15xf32>, vector<15x8xf32>, vector<8x8xf32> -> vector<8x8xf32>
    %219 = arith.addf %186, %218 : vector<8x8xf32>
    %220 = vector.extract_strided_slice %12 {offsets = [0, 24], sizes = [8, 8], strides = [1, 1]} : vector<16x32xf32> to vector<8x8xf32>
    %221 = vector.extract_strided_slice %17 {offsets = [0, 24], sizes = [8, 8], strides = [1, 1]} : vector<16x64xf32> to vector<8x8xf32>
    %222 = vector.extract_strided_slice %17 {offsets = [0, 56], sizes = [8, 8], strides = [1, 1]} : vector<16x64xf32> to vector<8x8xf32>
    %cst_88 = arith.constant dense<0.000000e+00> : vector<8x8xf32>
    %223 = tpu.matmul %220, %221, %cst_88 {dimension_numbers = #tpu.dot_dimension_numbers<[1], [1], [0], [0], [0, 0, 1, 0], [], []>, precision = #tpu.contract_precision<fp32>} : vector<8x8xf32>, vector<8x8xf32>, vector<8x8xf32> -> vector<8x8xf32>
    %cst_89 = arith.constant dense<0.000000e+00> : vector<8x15xf32>
    %224 = tpu.matmul %220, %4, %cst_89 {dimension_numbers = #tpu.dot_dimension_numbers<[1], [0], [0], [1], [0, 0, 1, 1], [], []>, precision = #tpu.contract_precision<fp32>} : vector<8x8xf32>, vector<8x15xf32>, vector<8x15xf32> -> vector<8x15xf32>
    %225 = vector.extract_strided_slice %224 {offsets = [0, 7], sizes = [1, 8], strides = [1, 1]} : vector<8x15xf32> to vector<1x8xf32>
    %226 = vector.extract_strided_slice %224 {offsets = [1, 6], sizes = [1, 8], strides = [1, 1]} : vector<8x15xf32> to vector<1x8xf32>
    %227 = vector.extract_strided_slice %224 {offsets = [2, 5], sizes = [1, 8], strides = [1, 1]} : vector<8x15xf32> to vector<1x8xf32>
    %228 = vector.extract_strided_slice %224 {offsets = [3, 4], sizes = [1, 8], strides = [1, 1]} : vector<8x15xf32> to vector<1x8xf32>
    %229 = vector.extract_strided_slice %224 {offsets = [4, 3], sizes = [1, 8], strides = [1, 1]} : vector<8x15xf32> to vector<1x8xf32>
    %230 = vector.extract_strided_slice %224 {offsets = [5, 2], sizes = [1, 8], strides = [1, 1]} : vector<8x15xf32> to vector<1x8xf32>
    %231 = vector.extract_strided_slice %224 {offsets = [6, 1], sizes = [1, 8], strides = [1, 1]} : vector<8x15xf32> to vector<1x8xf32>
    %232 = vector.extract_strided_slice %224 {offsets = [7, 0], sizes = [1, 8], strides = [1, 1]} : vector<8x15xf32> to vector<1x8xf32>
    %233 = tpu.concatenate %225, %226, %227, %228, %229, %230, %231, %232 in 0 : vector<1x8xf32>, vector<1x8xf32>, vector<1x8xf32>, vector<1x8xf32>, vector<1x8xf32>, vector<1x8xf32>, vector<1x8xf32>, vector<1x8xf32> -> vector<8x8xf32>
    %234 = arith.addf %223, %233 : vector<8x8xf32>
    %cst_90 = arith.constant -1.000000e+04 : f32
    %235 = vector.broadcast %cst_90 : f32 to vector<8x8xf32>
    %236 = arith.select %24, %235, %234 : vector<8x8xi1>, vector<8x8xf32>
    %cst_91 = arith.constant dense<0xFF800000> : vector<8xf32>
    %237 = vector.multi_reduction <maximumf>, %236, %cst_91 [1] : vector<8x8xf32> to vector<8xf32>
    %238 = vector.shape_cast %237 : vector<8xf32> to vector<8x1xf32>
    %239 = vector.broadcast %238 : vector<8x1xf32> to vector<8x8xf32>
    %240 = arith.subf %236, %239 : vector<8x8xf32>
    %241 = math.exp %240 : vector<8x8xf32>
    %cst_92 = arith.constant dense<0.000000e+00> : vector<8xf32>
    %242 = vector.multi_reduction <add>, %241, %cst_92 [1] : vector<8x8xf32> to vector<8xf32>
    %243 = vector.shape_cast %242 : vector<8xf32> to vector<8x1xf32>
    %244 = tpu.reciprocal %243 {approx = true} : vector<8x1xf32> -> vector<8x1xf32>
    %245 = arith.mulf %243, %244 : vector<8x1xf32>
    %cst_93 = arith.constant 2.000000e+00 : f32
    %246 = vector.broadcast %cst_93 : f32 to vector<8x1xf32>
    %247 = arith.subf %246, %245 : vector<8x1xf32>
    %248 = arith.mulf %244, %247 : vector<8x1xf32>
    %249 = vector.broadcast %248 : vector<8x1xf32> to vector<8x8xf32>
    %250 = arith.mulf %241, %249 : vector<8x8xf32>
    %cst_94 = arith.constant dense<0.000000e+00> : vector<8x8xf32>
    %251 = tpu.matmul %250, %222, %cst_94 {dimension_numbers = #tpu.dot_dimension_numbers<[1], [0], [0], [1], [0, 0, 1, 1], [], []>, precision = #tpu.contract_precision<fp32>} : vector<8x8xf32>, vector<8x8xf32>, vector<8x8xf32> -> vector<8x8xf32>
    %cst_95 = arith.constant 0.000000e+00 : f32
    %252 = vector.broadcast %cst_95 : f32 to vector<1x7xf32>
    %253 = vector.extract_strided_slice %250 {offsets = [0, 0], sizes = [1, 8], strides = [1, 1]} : vector<8x8xf32> to vector<1x8xf32>
    %254 = tpu.concatenate %252, %253 in 1 : vector<1x7xf32>, vector<1x8xf32> -> vector<1x15xf32>
    %cst_96 = arith.constant 0.000000e+00 : f32
    %255 = vector.broadcast %cst_96 : f32 to vector<1x6xf32>
    %256 = vector.extract_strided_slice %250 {offsets = [1, 0], sizes = [1, 8], strides = [1, 1]} : vector<8x8xf32> to vector<1x8xf32>
    %cst_97 = arith.constant 0.000000e+00 : f32
    %257 = vector.broadcast %cst_97 : f32 to vector<1x1xf32>
    %258 = tpu.concatenate %255, %256, %257 in 1 : vector<1x6xf32>, vector<1x8xf32>, vector<1x1xf32> -> vector<1x15xf32>
    %cst_98 = arith.constant 0.000000e+00 : f32
    %259 = vector.broadcast %cst_98 : f32 to vector<1x5xf32>
    %260 = vector.extract_strided_slice %250 {offsets = [2, 0], sizes = [1, 8], strides = [1, 1]} : vector<8x8xf32> to vector<1x8xf32>
    %cst_99 = arith.constant 0.000000e+00 : f32
    %261 = vector.broadcast %cst_99 : f32 to vector<1x2xf32>
    %262 = tpu.concatenate %259, %260, %261 in 1 : vector<1x5xf32>, vector<1x8xf32>, vector<1x2xf32> -> vector<1x15xf32>
    %cst_100 = arith.constant 0.000000e+00 : f32
    %263 = vector.broadcast %cst_100 : f32 to vector<1x4xf32>
    %264 = vector.extract_strided_slice %250 {offsets = [3, 0], sizes = [1, 8], strides = [1, 1]} : vector<8x8xf32> to vector<1x8xf32>
    %cst_101 = arith.constant 0.000000e+00 : f32
    %265 = vector.broadcast %cst_101 : f32 to vector<1x3xf32>
    %266 = tpu.concatenate %263, %264, %265 in 1 : vector<1x4xf32>, vector<1x8xf32>, vector<1x3xf32> -> vector<1x15xf32>
    %cst_102 = arith.constant 0.000000e+00 : f32
    %267 = vector.broadcast %cst_102 : f32 to vector<1x3xf32>
    %268 = vector.extract_strided_slice %250 {offsets = [4, 0], sizes = [1, 8], strides = [1, 1]} : vector<8x8xf32> to vector<1x8xf32>
    %cst_103 = arith.constant 0.000000e+00 : f32
    %269 = vector.broadcast %cst_103 : f32 to vector<1x4xf32>
    %270 = tpu.concatenate %267, %268, %269 in 1 : vector<1x3xf32>, vector<1x8xf32>, vector<1x4xf32> -> vector<1x15xf32>
    %cst_104 = arith.constant 0.000000e+00 : f32
    %271 = vector.broadcast %cst_104 : f32 to vector<1x2xf32>
    %272 = vector.extract_strided_slice %250 {offsets = [5, 0], sizes = [1, 8], strides = [1, 1]} : vector<8x8xf32> to vector<1x8xf32>
    %cst_105 = arith.constant 0.000000e+00 : f32
    %273 = vector.broadcast %cst_105 : f32 to vector<1x5xf32>
    %274 = tpu.concatenate %271, %272, %273 in 1 : vector<1x2xf32>, vector<1x8xf32>, vector<1x5xf32> -> vector<1x15xf32>
    %cst_106 = arith.constant 0.000000e+00 : f32
    %275 = vector.broadcast %cst_106 : f32 to vector<1x1xf32>
    %276 = vector.extract_strided_slice %250 {offsets = [6, 0], sizes = [1, 8], strides = [1, 1]} : vector<8x8xf32> to vector<1x8xf32>
    %cst_107 = arith.constant 0.000000e+00 : f32
    %277 = vector.broadcast %cst_107 : f32 to vector<1x6xf32>
    %278 = tpu.concatenate %275, %276, %277 in 1 : vector<1x1xf32>, vector<1x8xf32>, vector<1x6xf32> -> vector<1x15xf32>
    %279 = vector.extract_strided_slice %250 {offsets = [7, 0], sizes = [1, 8], strides = [1, 1]} : vector<8x8xf32> to vector<1x8xf32>
    %cst_108 = arith.constant 0.000000e+00 : f32
    %280 = vector.broadcast %cst_108 : f32 to vector<1x7xf32>
    %281 = tpu.concatenate %279, %280 in 1 : vector<1x8xf32>, vector<1x7xf32> -> vector<1x15xf32>
    %282 = tpu.concatenate %254, %258, %262, %266, %270, %274, %278, %281 in 0 : vector<1x15xf32>, vector<1x15xf32>, vector<1x15xf32>, vector<1x15xf32>, vector<1x15xf32>, vector<1x15xf32>, vector<1x15xf32>, vector<1x15xf32> -> vector<8x15xf32>
    %cst_109 = arith.constant dense<0.000000e+00> : vector<8x8xf32>
    %283 = tpu.matmul %282, %5, %cst_109 {dimension_numbers = #tpu.dot_dimension_numbers<[1], [0], [0], [1], [0, 0, 1, 1], [], []>, precision = #tpu.contract_precision<fp32>} : vector<8x15xf32>, vector<15x8xf32>, vector<8x8xf32> -> vector<8x8xf32>
    %284 = arith.addf %251, %283 : vector<8x8xf32>
    %285 = tpu.concatenate %89, %154, %219, %284 in 1 : vector<8x8xf32>, vector<8x8xf32>, vector<8x8xf32>, vector<8x8xf32> -> vector<8x32xf32>
    %286 = vector.extract_strided_slice %2 {offsets = [8, 0], sizes = [8, 1], strides = [1, 1]} : vector<16x1xf32> to vector<8x1xf32>
    %287 = vector.extract_strided_slice %3 {offsets = [1, 0], sizes = [1, 8], strides = [1, 1]} : vector<2x8xf32> to vector<1x8xf32>
    %288 = vector.broadcast %286 : vector<8x1xf32> to vector<8x8xf32>
    %289 = vector.broadcast %287 : vector<1x8xf32> to vector<8x8xf32>
    %290 = arith.mulf %288, %289 : vector<8x8xf32>
    %cst_110 = arith.constant 0.000000e+00 : f32
    %291 = vector.broadcast %cst_110 : f32 to vector<8x8xf32>
    %292 = arith.cmpf oeq, %290, %291 : vector<8x8xf32>
    %293 = vector.extract_strided_slice %12 {offsets = [8, 0], sizes = [8, 8], strides = [1, 1]} : vector<16x32xf32> to vector<8x8xf32>
    %294 = vector.extract_strided_slice %17 {offsets = [8, 0], sizes = [8, 8], strides = [1, 1]} : vector<16x64xf32> to vector<8x8xf32>
    %295 = vector.extract_strided_slice %17 {offsets = [8, 32], sizes = [8, 8], strides = [1, 1]} : vector<16x64xf32> to vector<8x8xf32>
    %cst_111 = arith.constant dense<0.000000e+00> : vector<8x8xf32>
    %296 = tpu.matmul %293, %294, %cst_111 {dimension_numbers = #tpu.dot_dimension_numbers<[1], [1], [0], [0], [0, 0, 1, 0], [], []>, precision = #tpu.contract_precision<fp32>} : vector<8x8xf32>, vector<8x8xf32>, vector<8x8xf32> -> vector<8x8xf32>
    %cst_112 = arith.constant dense<0.000000e+00> : vector<8x15xf32>
    %297 = tpu.matmul %293, %4, %cst_112 {dimension_numbers = #tpu.dot_dimension_numbers<[1], [0], [0], [1], [0, 0, 1, 1], [], []>, precision = #tpu.contract_precision<fp32>} : vector<8x8xf32>, vector<8x15xf32>, vector<8x15xf32> -> vector<8x15xf32>
    %298 = vector.extract_strided_slice %297 {offsets = [0, 7], sizes = [1, 8], strides = [1, 1]} : vector<8x15xf32> to vector<1x8xf32>
    %299 = vector.extract_strided_slice %297 {offsets = [1, 6], sizes = [1, 8], strides = [1, 1]} : vector<8x15xf32> to vector<1x8xf32>
    %300 = vector.extract_strided_slice %297 {offsets = [2, 5], sizes = [1, 8], strides = [1, 1]} : vector<8x15xf32> to vector<1x8xf32>
    %301 = vector.extract_strided_slice %297 {offsets = [3, 4], sizes = [1, 8], strides = [1, 1]} : vector<8x15xf32> to vector<1x8xf32>
    %302 = vector.extract_strided_slice %297 {offsets = [4, 3], sizes = [1, 8], strides = [1, 1]} : vector<8x15xf32> to vector<1x8xf32>
    %303 = vector.extract_strided_slice %297 {offsets = [5, 2], sizes = [1, 8], strides = [1, 1]} : vector<8x15xf32> to vector<1x8xf32>
    %304 = vector.extract_strided_slice %297 {offsets = [6, 1], sizes = [1, 8], strides = [1, 1]} : vector<8x15xf32> to vector<1x8xf32>
    %305 = vector.extract_strided_slice %297 {offsets = [7, 0], sizes = [1, 8], strides = [1, 1]} : vector<8x15xf32> to vector<1x8xf32>
    %306 = tpu.concatenate %298, %299, %300, %301, %302, %303, %304, %305 in 0 : vector<1x8xf32>, vector<1x8xf32>, vector<1x8xf32>, vector<1x8xf32>, vector<1x8xf32>, vector<1x8xf32>, vector<1x8xf32>, vector<1x8xf32> -> vector<8x8xf32>
    %307 = arith.addf %296, %306 : vector<8x8xf32>
    %cst_113 = arith.constant -1.000000e+04 : f32
    %308 = vector.broadcast %cst_113 : f32 to vector<8x8xf32>
    %309 = arith.select %292, %308, %307 : vector<8x8xi1>, vector<8x8xf32>
    %cst_114 = arith.constant dense<0xFF800000> : vector<8xf32>
    %310 = vector.multi_reduction <maximumf>, %309, %cst_114 [1] : vector<8x8xf32> to vector<8xf32>
    %311 = vector.shape_cast %310 : vector<8xf32> to vector<8x1xf32>
    %312 = vector.broadcast %311 : vector<8x1xf32> to vector<8x8xf32>
    %313 = arith.subf %309, %312 : vector<8x8xf32>
    %314 = math.exp %313 : vector<8x8xf32>
    %cst_115 = arith.constant dense<0.000000e+00> : vector<8xf32>
    %315 = vector.multi_reduction <add>, %314, %cst_115 [1] : vector<8x8xf32> to vector<8xf32>
    %316 = vector.shape_cast %315 : vector<8xf32> to vector<8x1xf32>
    %317 = tpu.reciprocal %316 {approx = true} : vector<8x1xf32> -> vector<8x1xf32>
    %318 = arith.mulf %316, %317 : vector<8x1xf32>
    %cst_116 = arith.constant 2.000000e+00 : f32
    %319 = vector.broadcast %cst_116 : f32 to vector<8x1xf32>
    %320 = arith.subf %319, %318 : vector<8x1xf32>
    %321 = arith.mulf %317, %320 : vector<8x1xf32>
    %322 = vector.broadcast %321 : vector<8x1xf32> to vector<8x8xf32>
    %323 = arith.mulf %314, %322 : vector<8x8xf32>
    %cst_117 = arith.constant dense<0.000000e+00> : vector<8x8xf32>
    %324 = tpu.matmul %323, %295, %cst_117 {dimension_numbers = #tpu.dot_dimension_numbers<[1], [0], [0], [1], [0, 0, 1, 1], [], []>, precision = #tpu.contract_precision<fp32>} : vector<8x8xf32>, vector<8x8xf32>, vector<8x8xf32> -> vector<8x8xf32>
    %cst_118 = arith.constant 0.000000e+00 : f32
    %325 = vector.broadcast %cst_118 : f32 to vector<1x7xf32>
    %326 = vector.extract_strided_slice %323 {offsets = [0, 0], sizes = [1, 8], strides = [1, 1]} : vector<8x8xf32> to vector<1x8xf32>
    %327 = tpu.concatenate %325, %326 in 1 : vector<1x7xf32>, vector<1x8xf32> -> vector<1x15xf32>
    %cst_119 = arith.constant 0.000000e+00 : f32
    %328 = vector.broadcast %cst_119 : f32 to vector<1x6xf32>
    %329 = vector.extract_strided_slice %323 {offsets = [1, 0], sizes = [1, 8], strides = [1, 1]} : vector<8x8xf32> to vector<1x8xf32>
    %cst_120 = arith.constant 0.000000e+00 : f32
    %330 = vector.broadcast %cst_120 : f32 to vector<1x1xf32>
    %331 = tpu.concatenate %328, %329, %330 in 1 : vector<1x6xf32>, vector<1x8xf32>, vector<1x1xf32> -> vector<1x15xf32>
    %cst_121 = arith.constant 0.000000e+00 : f32
    %332 = vector.broadcast %cst_121 : f32 to vector<1x5xf32>
    %333 = vector.extract_strided_slice %323 {offsets = [2, 0], sizes = [1, 8], strides = [1, 1]} : vector<8x8xf32> to vector<1x8xf32>
    %cst_122 = arith.constant 0.000000e+00 : f32
    %334 = vector.broadcast %cst_122 : f32 to vector<1x2xf32>
    %335 = tpu.concatenate %332, %333, %334 in 1 : vector<1x5xf32>, vector<1x8xf32>, vector<1x2xf32> -> vector<1x15xf32>
    %cst_123 = arith.constant 0.000000e+00 : f32
    %336 = vector.broadcast %cst_123 : f32 to vector<1x4xf32>
    %337 = vector.extract_strided_slice %323 {offsets = [3, 0], sizes = [1, 8], strides = [1, 1]} : vector<8x8xf32> to vector<1x8xf32>
    %cst_124 = arith.constant 0.000000e+00 : f32
    %338 = vector.broadcast %cst_124 : f32 to vector<1x3xf32>
    %339 = tpu.concatenate %336, %337, %338 in 1 : vector<1x4xf32>, vector<1x8xf32>, vector<1x3xf32> -> vector<1x15xf32>
    %cst_125 = arith.constant 0.000000e+00 : f32
    %340 = vector.broadcast %cst_125 : f32 to vector<1x3xf32>
    %341 = vector.extract_strided_slice %323 {offsets = [4, 0], sizes = [1, 8], strides = [1, 1]} : vector<8x8xf32> to vector<1x8xf32>
    %cst_126 = arith.constant 0.000000e+00 : f32
    %342 = vector.broadcast %cst_126 : f32 to vector<1x4xf32>
    %343 = tpu.concatenate %340, %341, %342 in 1 : vector<1x3xf32>, vector<1x8xf32>, vector<1x4xf32> -> vector<1x15xf32>
    %cst_127 = arith.constant 0.000000e+00 : f32
    %344 = vector.broadcast %cst_127 : f32 to vector<1x2xf32>
    %345 = vector.extract_strided_slice %323 {offsets = [5, 0], sizes = [1, 8], strides = [1, 1]} : vector<8x8xf32> to vector<1x8xf32>
    %cst_128 = arith.constant 0.000000e+00 : f32
    %346 = vector.broadcast %cst_128 : f32 to vector<1x5xf32>
    %347 = tpu.concatenate %344, %345, %346 in 1 : vector<1x2xf32>, vector<1x8xf32>, vector<1x5xf32> -> vector<1x15xf32>
    %cst_129 = arith.constant 0.000000e+00 : f32
    %348 = vector.broadcast %cst_129 : f32 to vector<1x1xf32>
    %349 = vector.extract_strided_slice %323 {offsets = [6, 0], sizes = [1, 8], strides = [1, 1]} : vector<8x8xf32> to vector<1x8xf32>
    %cst_130 = arith.constant 0.000000e+00 : f32
    %350 = vector.broadcast %cst_130 : f32 to vector<1x6xf32>
    %351 = tpu.concatenate %348, %349, %350 in 1 : vector<1x1xf32>, vector<1x8xf32>, vector<1x6xf32> -> vector<1x15xf32>
    %352 = vector.extract_strided_slice %323 {offsets = [7, 0], sizes = [1, 8], strides = [1, 1]} : vector<8x8xf32> to vector<1x8xf32>
    %cst_131 = arith.constant 0.000000e+00 : f32
    %353 = vector.broadcast %cst_131 : f32 to vector<1x7xf32>
    %354 = tpu.concatenate %352, %353 in 1 : vector<1x8xf32>, vector<1x7xf32> -> vector<1x15xf32>
    %355 = tpu.concatenate %327, %331, %335, %339, %343, %347, %351, %354 in 0 : vector<1x15xf32>, vector<1x15xf32>, vector<1x15xf32>, vector<1x15xf32>, vector<1x15xf32>, vector<1x15xf32>, vector<1x15xf32>, vector<1x15xf32> -> vector<8x15xf32>
    %cst_132 = arith.constant dense<0.000000e+00> : vector<8x8xf32>
    %356 = tpu.matmul %355, %5, %cst_132 {dimension_numbers = #tpu.dot_dimension_numbers<[1], [0], [0], [1], [0, 0, 1, 1], [], []>, precision = #tpu.contract_precision<fp32>} : vector<8x15xf32>, vector<15x8xf32>, vector<8x8xf32> -> vector<8x8xf32>
    %357 = arith.addf %324, %356 : vector<8x8xf32>
    %358 = vector.extract_strided_slice %12 {offsets = [8, 8], sizes = [8, 8], strides = [1, 1]} : vector<16x32xf32> to vector<8x8xf32>
    %359 = vector.extract_strided_slice %17 {offsets = [8, 8], sizes = [8, 8], strides = [1, 1]} : vector<16x64xf32> to vector<8x8xf32>
    %360 = vector.extract_strided_slice %17 {offsets = [8, 40], sizes = [8, 8], strides = [1, 1]} : vector<16x64xf32> to vector<8x8xf32>
    %cst_133 = arith.constant dense<0.000000e+00> : vector<8x8xf32>
    %361 = tpu.matmul %358, %359, %cst_133 {dimension_numbers = #tpu.dot_dimension_numbers<[1], [1], [0], [0], [0, 0, 1, 0], [], []>, precision = #tpu.contract_precision<fp32>} : vector<8x8xf32>, vector<8x8xf32>, vector<8x8xf32> -> vector<8x8xf32>
    %cst_134 = arith.constant dense<0.000000e+00> : vector<8x15xf32>
    %362 = tpu.matmul %358, %4, %cst_134 {dimension_numbers = #tpu.dot_dimension_numbers<[1], [0], [0], [1], [0, 0, 1, 1], [], []>, precision = #tpu.contract_precision<fp32>} : vector<8x8xf32>, vector<8x15xf32>, vector<8x15xf32> -> vector<8x15xf32>
    %363 = vector.extract_strided_slice %362 {offsets = [0, 7], sizes = [1, 8], strides = [1, 1]} : vector<8x15xf32> to vector<1x8xf32>
    %364 = vector.extract_strided_slice %362 {offsets = [1, 6], sizes = [1, 8], strides = [1, 1]} : vector<8x15xf32> to vector<1x8xf32>
    %365 = vector.extract_strided_slice %362 {offsets = [2, 5], sizes = [1, 8], strides = [1, 1]} : vector<8x15xf32> to vector<1x8xf32>
    %366 = vector.extract_strided_slice %362 {offsets = [3, 4], sizes = [1, 8], strides = [1, 1]} : vector<8x15xf32> to vector<1x8xf32>
    %367 = vector.extract_strided_slice %362 {offsets = [4, 3], sizes = [1, 8], strides = [1, 1]} : vector<8x15xf32> to vector<1x8xf32>
    %368 = vector.extract_strided_slice %362 {offsets = [5, 2], sizes = [1, 8], strides = [1, 1]} : vector<8x15xf32> to vector<1x8xf32>
    %369 = vector.extract_strided_slice %362 {offsets = [6, 1], sizes = [1, 8], strides = [1, 1]} : vector<8x15xf32> to vector<1x8xf32>
    %370 = vector.extract_strided_slice %362 {offsets = [7, 0], sizes = [1, 8], strides = [1, 1]} : vector<8x15xf32> to vector<1x8xf32>
    %371 = tpu.concatenate %363, %364, %365, %366, %367, %368, %369, %370 in 0 : vector<1x8xf32>, vector<1x8xf32>, vector<1x8xf32>, vector<1x8xf32>, vector<1x8xf32>, vector<1x8xf32>, vector<1x8xf32>, vector<1x8xf32> -> vector<8x8xf32>
    %372 = arith.addf %361, %371 : vector<8x8xf32>
    %cst_135 = arith.constant -1.000000e+04 : f32
    %373 = vector.broadcast %cst_135 : f32 to vector<8x8xf32>
    %374 = arith.select %292, %373, %372 : vector<8x8xi1>, vector<8x8xf32>
    %cst_136 = arith.constant dense<0xFF800000> : vector<8xf32>
    %375 = vector.multi_reduction <maximumf>, %374, %cst_136 [1] : vector<8x8xf32> to vector<8xf32>
    %376 = vector.shape_cast %375 : vector<8xf32> to vector<8x1xf32>
    %377 = vector.broadcast %376 : vector<8x1xf32> to vector<8x8xf32>
    %378 = arith.subf %374, %377 : vector<8x8xf32>
    %379 = math.exp %378 : vector<8x8xf32>
    %cst_137 = arith.constant dense<0.000000e+00> : vector<8xf32>
    %380 = vector.multi_reduction <add>, %379, %cst_137 [1] : vector<8x8xf32> to vector<8xf32>
    %381 = vector.shape_cast %380 : vector<8xf32> to vector<8x1xf32>
    %382 = tpu.reciprocal %381 {approx = true} : vector<8x1xf32> -> vector<8x1xf32>
    %383 = arith.mulf %381, %382 : vector<8x1xf32>
    %cst_138 = arith.constant 2.000000e+00 : f32
    %384 = vector.broadcast %cst_138 : f32 to vector<8x1xf32>
    %385 = arith.subf %384, %383 : vector<8x1xf32>
    %386 = arith.mulf %382, %385 : vector<8x1xf32>
    %387 = vector.broadcast %386 : vector<8x1xf32> to vector<8x8xf32>
    %388 = arith.mulf %379, %387 : vector<8x8xf32>
    %cst_139 = arith.constant dense<0.000000e+00> : vector<8x8xf32>
    %389 = tpu.matmul %388, %360, %cst_139 {dimension_numbers = #tpu.dot_dimension_numbers<[1], [0], [0], [1], [0, 0, 1, 1], [], []>, precision = #tpu.contract_precision<fp32>} : vector<8x8xf32>, vector<8x8xf32>, vector<8x8xf32> -> vector<8x8xf32>
    %cst_140 = arith.constant 0.000000e+00 : f32
    %390 = vector.broadcast %cst_140 : f32 to vector<1x7xf32>
    %391 = vector.extract_strided_slice %388 {offsets = [0, 0], sizes = [1, 8], strides = [1, 1]} : vector<8x8xf32> to vector<1x8xf32>
    %392 = tpu.concatenate %390, %391 in 1 : vector<1x7xf32>, vector<1x8xf32> -> vector<1x15xf32>
    %cst_141 = arith.constant 0.000000e+00 : f32
    %393 = vector.broadcast %cst_141 : f32 to vector<1x6xf32>
    %394 = vector.extract_strided_slice %388 {offsets = [1, 0], sizes = [1, 8], strides = [1, 1]} : vector<8x8xf32> to vector<1x8xf32>
    %cst_142 = arith.constant 0.000000e+00 : f32
    %395 = vector.broadcast %cst_142 : f32 to vector<1x1xf32>
    %396 = tpu.concatenate %393, %394, %395 in 1 : vector<1x6xf32>, vector<1x8xf32>, vector<1x1xf32> -> vector<1x15xf32>
    %cst_143 = arith.constant 0.000000e+00 : f32
    %397 = vector.broadcast %cst_143 : f32 to vector<1x5xf32>
    %398 = vector.extract_strided_slice %388 {offsets = [2, 0], sizes = [1, 8], strides = [1, 1]} : vector<8x8xf32> to vector<1x8xf32>
    %cst_144 = arith.constant 0.000000e+00 : f32
    %399 = vector.broadcast %cst_144 : f32 to vector<1x2xf32>
    %400 = tpu.concatenate %397, %398, %399 in 1 : vector<1x5xf32>, vector<1x8xf32>, vector<1x2xf32> -> vector<1x15xf32>
    %cst_145 = arith.constant 0.000000e+00 : f32
    %401 = vector.broadcast %cst_145 : f32 to vector<1x4xf32>
    %402 = vector.extract_strided_slice %388 {offsets = [3, 0], sizes = [1, 8], strides = [1, 1]} : vector<8x8xf32> to vector<1x8xf32>
    %cst_146 = arith.constant 0.000000e+00 : f32
    %403 = vector.broadcast %cst_146 : f32 to vector<1x3xf32>
    %404 = tpu.concatenate %401, %402, %403 in 1 : vector<1x4xf32>, vector<1x8xf32>, vector<1x3xf32> -> vector<1x15xf32>
    %cst_147 = arith.constant 0.000000e+00 : f32
    %405 = vector.broadcast %cst_147 : f32 to vector<1x3xf32>
    %406 = vector.extract_strided_slice %388 {offsets = [4, 0], sizes = [1, 8], strides = [1, 1]} : vector<8x8xf32> to vector<1x8xf32>
    %cst_148 = arith.constant 0.000000e+00 : f32
    %407 = vector.broadcast %cst_148 : f32 to vector<1x4xf32>
    %408 = tpu.concatenate %405, %406, %407 in 1 : vector<1x3xf32>, vector<1x8xf32>, vector<1x4xf32> -> vector<1x15xf32>
    %cst_149 = arith.constant 0.000000e+00 : f32
    %409 = vector.broadcast %cst_149 : f32 to vector<1x2xf32>
    %410 = vector.extract_strided_slice %388 {offsets = [5, 0], sizes = [1, 8], strides = [1, 1]} : vector<8x8xf32> to vector<1x8xf32>
    %cst_150 = arith.constant 0.000000e+00 : f32
    %411 = vector.broadcast %cst_150 : f32 to vector<1x5xf32>
    %412 = tpu.concatenate %409, %410, %411 in 1 : vector<1x2xf32>, vector<1x8xf32>, vector<1x5xf32> -> vector<1x15xf32>
    %cst_151 = arith.constant 0.000000e+00 : f32
    %413 = vector.broadcast %cst_151 : f32 to vector<1x1xf32>
    %414 = vector.extract_strided_slice %388 {offsets = [6, 0], sizes = [1, 8], strides = [1, 1]} : vector<8x8xf32> to vector<1x8xf32>
    %cst_152 = arith.constant 0.000000e+00 : f32
    %415 = vector.broadcast %cst_152 : f32 to vector<1x6xf32>
    %416 = tpu.concatenate %413, %414, %415 in 1 : vector<1x1xf32>, vector<1x8xf32>, vector<1x6xf32> -> vector<1x15xf32>
    %417 = vector.extract_strided_slice %388 {offsets = [7, 0], sizes = [1, 8], strides = [1, 1]} : vector<8x8xf32> to vector<1x8xf32>
    %cst_153 = arith.constant 0.000000e+00 : f32
    %418 = vector.broadcast %cst_153 : f32 to vector<1x7xf32>
    %419 = tpu.concatenate %417, %418 in 1 : vector<1x8xf32>, vector<1x7xf32> -> vector<1x15xf32>
    %420 = tpu.concatenate %392, %396, %400, %404, %408, %412, %416, %419 in 0 : vector<1x15xf32>, vector<1x15xf32>, vector<1x15xf32>, vector<1x15xf32>, vector<1x15xf32>, vector<1x15xf32>, vector<1x15xf32>, vector<1x15xf32> -> vector<8x15xf32>
    %cst_154 = arith.constant dense<0.000000e+00> : vector<8x8xf32>
    %421 = tpu.matmul %420, %5, %cst_154 {dimension_numbers = #tpu.dot_dimension_numbers<[1], [0], [0], [1], [0, 0, 1, 1], [], []>, precision = #tpu.contract_precision<fp32>} : vector<8x15xf32>, vector<15x8xf32>, vector<8x8xf32> -> vector<8x8xf32>
    %422 = arith.addf %389, %421 : vector<8x8xf32>
    %423 = vector.extract_strided_slice %12 {offsets = [8, 16], sizes = [8, 8], strides = [1, 1]} : vector<16x32xf32> to vector<8x8xf32>
    %424 = vector.extract_strided_slice %17 {offsets = [8, 16], sizes = [8, 8], strides = [1, 1]} : vector<16x64xf32> to vector<8x8xf32>
    %425 = vector.extract_strided_slice %17 {offsets = [8, 48], sizes = [8, 8], strides = [1, 1]} : vector<16x64xf32> to vector<8x8xf32>
    %cst_155 = arith.constant dense<0.000000e+00> : vector<8x8xf32>
    %426 = tpu.matmul %423, %424, %cst_155 {dimension_numbers = #tpu.dot_dimension_numbers<[1], [1], [0], [0], [0, 0, 1, 0], [], []>, precision = #tpu.contract_precision<fp32>} : vector<8x8xf32>, vector<8x8xf32>, vector<8x8xf32> -> vector<8x8xf32>
    %cst_156 = arith.constant dense<0.000000e+00> : vector<8x15xf32>
    %427 = tpu.matmul %423, %4, %cst_156 {dimension_numbers = #tpu.dot_dimension_numbers<[1], [0], [0], [1], [0, 0, 1, 1], [], []>, precision = #tpu.contract_precision<fp32>} : vector<8x8xf32>, vector<8x15xf32>, vector<8x15xf32> -> vector<8x15xf32>
    %428 = vector.extract_strided_slice %427 {offsets = [0, 7], sizes = [1, 8], strides = [1, 1]} : vector<8x15xf32> to vector<1x8xf32>
    %429 = vector.extract_strided_slice %427 {offsets = [1, 6], sizes = [1, 8], strides = [1, 1]} : vector<8x15xf32> to vector<1x8xf32>
    %430 = vector.extract_strided_slice %427 {offsets = [2, 5], sizes = [1, 8], strides = [1, 1]} : vector<8x15xf32> to vector<1x8xf32>
    %431 = vector.extract_strided_slice %427 {offsets = [3, 4], sizes = [1, 8], strides = [1, 1]} : vector<8x15xf32> to vector<1x8xf32>
    %432 = vector.extract_strided_slice %427 {offsets = [4, 3], sizes = [1, 8], strides = [1, 1]} : vector<8x15xf32> to vector<1x8xf32>
    %433 = vector.extract_strided_slice %427 {offsets = [5, 2], sizes = [1, 8], strides = [1, 1]} : vector<8x15xf32> to vector<1x8xf32>
    %434 = vector.extract_strided_slice %427 {offsets = [6, 1], sizes = [1, 8], strides = [1, 1]} : vector<8x15xf32> to vector<1x8xf32>
    %435 = vector.extract_strided_slice %427 {offsets = [7, 0], sizes = [1, 8], strides = [1, 1]} : vector<8x15xf32> to vector<1x8xf32>
    %436 = tpu.concatenate %428, %429, %430, %431, %432, %433, %434, %435 in 0 : vector<1x8xf32>, vector<1x8xf32>, vector<1x8xf32>, vector<1x8xf32>, vector<1x8xf32>, vector<1x8xf32>, vector<1x8xf32>, vector<1x8xf32> -> vector<8x8xf32>
    %437 = arith.addf %426, %436 : vector<8x8xf32>
    %cst_157 = arith.constant -1.000000e+04 : f32
    %438 = vector.broadcast %cst_157 : f32 to vector<8x8xf32>
    %439 = arith.select %292, %438, %437 : vector<8x8xi1>, vector<8x8xf32>
    %cst_158 = arith.constant dense<0xFF800000> : vector<8xf32>
    %440 = vector.multi_reduction <maximumf>, %439, %cst_158 [1] : vector<8x8xf32> to vector<8xf32>
    %441 = vector.shape_cast %440 : vector<8xf32> to vector<8x1xf32>
    %442 = vector.broadcast %441 : vector<8x1xf32> to vector<8x8xf32>
    %443 = arith.subf %439, %442 : vector<8x8xf32>
    %444 = math.exp %443 : vector<8x8xf32>
    %cst_159 = arith.constant dense<0.000000e+00> : vector<8xf32>
    %445 = vector.multi_reduction <add>, %444, %cst_159 [1] : vector<8x8xf32> to vector<8xf32>
    %446 = vector.shape_cast %445 : vector<8xf32> to vector<8x1xf32>
    %447 = tpu.reciprocal %446 {approx = true} : vector<8x1xf32> -> vector<8x1xf32>
    %448 = arith.mulf %446, %447 : vector<8x1xf32>
    %cst_160 = arith.constant 2.000000e+00 : f32
    %449 = vector.broadcast %cst_160 : f32 to vector<8x1xf32>
    %450 = arith.subf %449, %448 : vector<8x1xf32>
    %451 = arith.mulf %447, %450 : vector<8x1xf32>
    %452 = vector.broadcast %451 : vector<8x1xf32> to vector<8x8xf32>
    %453 = arith.mulf %444, %452 : vector<8x8xf32>
    %cst_161 = arith.constant dense<0.000000e+00> : vector<8x8xf32>
    %454 = tpu.matmul %453, %425, %cst_161 {dimension_numbers = #tpu.dot_dimension_numbers<[1], [0], [0], [1], [0, 0, 1, 1], [], []>, precision = #tpu.contract_precision<fp32>} : vector<8x8xf32>, vector<8x8xf32>, vector<8x8xf32> -> vector<8x8xf32>
    %cst_162 = arith.constant 0.000000e+00 : f32
    %455 = vector.broadcast %cst_162 : f32 to vector<1x7xf32>
    %456 = vector.extract_strided_slice %453 {offsets = [0, 0], sizes = [1, 8], strides = [1, 1]} : vector<8x8xf32> to vector<1x8xf32>
    %457 = tpu.concatenate %455, %456 in 1 : vector<1x7xf32>, vector<1x8xf32> -> vector<1x15xf32>
    %cst_163 = arith.constant 0.000000e+00 : f32
    %458 = vector.broadcast %cst_163 : f32 to vector<1x6xf32>
    %459 = vector.extract_strided_slice %453 {offsets = [1, 0], sizes = [1, 8], strides = [1, 1]} : vector<8x8xf32> to vector<1x8xf32>
    %cst_164 = arith.constant 0.000000e+00 : f32
    %460 = vector.broadcast %cst_164 : f32 to vector<1x1xf32>
    %461 = tpu.concatenate %458, %459, %460 in 1 : vector<1x6xf32>, vector<1x8xf32>, vector<1x1xf32> -> vector<1x15xf32>
    %cst_165 = arith.constant 0.000000e+00 : f32
    %462 = vector.broadcast %cst_165 : f32 to vector<1x5xf32>
    %463 = vector.extract_strided_slice %453 {offsets = [2, 0], sizes = [1, 8], strides = [1, 1]} : vector<8x8xf32> to vector<1x8xf32>
    %cst_166 = arith.constant 0.000000e+00 : f32
    %464 = vector.broadcast %cst_166 : f32 to vector<1x2xf32>
    %465 = tpu.concatenate %462, %463, %464 in 1 : vector<1x5xf32>, vector<1x8xf32>, vector<1x2xf32> -> vector<1x15xf32>
    %cst_167 = arith.constant 0.000000e+00 : f32
    %466 = vector.broadcast %cst_167 : f32 to vector<1x4xf32>
    %467 = vector.extract_strided_slice %453 {offsets = [3, 0], sizes = [1, 8], strides = [1, 1]} : vector<8x8xf32> to vector<1x8xf32>
    %cst_168 = arith.constant 0.000000e+00 : f32
    %468 = vector.broadcast %cst_168 : f32 to vector<1x3xf32>
    %469 = tpu.concatenate %466, %467, %468 in 1 : vector<1x4xf32>, vector<1x8xf32>, vector<1x3xf32> -> vector<1x15xf32>
    %cst_169 = arith.constant 0.000000e+00 : f32
    %470 = vector.broadcast %cst_169 : f32 to vector<1x3xf32>
    %471 = vector.extract_strided_slice %453 {offsets = [4, 0], sizes = [1, 8], strides = [1, 1]} : vector<8x8xf32> to vector<1x8xf32>
    %cst_170 = arith.constant 0.000000e+00 : f32
    %472 = vector.broadcast %cst_170 : f32 to vector<1x4xf32>
    %473 = tpu.concatenate %470, %471, %472 in 1 : vector<1x3xf32>, vector<1x8xf32>, vector<1x4xf32> -> vector<1x15xf32>
    %cst_171 = arith.constant 0.000000e+00 : f32
    %474 = vector.broadcast %cst_171 : f32 to vector<1x2xf32>
    %475 = vector.extract_strided_slice %453 {offsets = [5, 0], sizes = [1, 8], strides = [1, 1]} : vector<8x8xf32> to vector<1x8xf32>
    %cst_172 = arith.constant 0.000000e+00 : f32
    %476 = vector.broadcast %cst_172 : f32 to vector<1x5xf32>
    %477 = tpu.concatenate %474, %475, %476 in 1 : vector<1x2xf32>, vector<1x8xf32>, vector<1x5xf32> -> vector<1x15xf32>
    %cst_173 = arith.constant 0.000000e+00 : f32
    %478 = vector.broadcast %cst_173 : f32 to vector<1x1xf32>
    %479 = vector.extract_strided_slice %453 {offsets = [6, 0], sizes = [1, 8], strides = [1, 1]} : vector<8x8xf32> to vector<1x8xf32>
    %cst_174 = arith.constant 0.000000e+00 : f32
    %480 = vector.broadcast %cst_174 : f32 to vector<1x6xf32>
    %481 = tpu.concatenate %478, %479, %480 in 1 : vector<1x1xf32>, vector<1x8xf32>, vector<1x6xf32> -> vector<1x15xf32>
    %482 = vector.extract_strided_slice %453 {offsets = [7, 0], sizes = [1, 8], strides = [1, 1]} : vector<8x8xf32> to vector<1x8xf32>
    %cst_175 = arith.constant 0.000000e+00 : f32
    %483 = vector.broadcast %cst_175 : f32 to vector<1x7xf32>
    %484 = tpu.concatenate %482, %483 in 1 : vector<1x8xf32>, vector<1x7xf32> -> vector<1x15xf32>
    %485 = tpu.concatenate %457, %461, %465, %469, %473, %477, %481, %484 in 0 : vector<1x15xf32>, vector<1x15xf32>, vector<1x15xf32>, vector<1x15xf32>, vector<1x15xf32>, vector<1x15xf32>, vector<1x15xf32>, vector<1x15xf32> -> vector<8x15xf32>
    %cst_176 = arith.constant dense<0.000000e+00> : vector<8x8xf32>
    %486 = tpu.matmul %485, %5, %cst_176 {dimension_numbers = #tpu.dot_dimension_numbers<[1], [0], [0], [1], [0, 0, 1, 1], [], []>, precision = #tpu.contract_precision<fp32>} : vector<8x15xf32>, vector<15x8xf32>, vector<8x8xf32> -> vector<8x8xf32>
    %487 = arith.addf %454, %486 : vector<8x8xf32>
    %488 = vector.extract_strided_slice %12 {offsets = [8, 24], sizes = [8, 8], strides = [1, 1]} : vector<16x32xf32> to vector<8x8xf32>
    %489 = vector.extract_strided_slice %17 {offsets = [8, 24], sizes = [8, 8], strides = [1, 1]} : vector<16x64xf32> to vector<8x8xf32>
    %490 = vector.extract_strided_slice %17 {offsets = [8, 56], sizes = [8, 8], strides = [1, 1]} : vector<16x64xf32> to vector<8x8xf32>
    %cst_177 = arith.constant dense<0.000000e+00> : vector<8x8xf32>
    %491 = tpu.matmul %488, %489, %cst_177 {dimension_numbers = #tpu.dot_dimension_numbers<[1], [1], [0], [0], [0, 0, 1, 0], [], []>, precision = #tpu.contract_precision<fp32>} : vector<8x8xf32>, vector<8x8xf32>, vector<8x8xf32> -> vector<8x8xf32>
    %cst_178 = arith.constant dense<0.000000e+00> : vector<8x15xf32>
    %492 = tpu.matmul %488, %4, %cst_178 {dimension_numbers = #tpu.dot_dimension_numbers<[1], [0], [0], [1], [0, 0, 1, 1], [], []>, precision = #tpu.contract_precision<fp32>} : vector<8x8xf32>, vector<8x15xf32>, vector<8x15xf32> -> vector<8x15xf32>
    %493 = vector.extract_strided_slice %492 {offsets = [0, 7], sizes = [1, 8], strides = [1, 1]} : vector<8x15xf32> to vector<1x8xf32>
    %494 = vector.extract_strided_slice %492 {offsets = [1, 6], sizes = [1, 8], strides = [1, 1]} : vector<8x15xf32> to vector<1x8xf32>
    %495 = vector.extract_strided_slice %492 {offsets = [2, 5], sizes = [1, 8], strides = [1, 1]} : vector<8x15xf32> to vector<1x8xf32>
    %496 = vector.extract_strided_slice %492 {offsets = [3, 4], sizes = [1, 8], strides = [1, 1]} : vector<8x15xf32> to vector<1x8xf32>
    %497 = vector.extract_strided_slice %492 {offsets = [4, 3], sizes = [1, 8], strides = [1, 1]} : vector<8x15xf32> to vector<1x8xf32>
    %498 = vector.extract_strided_slice %492 {offsets = [5, 2], sizes = [1, 8], strides = [1, 1]} : vector<8x15xf32> to vector<1x8xf32>
    %499 = vector.extract_strided_slice %492 {offsets = [6, 1], sizes = [1, 8], strides = [1, 1]} : vector<8x15xf32> to vector<1x8xf32>
    %500 = vector.extract_strided_slice %492 {offsets = [7, 0], sizes = [1, 8], strides = [1, 1]} : vector<8x15xf32> to vector<1x8xf32>
    %501 = tpu.concatenate %493, %494, %495, %496, %497, %498, %499, %500 in 0 : vector<1x8xf32>, vector<1x8xf32>, vector<1x8xf32>, vector<1x8xf32>, vector<1x8xf32>, vector<1x8xf32>, vector<1x8xf32>, vector<1x8xf32> -> vector<8x8xf32>
    %502 = arith.addf %491, %501 : vector<8x8xf32>
    %cst_179 = arith.constant -1.000000e+04 : f32
    %503 = vector.broadcast %cst_179 : f32 to vector<8x8xf32>
    %504 = arith.select %292, %503, %502 : vector<8x8xi1>, vector<8x8xf32>
    %cst_180 = arith.constant dense<0xFF800000> : vector<8xf32>
    %505 = vector.multi_reduction <maximumf>, %504, %cst_180 [1] : vector<8x8xf32> to vector<8xf32>
    %506 = vector.shape_cast %505 : vector<8xf32> to vector<8x1xf32>
    %507 = vector.broadcast %506 : vector<8x1xf32> to vector<8x8xf32>
    %508 = arith.subf %504, %507 : vector<8x8xf32>
    %509 = math.exp %508 : vector<8x8xf32>
    %cst_181 = arith.constant dense<0.000000e+00> : vector<8xf32>
    %510 = vector.multi_reduction <add>, %509, %cst_181 [1] : vector<8x8xf32> to vector<8xf32>
    %511 = vector.shape_cast %510 : vector<8xf32> to vector<8x1xf32>
    %512 = tpu.reciprocal %511 {approx = true} : vector<8x1xf32> -> vector<8x1xf32>
    %513 = arith.mulf %511, %512 : vector<8x1xf32>
    %cst_182 = arith.constant 2.000000e+00 : f32
    %514 = vector.broadcast %cst_182 : f32 to vector<8x1xf32>
    %515 = arith.subf %514, %513 : vector<8x1xf32>
    %516 = arith.mulf %512, %515 : vector<8x1xf32>
    %517 = vector.broadcast %516 : vector<8x1xf32> to vector<8x8xf32>
    %518 = arith.mulf %509, %517 : vector<8x8xf32>
    %cst_183 = arith.constant dense<0.000000e+00> : vector<8x8xf32>
    %519 = tpu.matmul %518, %490, %cst_183 {dimension_numbers = #tpu.dot_dimension_numbers<[1], [0], [0], [1], [0, 0, 1, 1], [], []>, precision = #tpu.contract_precision<fp32>} : vector<8x8xf32>, vector<8x8xf32>, vector<8x8xf32> -> vector<8x8xf32>
    %cst_184 = arith.constant 0.000000e+00 : f32
    %520 = vector.broadcast %cst_184 : f32 to vector<1x7xf32>
    %521 = vector.extract_strided_slice %518 {offsets = [0, 0], sizes = [1, 8], strides = [1, 1]} : vector<8x8xf32> to vector<1x8xf32>
    %522 = tpu.concatenate %520, %521 in 1 : vector<1x7xf32>, vector<1x8xf32> -> vector<1x15xf32>
    %cst_185 = arith.constant 0.000000e+00 : f32
    %523 = vector.broadcast %cst_185 : f32 to vector<1x6xf32>
    %524 = vector.extract_strided_slice %518 {offsets = [1, 0], sizes = [1, 8], strides = [1, 1]} : vector<8x8xf32> to vector<1x8xf32>
    %cst_186 = arith.constant 0.000000e+00 : f32
    %525 = vector.broadcast %cst_186 : f32 to vector<1x1xf32>
    %526 = tpu.concatenate %523, %524, %525 in 1 : vector<1x6xf32>, vector<1x8xf32>, vector<1x1xf32> -> vector<1x15xf32>
    %cst_187 = arith.constant 0.000000e+00 : f32
    %527 = vector.broadcast %cst_187 : f32 to vector<1x5xf32>
    %528 = vector.extract_strided_slice %518 {offsets = [2, 0], sizes = [1, 8], strides = [1, 1]} : vector<8x8xf32> to vector<1x8xf32>
    %cst_188 = arith.constant 0.000000e+00 : f32
    %529 = vector.broadcast %cst_188 : f32 to vector<1x2xf32>
    %530 = tpu.concatenate %527, %528, %529 in 1 : vector<1x5xf32>, vector<1x8xf32>, vector<1x2xf32> -> vector<1x15xf32>
    %cst_189 = arith.constant 0.000000e+00 : f32
    %531 = vector.broadcast %cst_189 : f32 to vector<1x4xf32>
    %532 = vector.extract_strided_slice %518 {offsets = [3, 0], sizes = [1, 8], strides = [1, 1]} : vector<8x8xf32> to vector<1x8xf32>
    %cst_190 = arith.constant 0.000000e+00 : f32
    %533 = vector.broadcast %cst_190 : f32 to vector<1x3xf32>
    %534 = tpu.concatenate %531, %532, %533 in 1 : vector<1x4xf32>, vector<1x8xf32>, vector<1x3xf32> -> vector<1x15xf32>
    %cst_191 = arith.constant 0.000000e+00 : f32
    %535 = vector.broadcast %cst_191 : f32 to vector<1x3xf32>
    %536 = vector.extract_strided_slice %518 {offsets = [4, 0], sizes = [1, 8], strides = [1, 1]} : vector<8x8xf32> to vector<1x8xf32>
    %cst_192 = arith.constant 0.000000e+00 : f32
    %537 = vector.broadcast %cst_192 : f32 to vector<1x4xf32>
    %538 = tpu.concatenate %535, %536, %537 in 1 : vector<1x3xf32>, vector<1x8xf32>, vector<1x4xf32> -> vector<1x15xf32>
    %cst_193 = arith.constant 0.000000e+00 : f32
    %539 = vector.broadcast %cst_193 : f32 to vector<1x2xf32>
    %540 = vector.extract_strided_slice %518 {offsets = [5, 0], sizes = [1, 8], strides = [1, 1]} : vector<8x8xf32> to vector<1x8xf32>
    %cst_194 = arith.constant 0.000000e+00 : f32
    %541 = vector.broadcast %cst_194 : f32 to vector<1x5xf32>
    %542 = tpu.concatenate %539, %540, %541 in 1 : vector<1x2xf32>, vector<1x8xf32>, vector<1x5xf32> -> vector<1x15xf32>
    %cst_195 = arith.constant 0.000000e+00 : f32
    %543 = vector.broadcast %cst_195 : f32 to vector<1x1xf32>
    %544 = vector.extract_strided_slice %518 {offsets = [6, 0], sizes = [1, 8], strides = [1, 1]} : vector<8x8xf32> to vector<1x8xf32>
    %cst_196 = arith.constant 0.000000e+00 : f32
    %545 = vector.broadcast %cst_196 : f32 to vector<1x6xf32>
    %546 = tpu.concatenate %543, %544, %545 in 1 : vector<1x1xf32>, vector<1x8xf32>, vector<1x6xf32> -> vector<1x15xf32>
    %547 = vector.extract_strided_slice %518 {offsets = [7, 0], sizes = [1, 8], strides = [1, 1]} : vector<8x8xf32> to vector<1x8xf32>
    %cst_197 = arith.constant 0.000000e+00 : f32
    %548 = vector.broadcast %cst_197 : f32 to vector<1x7xf32>
    %549 = tpu.concatenate %547, %548 in 1 : vector<1x8xf32>, vector<1x7xf32> -> vector<1x15xf32>
    %550 = tpu.concatenate %522, %526, %530, %534, %538, %542, %546, %549 in 0 : vector<1x15xf32>, vector<1x15xf32>, vector<1x15xf32>, vector<1x15xf32>, vector<1x15xf32>, vector<1x15xf32>, vector<1x15xf32>, vector<1x15xf32> -> vector<8x15xf32>
    %cst_198 = arith.constant dense<0.000000e+00> : vector<8x8xf32>
    %551 = tpu.matmul %550, %5, %cst_198 {dimension_numbers = #tpu.dot_dimension_numbers<[1], [0], [0], [1], [0, 0, 1, 1], [], []>, precision = #tpu.contract_precision<fp32>} : vector<8x15xf32>, vector<15x8xf32>, vector<8x8xf32> -> vector<8x8xf32>
    %552 = arith.addf %519, %551 : vector<8x8xf32>
    %553 = tpu.concatenate %357, %422, %487, %552 in 1 : vector<8x8xf32>, vector<8x8xf32>, vector<8x8xf32>, vector<8x8xf32> -> vector<8x32xf32>
    %554 = tpu.concatenate %285, %553 in 0 : vector<8x32xf32>, vector<8x32xf32> -> vector<16x32xf32>
    %c0_199 = arith.constant 0 : index
    %c0_200 = arith.constant 0 : index
    %555 = vector.load %arg9[%c0_199, %c0_200] : memref<32x32xf32, #tpu.memory_space<vmem>>, vector<32x32xf32>
    %cst_201 = arith.constant dense<0.000000e+00> : vector<16x32xf32>
    %556 = tpu.matmul %554, %555, %cst_201 {dimension_numbers = #tpu.dot_dimension_numbers<[1], [0], [0], [1], [0, 0, 1, 1], [], []>, precision = #tpu.contract_precision<fp32>} : vector<16x32xf32>, vector<32x32xf32>, vector<16x32xf32> -> vector<16x32xf32>
    %c0_202 = arith.constant 0 : index
    %c0_203 = arith.constant 0 : index
    %557 = vector.load %arg10[%c0_202, %c0_203] : memref<1x32xf32, #tpu.memory_space<vmem>>, vector<1x32xf32>
    %558 = vector.broadcast %557 : vector<1x32xf32> to vector<16x32xf32>
    %559 = arith.addf %556, %558 : vector<16x32xf32>
    %c0_204 = arith.constant 0 : index
    %c0_205 = arith.constant 0 : index
    %560 = vector.load %arg13[%c0_204, %c0_205] : memref<16x32xf32, #tpu.memory_space<vmem>>, vector<16x32xf32>
    tpu.vector_store %arg13[%c0_204, %c0_205], %559 {strides = array<i32>} : memref<16x32xf32, #tpu.memory_space<vmem>>, vector<16x32xf32>,
    return
  }
  func.func @transform_0(%arg0: i32) -> (i32, i32) {
    %c0_i32 = arith.constant 0 : i32
    %c0_i32_0 = arith.constant 0 : i32
    %c0_i32_1 = arith.constant 0 : i32
    return %c0_i32, %c0_i32_0 : i32, i32
  }
  func.func @transform_1(%arg0: i32) -> (i32, i32) {
    %c0_i32 = arith.constant 0 : i32
    %c0_i32_0 = arith.constant 0 : i32
    %c0_i32_1 = arith.constant 0 : i32
    return %c0_i32, %c0_i32_0 : i32, i32
  }
  func.func @transform_2(%arg0: i32) -> (i32, i32) {
    %c0_i32 = arith.constant 0 : i32
    %c0_i32_0 = arith.constant 0 : i32
    %c0_i32_1 = arith.constant 0 : i32
    return %c0_i32, %c0_i32_0 : i32, i32
  }
  func.func @transform_3(%arg0: i32) -> (i32, i32) {
    %c0_i32 = arith.constant 0 : i32
    %c0_i32_0 = arith.constant 0 : i32
    %c0_i32_1 = arith.constant 0 : i32
    return %c0_i32, %c0_i32_0 : i32, i32
  }
  func.func @transform_4(%arg0: i32) -> (i32, i32) {
    %c0_i32 = arith.constant 0 : i32
    %c0_i32_0 = arith.constant 0 : i32
    %c0_i32_1 = arith.constant 0 : i32
    return %c0_i32, %c0_i32_0 : i32, i32
  }
  func.func @transform_5(%arg0: i32) -> (i32, i32) {
    %c0_i32 = arith.constant 0 : i32
    %c0_i32_0 = arith.constant 0 : i32
    %c0_i32_1 = arith.constant 0 : i32
    return %c0_i32, %c0_i32_0 : i32, i32
  }
  func.func @transform_6(%arg0: i32) -> (i32, i32) {
    %c0_i32 = arith.constant 0 : i32
    %c0_i32_0 = arith.constant 0 : i32
    %c0_i32_1 = arith.constant 0 : i32
    return %c0_i32, %c0_i32_0 : i32, i32
  }
  func.func @transform_7(%arg0: i32) -> (i32, i32) {
    %c0_i32 = arith.constant 0 : i32
    %c0_i32_0 = arith.constant 0 : i32
    %c0_i32_1 = arith.constant 0 : i32
    return %c0_i32, %c0_i32_0 : i32, i32
  }
  func.func @transform_8(%arg0: i32) -> (i32, i32) {
    %c0_i32 = arith.constant 0 : i32
    %c0_i32_0 = arith.constant 0 : i32
    %c0_i32_1 = arith.constant 0 : i32
    return %c0_i32, %c0_i32_0 : i32, i32
  }
  func.func @transform_9(%arg0: i32) -> (i32, i32) {
    %c0_i32 = arith.constant 0 : i32
    %c0_i32_0 = arith.constant 0 : i32
    %c0_i32_1 = arith.constant 0 : i32
    return %c0_i32, %c0_i32_0 : i32, i32
  }
  func.func @transform_10(%arg0: i32) -> (i32, i32) {
    %c0_i32 = arith.constant 0 : i32
    %c0_i32_0 = arith.constant 0 : i32
    %c0_i32_1 = arith.constant 0 : i32
    return %c0_i32, %c0_i32_0 : i32, i32
  }
  func.func @transform_11(%arg0: i32) -> (i32, i32) {
    %c0_i32 = arith.constant 0 : i32
    %c0_i32_0 = arith.constant 0 : i32
    %c0_i32_1 = arith.constant 0 : i32
    return %c0_i32, %c0_i32_0 : i32, i32
  }
  func.func @transform_12(%arg0: i32) -> (i32, i32) {
    %c0_i32 = arith.constant 0 : i32
    %c0_i32_0 = arith.constant 0 : i32
    %c0_i32_1 = arith.constant 0 : i32
    return %c0_i32, %c0_i32_0 : i32, i32
  }
}

</mosaic_0001>

<bundles_post_ra>
// kernel: multi_head_attention_pallas.1
= control target key start
LH: loop header
LB: loop body
LE: loop exit
PB: predicated region body
PF: predicated region fallthrough
CT: control target
= control target key end

     0   :  { %vm8032_vm0 = vcmask 261120   ;;  %s8019_s0 = inlined_call_operand.vmem [shape: f32[16,32], index: 0, kind: input, shape index: {}]   ;;  %s8020_s1 = inlined_call_operand.vmem [shape: f32[16,32], index: 1, kind: input, shape index: {}]   ;;  %s8021_s2 = inlined_call_operand.vmem [shape: f32[16,1], index: 2, kind: input, shape index: {}]   ;;  %s8022_s3 = inlined_call_operand.vmem [shape: f32[2,8], index: 3, kind: input, shape index: {}]   ;;  %s8023_s4 = inlined_call_operand.vmem [shape: f32[32,32], index: 4, kind: input, shape index: {}]   ;;  %s8024_s5 = inlined_call_operand.vmem [shape: f32[1,32], index: 5, kind: input, shape index: {}]   ;;  %s8025_s6 = inlined_call_operand.vmem [shape: f32[32,64], index: 6, kind: input, shape index: {}]   ;;  %s8026_s7 = inlined_call_operand.vmem [shape: f32[1,64], index: 7, kind: input, shape index: {}]   ;;  %s8027_s8 = inlined_call_operand.vmem [shape: f32[32,32], index: 8, kind: input, shape index: {}]   ;;  %s8028_s9 = inlined_call_operand.vmem [shape: f32[1,32], index: 9, kind: input, shape index: {}]   ;;  %s8029_s10 = inlined_call_operand.vmem [shape: f32[8,15], index: 10, kind: input, shape index: {}]   ;;  %s8030_s11 = inlined_call_operand.vmem [shape: f32[15,8], index: 11, kind: input, shape index: {}]   ;;  %s8031_s12 = inlined_call_operand.hbm [shape: f32[16,32], index: 12, kind: output, shape index: {}]  }
   0x1   :  { %v55_v0 = vld [vmem:[%s8023_s4 + $0x18] sm:$0xff]  ;;  %v54_v1 = vld [vmem:[%s8023_s4 + $0x10] sm:$0xff]  ;;  %v53_v2 = vld [vmem:[%s8023_s4 + $0x8] sm:$0xff] }
   0x2   :  { %v6849_v3 = vand.u32 4294901760, %v55_v0  ;;  %v6851_v4 = vand.u32 4294901760, %v54_v1  ;;  %v6853_v5 = vand.u32 4294901760, %v53_v2  ;;  %v52_v6 = vld [vmem:[%s8023_s4] sm:$0xff]  ;;  %v43_v7 = vld [vmem:[%s8019_s0 + $0x8] sm:$0xff]  ;;  %v288_v16 = vld [vmem:[%s8025_s6 + $0x18] sm:$0xff] }
   0x3   :  { %v42_v8 = vld [vmem:[%s8019_s0] sm:$0xff]  ;;  %v6864_v9 = vand.u32 4294901760, %v52_v6  ;;  %v65_v10 = vsel %vm8032_vm0, %v43_v7, 0  ;;  %v287_v23 = vld [vmem:[%s8025_s6 + $0x10] sm:$0xff]  ;;  %v6895_v26 = vand.u32 4294901760, %v288_v16 }
   0x4   :  { %v62_v11 = vsel %vm8032_vm0, %v42_v8, 0  ;;  %6658 = vmatpush.msra.mxu2 %v6849_v3  ;;  %v117_v12 = vsub.f32 %v55_v0, %v6849_v3  ;;  %v6870_v13 = vand.u32 4294901760, %v65_v10  ;;  %v123_v14 = vsub.f32 %v54_v1, %v6851_v4  ;;  %80 = vmatpush.msra.mxu0 %v6849_v3 }
   0x5   :  { %v129_v15 = vsub.f32 %v53_v2, %v6853_v5  ;;  %v6879_v17 = vsub.f32 %v52_v6, %v6864_v9  ;;  %v6881_v18 = vand.u32 4294901760, %v62_v11 }
   0x6   :  { %6659 = vmatpush.msra.mxu2 %v6851_v4  ;;  %v118_v19 = vand.u32 4294901760, %v117_v12  ;;  %v6885_v20 = vsub.f32 %v65_v10, %v6870_v13  ;;  %v124_v21 = vand.u32 4294901760, %v123_v14  ;;  %82 = vmatpush.msra.mxu0 %v6851_v4 }
   0x7   :  { %v130_v22 = vand.u32 4294901760, %v129_v15  ;;  %v136_v24 = vand.u32 4294901760, %v6879_v17  ;;  %v6893_v25 = vsub.f32 %v62_v11, %v6881_v18 }
   0x8   :  { %17 = vsyncpa [#allocation3], 0  ;;  %6660 = vmatpush.msra.mxu2 %v6853_v5  ;;  %v119_v27 = vsub.f32 %v117_v12, %v118_v19  ;;  %v97_v28 = vand.u32 4294901760, %v6885_v20  ;;  %v125_v29 = vsub.f32 %v123_v14, %v124_v21  ;;  %84 = vmatpush.msra.mxu0 %v6853_v5  ;;  %v6901_v32 = vand.u32 4294901760, %v287_v23  ;;  %v286_v33 = vld [vmem:[%s8025_s6 + $0x8] sm:$0xff]  ;;  %v285_v39 = vld [vmem:[%s8025_s6] sm:$0xff] }
   0x9   :  { %v131_v30 = vsub.f32 %v129_v15, %v130_v22  ;;  %v89_v31 = vand.u32 4294901760, %v6893_v25  ;;  %v137_v37 = vsub.f32 %v6879_v17, %v136_v24  ;;  %v6919_v42 = vsub.f32 %v288_v16, %v6895_v26  ;;  %v44_v44 = vld [vmem:[%s8020_s1] sm:$0xff]  ;;  %v45_v57 = vld [vmem:[%s8020_s1 + $0x8] sm:$0xff]  ;;  %s6754_s28 = smov 5   ;;  %s6755_s29 = smov 3  }
   0xa   :  { %6661 = vmatpush.msra.mxu2 %v6864_v9  ;;  %v120_v34 = vand.u32 4294901760, %v119_v27  ;;  %v98_v35 = vsub.f32 %v6885_v20, %v97_v28  ;;  %v126_v36 = vand.u32 4294901760, %v125_v29  ;;  %86 = vmatpush.msra.mxu0 %v6864_v9  ;;  %v6921_v43 = vand.u32 4294901760, %v286_v33  ;;  %s6756_s30 = smov 1   ;;  %s6757_s13 = smov 6  }
   0xb   :  { %v90_v38 = vsub.f32 %v6893_v25, %v89_v31  ;;  %v132_v41 = vand.u32 4294901760, %v131_v30  ;;  %v138_v46 = vand.u32 4294901760, %v137_v37  ;;  %v6927_v47 = vsub.f32 %v287_v23, %v6901_v32  ;;  %v6691_v37 = vld [vmem:[%s8026_s7] ss:$0 sm:$0xff]  ;;  %s6758_s14 = smov 4   ;;  %s6759_s4 = smov 2  }
   0xc   :  { %163 = vmatpush.msrb.mxu2 %v117_v12  ;;  %232 = vmatpush.msrb.mxu0 %v118_v19  ;;  %v99_v40 = vand.u32 4294901760, %v98_v35  ;;  %v6929_v48 = vand.u32 4294901760, %v285_v39  ;;  %v294_v49 = vsel %vm8032_vm0, %v44_v44, 0  ;;  %v350_v50 = vand.u32 4294901760, %v6919_v42  ;;  %v49_v12 = vld [vmem:[%s8029_s10] sm:$0xff]  ;;  %s6760_s0 = smov 7  }
   0xd   :  { %6662 = vmatpush.msra.mxu3 %v120_v34  ;;  %121 = vmatpush.msra.mxu1 %v120_v34  ;;  %v91_v45 = vand.u32 4294901760, %v90_v38  ;;  %v6934_v51 = vsub.f32 %v286_v33, %v6921_v43  ;;  %v356_v52 = vand.u32 4294901760, %v6927_v47  ;;  %v6938_v53 = vand.u32 4294901760, %v294_v49  ;;  %v6690_v19 = vld [vmem:[%s8024_s5] ss:$0 sm:$0xff]  ;;  %s6762_s17 = smov 121  }
   0xe   :  { %166 = vmatpush.msrb.mxu2 %v123_v14  ;;  %236 = vmatpush.msrb.mxu0 %v124_v21  ;;  %v367_v54 = vsub.f32 %v285_v39, %v6929_v48  ;;  %v351_v55 = vsub.f32 %v6919_v42, %v350_v50  ;;  %v297_v61 = vsel %vm8032_vm0, %v45_v57, 0  ;;  %vm523_vm1 = vcmask 64512   ;;  %s6763_s20 = smov 96   ;;  %s6765_s1 = smov 88  }
   0xf   :  { %100 = vmatmul.f32.vlgmr.msra.gmra.mxu2 %v99_v40  ;;  %6663 = vmatpush.msra.mxu3 %v126_v36  ;;  %v362_v56 = vand.u32 4294901760, %v6934_v51  ;;  %v357_v58 = vsub.f32 %v6927_v47, %v356_v52  ;;  %v320_v59 = vsub.f32 %v294_v49, %v6938_v53  ;;  %vm695_vm2 = vcmask 1040384   ;;  %s6766_s24 = smov 112   ;;  %s6767_s10 = smov 80  }
  0x10   :  { %169 = vmatpush.msrb.mxu2 %v129_v15  ;;  %127 = vmatpush.msra.mxu1 %v126_v36  ;;  %v368_v60 = vand.u32 4294901760, %v367_v54  ;;  %v352_v62 = vand.u32 4294901760, %v351_v55  ;;  %vm697_vm3 = vcmask 1041408   ;;  %vm699_vm4 = vcmask 1042432   ;;  %s6768_s25 = smov 104   ;;  %s6769_s26 = smov 72  }
  0x11   :  { %6664 = vmatpush.msra.mxu3 %v132_v41  ;;  %92 = vmatmul.f32.vlgmr.msra.gmra.mxu0 %v91_v45  ;;  %v363_v63 = vsub.f32 %v6934_v51, %v362_v56  ;;  %v358_v0 = vand.u32 4294901760, %v357_v58  ;;  %v321_v1 = vand.u32 4294901760, %v320_v59  ;;  %vm701_vm5 = vcmask 1043456  }
  0x12   :  { %172 = vmatpush.msrb.mxu2 %v6879_v17  ;;  %133 = vmatpush.msra.mxu1 %v132_v41  ;;  %v369_v2 = vsub.f32 %v367_v54, %v368_v60  ;;  %vm8043_vm6 = vcmask 1044480   ;;  %vm8042_vm7 = vcmask 1045504   ;;  %vm8034_vm8 = vcmask 1046528  }
  0x13   :  { %6665 = vmatpush.msra.mxu3 %v138_v46  ;;  %240 = vmatpush.msrb.mxu0 %v130_v22  ;;  %vm8035_vm10 = vcmask 48128   ;;  %vm8036_vm11 = vcmask 39936   ;;  %vm8037_vm12 = vcmask 31744   ;;  %vm8038_vm13 = vcmask 113664  }
  0x14   :  { %145 = vmatmul.f32.vlgmr.msra.gmra.mxu3 %v6870_v13  ;;  %139 = vmatpush.msra.mxu1 %v138_v46  ;;  %v370_v6 = vand.u32 4294901760, %v369_v2  ;;  %vm8044_vm14 = vcmask 23552   ;;  %vm897_vm15 = vcmask 105472   ;;  %vm905_vm0 = vcmask 97280  }
  0x15   :  { %197 = vmatpush.msrb.mxu3 %v6849_v3  ;;  %141 = vmatmul.f32.vlgmr.msra.gmra.mxu1 %v6881_v18 }
  0x16   :  { %267 = vmatpush.msrb.mxu1 %v6849_v3  ;;  %244 = vmatpush.msrb.mxu0 %v136_v24  ;;  %v327_v3 = vand.u32 4294901760, %v297_v61 }
  0x17   :  { %175 = vmatmul.f32.vlgmr.msrb.gmra.mxu2 %v6893_v25  ;;  %199 = vmatpush.msrb.mxu3 %v6851_v4 }
  0x18   :  { %269 = vmatpush.msrb.mxu1 %v6851_v4  ;;  %312 = vmatpush.msra.mxu2 %v6895_v26  ;;  %v364_v4 = vand.u32 4294901760, %v363_v63  ;;  %v328_v7 = vsub.f32 %v297_v61, %v327_v3 }
  0x19   :  { %201 = vmatpush.msrb.mxu3 %v6853_v5  ;;  %246 = vmatmul.f32.vlgmr.msrb.gmra.mxu0 %v6881_v18 }
  0x1a   :  { %271 = vmatpush.msrb.mxu1 %v6853_v5  ;;  %314 = vmatpush.msra.mxu2 %v6901_v32  ;;  %v322_v5 = vsub.f32 %v320_v59, %v321_v1 }
  0x1b   :  { %203 = vmatpush.msrb.mxu3 %v6864_v9  ;;  %395 = vmatpush.msra.mxu0 %v6919_v42 }
  0x1c   :  { %207 = vmatmul.f32.vlgmr.msrb.gmra.mxu3 %v89_v31  ;;  %273 = vmatpush.msrb.mxu1 %v6864_v9  ;;  %v323_v8 = vand.u32 4294901760, %v322_v5  ;;  %v329_v9 = vand.u32 4294901760, %v328_v7 }
  0x1d   :  { %353 = vmatpush.msra.mxu3 %v352_v62  ;;  %275 = vmatmul.f32.vlgmr.msrb.gmra.mxu1 %v6881_v18 }
  0x1e   :  { %316 = vmatpush.msra.mxu2 %v6921_v43  ;;  %398 = vmatpush.msra.mxu0 %v6927_v47  ;;  %v330_v10 = vsub.f32 %v328_v7, %v329_v9 }
  0x1f   :  { %180 = vmatmul.f32.gmra.mxu2 %v6885_v20  ;;  %359 = vmatpush.msra.mxu3 %v358_v0 }
  0x20   :  { %318 = vmatpush.msra.mxu2 %v6929_v48  ;;  %429 = vmatpush.msra.mxu1 %v6895_v26  ;;  %v331_v11 = vand.u32 4294901760, %v330_v10 }
  0x21   :  { %365 = vmatpush.msra.mxu3 %v364_v4  ;;  %250 = vmatmul.f32.gmra.mxu0 %v6870_v13 }
  0x22   :  { %464 = vmatpush.msrb.mxu2 %v350_v50  ;;  %401 = vmatpush.msra.mxu0 %v6934_v51 }
  0x23   :  { %371 = vmatpush.msra.mxu3 %v370_v6  ;;  %431 = vmatpush.msra.mxu1 %v6901_v32 }
  0x24   :  { %213 = vmatmul.f32.gmra.mxu3 %v97_v28  ;;  %468 = vmatpush.msrb.mxu2 %v356_v52 }
  0x25   :  { %279 = vmatmul.f32.gmra.mxu1 %v6870_v13  ;;  %499 = vmatpush.msrb.mxu3 %v6895_v26  ;;  %v6991_v13 = vand.u32 4294901760, %v49_v12 }
  0x26   :  { %472 = vmatpush.msrb.mxu2 %v362_v56  ;;  %404 = vmatpush.msra.mxu0 %v367_v54 }
  0x27   :  { %324 = vmatmul.f32.vlgmr.msra.gmra.mxu2 %v323_v8  ;;  %501 = vmatpush.msrb.mxu3 %v6901_v32  ;;  %v6994_v14 = vsub.f32 %v49_v12, %v6991_v13 }
  0x28   :  { %476 = vmatpush.msrb.mxu2 %v368_v60  ;;  %433 = vmatpush.msra.mxu1 %v6921_v43 }
  0x29   :  { %503 = vmatpush.msrb.mxu3 %v6921_v43  ;;  %407 = vmatmul.f32.vlgmr.msra.gmra.mxu0 %v320_v59  ;;  %v7000_v15 = vand.u32 4294901760, %v6994_v14 }
  0x2a   :  { %435 = vmatpush.msra.mxu1 %v6929_v48  ;;  %543 = vmatpush.msrb.mxu0 %v6991_v13 }
  0x2b   :  { %505 = vmatpush.msrb.mxu3 %v6929_v48  ;;  %596 = vmatpush.msra.mxu2 %v6994_v14  ;;  %v571_v16 = vsub.f32 %v6994_v14, %v7000_v15 }
  0x2c   :  { %373 = vmatmul.f32.vlgmr.msra.gmra.mxu3 %v6938_v53  ;;  %645 = vmatpush.msra.mxu0 %v7000_v15 }
  0x2d   :  { %439 = vmatmul.f32.vlgmr.msra.gmra.mxu1 %v321_v1  ;;  %619 = vmatpush.msra.mxu3 %v6991_v13  ;;  %v7005_v17 = vand.u32 4294901760, %v571_v16 }
  0x2f   :  { %332 = vmatmul.f32.gmra.mxu2 %v331_v11  ;;  %573 = vmatpush.msrb.mxu1 %v7005_v17 }
  0x31   :  { %412 = vmatmul.f32.gmra.mxu0 %v328_v7  ;;  %667 = vmatpush.msra.mxu1 %v6991_v13 }
  0x34   :  { %377 = vmatmul.f32.gmra.mxu3 %v327_v3 }
  0x35   :  { %445 = vmatmul.f32.gmra.mxu1 %v329_v9 }
  0x37   :  { %478 = vmatmul.f32.vlgmr.msrb.gmra.mxu2 %v6938_v53 }
  0x3c   :  { %507 = vmatmul.f32.vlgmr.msrb.gmra.mxu3 %v6938_v53 }
  0x3f   :  { %482 = vmatmul.f32.gmra.mxu2 %v327_v3 }
  0x44   :  { %511 = vmatmul.f32.gmra.mxu3 %v327_v3 }
  0x8e   :  { %v93_v18 = vpop.f32.mrf.mxu0 }
  0x8f   :  { %v94_v21 = vadd.f32 %v6690_v19, %v93_v18 }
  0x92   :  { %v7012_v20 = vpop.f32.mrf.mxu2  ;;  %v142_v22 = vpop.f32.mrf.mxu1 }
  0x93   :  { %v143_v24 = vadd.f32 %v142_v22, %v94_v21  ;;  %v46_v21 = vld [vmem:[%s8021_s2] sm:$0xff]  ;;  %v6761_v22 = vmov 0  }
  0x94   :  { %6687 = vset.pattern.permute.xlu2 %v6761_v22  ;;  %6688 = vset.pattern.permute.xlu1 %v6761_v22 }
  0x95   :  { %6689 = vset.pattern.permute.xlu0 %v6761_v22 }
  0x96   :  { %v247_v28 = vpop.f32.mrf.mxu0 }
  0x97   :  { %v7014_v23 = vpop.f32.mrf.mxu3 }
  0x9a   :  { %v176_v25 = vpop.f32.mrf.mxu2  ;;  %v276_v30 = vpop.f32.mrf.mxu1 }
  0x9b   :  { %v177_v26 = vadd.f32 %v176_v25, %v143_v24 }
  0x9e   :  { %v7027_v39 = vpop.f32.mrf.mxu0 }
  0x9f   :  { %v208_v27 = vpop.f32.mrf.mxu3 }
  0xa0   :  { %v209_v29 = vadd.f32 %v208_v27, %v177_v26 }
  0xa2   :  { %v7016_v31 = vpop.f32.mrf.mxu2  ;;  %v248_v32 = vadd.f32 %v247_v28, %v209_v29  ;;  %v7029_v43 = vpop.f32.mrf.mxu1 }
  0xa4   :  { %v277_v33 = vadd.f32 %v276_v30, %v248_v32 }
  0xa6   :  { %v7018_v34 = vmul.f32 0.35355338, %v277_v33  ;;  %v408_v49 = vpop.f32.mrf.mxu0 }
  0xa7   :  { %v7020_v35 = vpop.f32.mrf.mxu3 }
  0xa8   :  { %v525_v36 = vsel %vm523_vm1, %v7018_v34, 0 }
  0xa9   :  { %v544_v38 = vand.u32 4294901760, %v525_v36 }
  0xaa   :  { %v325_v40 = vpop.f32.mrf.mxu2  ;;  %v440_v52 = vpop.f32.mrf.mxu1 }
  0xab   :  { %575 = vmatmul.f32.vlgmr.msrb.gmra.mxu1 %v544_v38  ;;  %v545_v41 = vsub.f32 %v525_v36, %v544_v38  ;;  %v326_v42 = vadd.f32 %v6691_v37, %v325_v40 }
  0xad   :  { %599 = vmatmul.f32.vlgmr.msra.gmra.mxu2 %v545_v41  ;;  %v546_v44 = vand.u32 4294901760, %v545_v41 }
  0xae   :  { %v7039_v1 = vpop.f32.mrf.mxu0 }
  0xaf   :  { %v374_v45 = vpop.f32.mrf.mxu3  ;;  %623 = vmatmul.f32.vlgmr.msra.gmra.mxu3 %v546_v44  ;;  %v547_v46 = vsub.f32 %v545_v41, %v546_v44 }
  0xb0   :  { %v375_v47 = vadd.f32 %v374_v45, %v326_v42 }
  0xb1   :  { %v548_v48 = vand.u32 4294901760, %v547_v46 }
  0xb2   :  { %v7031_v50 = vpop.f32.mrf.mxu2  ;;  %v409_v51 = vadd.f32 %v408_v49, %v375_v47  ;;  %v7041_v2 = vpop.f32.mrf.mxu1 }
  0xb3   :  { %549 = vmatmul.f32.vlgmr.msrb.gmra.mxu0 %v548_v48  ;;  %669 = vmatmul.f32.vlgmr.msra.gmra.mxu1 %v544_v38 }
  0xb4   :  { %v441_v54 = vadd.f32 %v440_v52, %v409_v51 }
  0xb7   :  { %v7033_v53 = vpop.f32.mrf.mxu3 }
  0xba   :  { %v479_v55 = vpop.f32.mrf.mxu2 }
  0xbb   :  { %647 = vmatmul.f32.vlgmr.msra.gmra.mxu0 %v544_v38  ;;  %v480_v56 = vadd.f32 %v479_v55, %v441_v54 }
  0xbf   :  { %v508_v57 = vpop.f32.mrf.mxu3 }
  0xc0   :  { %v7035_v58 = vadd.f32 %v508_v57, %v480_v56 }
  0xc2   :  { %v714_v59 = vsel %vm523_vm1, %v7035_v58, 0  ;;  %v7043_v3 = vpop.f32.mrf.mxu2 }
  0xc3   :  { %v731_v60 = vand.u32 4294901760, %v714_v59 }
  0xc5   :  { %732 = vmatpush.xpose.msrb.mxu2 %v731_v60  ;;  %808 = vmatpush.xpose.msrb.mxu1 %v731_v60  ;;  %v758_v61 = vsub.f32 %v714_v59, %v731_v60 }
  0xc7   :  { %785 = vmatpush.xpose.msrb.mxu0 %v758_v61  ;;  %v759_v62 = vand.u32 4294901760, %v758_v61  ;;  %v7045_v4 = vpop.f32.mrf.mxu3 }
  0xc8   :  { %738 = vmatmul.f32.vlgmr.msrb.gmra.mxu2 %v548_v48  ;;  %812 = vmatmul.f32.vlgmr.msrb.gmra.mxu1 %v546_v44  ;;  %v48_v44 = vld [vmem:[%s8022_s3] sm:$0x3] }
  0xc9   :  { %v760_v63 = vsub.f32 %v758_v61, %v759_v62  ;;  %834 = vmatpush.xpose.msra.mxu2 %v759_v62  ;;  %v520_v48 = vperm.slane %v48_v44, 0 }
  0xca   :  { %788 = vmatmul.f32.vlgmr.msrb.gmra.mxu0 %v545_v41 }
  0xcb   :  { %v761_v0 = vand.u32 4294901760, %v760_v63 }
  0xcd   :  { %762 = vmatpush.xpose.msrb.mxu3 %v761_v0 }
  0xd0   :  { %764 = vmatmul.f32.vlgmr.msrb.gmra.mxu3 %v544_v38  ;;  %836 = vmatmul.f32.vlgmr.msra.gmra.mxu2 %v544_v38 }
  0xd1   :  { %856 = vmatpush.xpose.msra.mxu3 %v731_v60 }
  0xd8   :  { %858 = vmatmul.f32.vlgmr.msra.gmra.mxu3 %v544_v38 }
 0x128   :  { %v576_v5 = vpop.f32.mrf.mxu1 }
 0x130   :  { %v550_v6 = vpop.f32.mrf.mxu0  ;;  %v600_v8 = vpop.f32.mrf.mxu2 }
 0x131   :  { %v577_v7 = vadd.f32 %v576_v5, %v550_v6  ;;  %v670_v18 = vpop.f32.mrf.mxu1 }
 0x132   :  { %v624_v10 = vpop.f32.mrf.mxu3 }
 0x133   :  { %v601_v9 = vadd.f32 %v600_v8, %v577_v7 }
 0x135   :  { %v625_v11 = vadd.f32 %v624_v10, %v601_v9  ;;  %v51_v10 = vld [vmem:[%s8030_s11 + $0x8] sm:$0x7f] }
 0x138   :  { %v648_v12 = vpop.f32.mrf.mxu0 }
 0x139   :  { %v649_v16 = vadd.f32 %v648_v12, %v625_v11  ;;  %v962_v11 = vsel %vm8034_vm8, %v51_v10, 0 }
 0x13a   :  { %v7081_v12 = vand.u32 4294901760, %v962_v11 }
 0x13b   :  { %v671_v19 = vadd.f32 %v670_v18, %v649_v16  ;;  %v50_v16 = vld [vmem:[%s8030_s11] sm:$0xff]  ;;  %s6764_s11 = smov 120  }
 0x13c   :  { %v7087_v18 = vsub.f32 %v962_v11, %v7081_v12  ;;  %1063 = vmatpush.msrb.mxu3 %v7081_v12  ;;  %979 = vmatpush.msra.mxu0 %v7081_v12 }
 0x13d   :  { %686 = vrot.lane.b32.xlu2 %v671_v19, %s6754_s28  ;;  %680 = vrot.lane.b32.xlu1 %v671_v19, %s6755_s29 }
 0x13e   :  { %674 = vrot.lane.b32.xlu0 %v671_v19, %s6756_s30  ;;  %1038 = vmatpush.msrb.mxu2 %v7087_v18 }
 0x145   :  { %689 = vrot.lane.b32.xlu2 %v671_v19, %s6757_s13  ;;  %683 = vrot.lane.b32.xlu1 %v671_v19, %s6758_s14  ;;  %v813_v55 = vpop.f32.mrf.mxu1 }
 0x146   :  { %677 = vrot.lane.b32.xlu0 %v671_v19, %s6759_s4 }
 0x147   :  { %v789_v52 = vpop.f32.mrf.mxu0 }
 0x14b   :  { %v739_v42 = vpop.f32.mrf.mxu2 }
 0x14d   :  { %517 = vperm.xlu2 %6687, %v46_v21  }
 0x14e   :  { %692 = vrot.lane.b32.xlu0 %v671_v19, %s6760_s0 }
 0x153   :  { %v765_v45 = vpop.f32.mrf.mxu3  ;;  %v837_v59 = vpop.f32.mrf.mxu2 }
 0x15b   :  { %v859_v61 = vpop.f32.mrf.mxu3 }
 0x197   :  { %v687_v26 = vpop.permute.xlu2 %686 }
 0x19f   :  { %v690_v37 = vpop.permute.xlu2 %689 }
 0x1a7   :  { %v518_v51 = vpop.permute.xlu2 %517 }
 0x1a8   :  { %v7068_v56 = vmul.f32 %v520_v48, %v518_v51  ;;  %v7131_v48 = vand.u32 4294901760, %v7087_v18 }
 0x1aa   :  { %vm8033_vm9 = vcmp.eq.f32.partialorder %v7068_v56, 0.0 }
 0x1af   :  { %v681_v24 = vpop.permute.xlu1 %680 }
 0x1b0   :  { %v675_v25 = vpop.permute.xlu0 %674 }
 0x1b1   :  { %v696_v27 = vsel %vm695_vm2, %v671_v19, %v675_v25  ;;  %v7089_v19 = vand.u32 4294901760, %v50_v16 }
 0x1b3   :  { %v7095_v21 = vsub.f32 %v50_v16, %v7089_v19  ;;  %1065 = vmatpush.msrb.mxu3 %v7089_v19  ;;  %981 = vmatpush.msra.mxu0 %v7089_v19 }
 0x1b5   :  { %1041 = vmatpush.msrb.mxu2 %v7095_v21  ;;  %v7136_v51 = vand.u32 4294901760, %v7095_v21  ;;  %1090 = vmatpush.msrb.mxu0 %v7131_v48 }
 0x1b7   :  { %v684_v30 = vpop.permute.xlu1 %683  ;;  %1094 = vmatpush.msrb.mxu0 %v7136_v51 }
 0x1b8   :  { %v678_v28 = vpop.permute.xlu0 %677 }
 0x1b9   :  { %v698_v29 = vsel %vm697_vm3, %v696_v27, %v678_v28 }
 0x1ba   :  { %v700_v32 = vsel %vm699_vm4, %v698_v29, %v681_v24 }
 0x1bb   :  { %v702_v33 = vsel %vm701_vm5, %v700_v32, %v684_v30 }
 0x1bc   :  { %v704_v36 = vsel %vm8043_vm6, %v702_v33, %v687_v26 }
 0x1bd   :  { %v706_v40 = vsel %vm8042_vm7, %v704_v36, %v690_v37 }
 0x1c0   :  { %v693_v38 = vpop.permute.xlu0 %692 }
 0x1c1   :  { %v708_v41 = vsel %vm8034_vm8, %v706_v40, %v693_v38  ;;  %vm927_vm8 = vcmask 7168  }
 0x1c2   :  { %710 = vrot.lane.b32.xlu1 %v708_v41, %s6762_s17 }
 0x234   :  { %v711_v46 = vpop.permute.xlu1 %710 }
 0x235   :  { %v740_v47 = vadd.f32 %v739_v42, %v711_v46 }
 0x237   :  { %v766_v49 = vadd.f32 %v765_v45, %v740_v47 }
 0x239   :  { %v790_v54 = vadd.f32 %v789_v52, %v766_v49  ;;  %v1008_v49 = vsub.f32 %v7087_v18, %v7131_v48 }
 0x23b   :  { %v814_v57 = vadd.f32 %v813_v55, %v790_v54  ;;  %v7139_v52 = vand.u32 4294901760, %v1008_v49  ;;  %v1014_v54 = vsub.f32 %v7095_v21, %v7136_v51 }
 0x23d   :  { %v838_v60 = vadd.f32 %v837_v59, %v814_v57  ;;  %1010 = vmatpush.msra.mxu1 %v7139_v52  ;;  %v7145_v55 = vand.u32 4294901760, %v1014_v54 }
 0x23f   :  { %v860_v62 = vadd.f32 %v859_v61, %v838_v60  ;;  %1016 = vmatpush.msra.mxu1 %v7145_v55 }
 0x241   :  { %v862_v63 = vsel %vm8033_vm9, -10000.0, %v860_v62  ;;  %1115 = vmatpush.msrb.mxu1 %v7081_v12  ;;  %vm8039_vm9 = vcmask 89088  }
 0x242   :  { %v863_v0 = vsel %vm523_vm1, %v862_v63, -inf }
 0x243   :  { %864 = vmax.xlane.f32.xlu0 %v863_v0  ;;  %1117 = vmatpush.msrb.mxu1 %v7089_v19 }
 0x2b6   :  { %v865_v5 = vpop.xlane.xlu0 %864 }
 0x2b7   :  { %v866_v6 = vsub.f32 %v862_v63, %v865_v5 }
 0x2b9   :  { %v867_v7 = vmul.f32 1.442695, %v866_v6 }
 0x2bb   :  { %6693 = vpow2.f32 %v867_v7 }
 0x2c1   :  { %v6694_v8 = vpop.eup %6693 }
 0x2c2   :  { %v869_v9 = vsel %vm523_vm1, %v6694_v8, 0.0 }
 0x2c3   :  { %870 = vadd.xlane.f32.xlu1 %v869_v9 }
 0x2dc   :  { %1123 = vrot.lane.b32.xlu1 %v7035_v58, %s6763_s20 }
 0x336   :  { %v871_v22 = vpop.xlane.xlu1 %870 }
 0x337   :  { %6695 = vrcp.f32 %v871_v22 }
 0x33d   :  { %v6696_v24 = vpop.eup %6695 }
 0x33e   :  { %v873_v25 = vmul.f32 %v6696_v24, %v871_v22 }
 0x340   :  { %v874_v26 = vsub.f32 2.0, %v873_v25 }
 0x342   :  { %v875_v27 = vmul.f32 %v6696_v24, %v874_v26 }
 0x344   :  { %v7100_v28 = vmul.f32 %v6694_v8, %v875_v27 }
 0x346   :  { %878 = vrot.lane.b32.xlu2 %v7100_v28, %s6760_s0  ;;  %v923_v29 = vrot.slane %v7100_v28, 6  ;;  %v883_v30 = vrot.slane %v7100_v28, 1  ;;  %v891_v38 = vrot.slane %v7100_v28, 2  ;;  %v899_v42 = vrot.slane %v7100_v28, 3 }
 0x347   :  { %v907_v44 = vrot.slane %v7100_v28, 4  ;;  %v915_v45 = vrot.slane %v7100_v28, 5  ;;  %v1126_v27 = vsel %vm523_vm1, %v7100_v28, 0  ;;  %v931_v54 = vsel %vm523_vm1, %v7100_v28, 0.0 }
 0x348   :  { %924 = vrot.lane.b32.xlu0 %v923_v29, %s6756_s30 }
 0x34e   :  { %884 = vrot.lane.b32.xlu2 %v883_v30, %s6757_s13  ;;  %v1124_v32 = vpop.permute.xlu1 %1123 }
 0x34f   :  { %v7108_v33 = vand.u32 4294901760, %v1124_v32 }
 0x351   :  { %v7111_v36 = vsub.f32 %v1124_v32, %v7108_v33  ;;  %1144 = vmatpush.msra.mxu2 %v7108_v33 }
 0x353   :  { %v1171_v37 = vand.u32 4294901760, %v7111_v36 }
 0x355   :  { %v1172_v40 = vsub.f32 %v7111_v36, %v1171_v37 }
 0x356   :  { %892 = vrot.lane.b32.xlu2 %v891_v38, %s6754_s28 }
 0x357   :  { %v1173_v41 = vand.u32 4294901760, %v1172_v40 }
 0x359   :  { %1174 = vmatpush.msra.mxu3 %v1173_v41 }
 0x35e   :  { %900 = vrot.lane.b32.xlu2 %v899_v42, %s6758_s14 }
 0x366   :  { %908 = vrot.lane.b32.xlu2 %v907_v44, %s6755_s29  ;;  %v1145_v44 = vand.u32 4294901760, %v1126_v27 }
 0x36e   :  { %916 = vrot.lane.b32.xlu2 %v915_v45, %s6759_s4 }
 0x376   :  { %1274 = vrot.lane.b32.xlu2 %v7018_v34, %s6764_s11 }
 0x37e   :  { %1453 = vrot.lane.b32.xlu2 %v7035_v58, %s6764_s11 }
 0x3a0   :  { %v879_v46 = vpop.permute.xlu2 %878 }
 0x3a8   :  { %v885_v47 = vpop.permute.xlu2 %884 }
 0x3a9   :  { %v888_v60 = vsel %vm8035_vm10, 0.0, %v885_v47  ;;  %vm881_vm10 = vcmask 56320  }
 0x3aa   :  { %v890_v0 = vsel %vm8038_vm13, %v888_v60, 0.0  ;;  %vm8045_vm13 = vcmask 80896   ;;  %v882_v24 = vsel %vm881_vm10, 0.0, %v879_v46 }
 0x3ab   :  { %v933_v9 = vrot.slane %v890_v0, 7 }
 0x3ad   :  { %v950_v29 = vsel %vm695_vm2, %v882_v24, %v933_v9 }
 0x3b0   :  { %v893_v57 = vpop.permute.xlu2 %892 }
 0x3b1   :  { %v896_v61 = vsel %vm8036_vm11, 0.0, %v893_v57  ;;  %vm8040_vm11 = vcmask 72704  }
 0x3b2   :  { %v898_v6 = vsel %vm897_vm15, %v896_v61, 0.0 }
 0x3b3   :  { %v936_v11 = vrot.slane %v898_v6, 6 }
 0x3b5   :  { %v951_v38 = vsel %vm697_vm3, %v950_v29, %v936_v11 }
 0x3b8   :  { %v901_v59 = vpop.permute.xlu2 %900 }
 0x3b9   :  { %v904_v63 = vsel %vm8037_vm12, 0.0, %v901_v59  ;;  %vm919_vm12 = vcmask 15360   ;;  %v1146_v59 = vsub.f32 %v1126_v27, %v1145_v44 }
 0x3ba   :  { %v925_v7 = vpop.permute.xlu0 %924  ;;  %v906_v8 = vsel %vm905_vm0, %v904_v63, 0.0 }
 0x3bb   :  { %v928_v16 = vsel %vm927_vm8, 0.0, %v925_v7  ;;  %v939_v22 = vrot.slane %v906_v8, 5  ;;  %v1147_v0 = vand.u32 4294901760, %v1146_v59 }
 0x3bc   :  { %v930_v30 = vsel %vm8040_vm11, %v928_v16, 0.0  ;;  %vm8046_vm11 = vcmask 1046528  }
 0x3bd   :  { %v952_v41 = vsel %vm699_vm4, %v951_v38, %v939_v22  ;;  %v948_v45 = vrot.slane %v930_v30, 2  ;;  %v1148_v28 = vsub.f32 %v1146_v59, %v1147_v0 }
 0x3bf   :  { %v1149_v11 = vand.u32 4294901760, %v1148_v28 }
 0x3c0   :  { %v909_v62 = vpop.permute.xlu2 %908 }
 0x3c1   :  { %v912_v5 = vsel %vm8044_vm14, 0.0, %v909_v62 }
 0x3c2   :  { %v914_v10 = vsel %vm8039_vm9, %v912_v5, 0.0  ;;  %vm8041_vm9 = vcmask 121856  }
 0x3c3   :  { %v942_v25 = vrot.slane %v914_v10, 4 }
 0x3c5   :  { %v953_v46 = vsel %vm701_vm5, %v952_v41, %v942_v25 }
 0x3c8   :  { %v917_v26 = vpop.permute.xlu2 %916 }
 0x3c9   :  { %v920_v32 = vsel %vm919_vm12, 0.0, %v917_v26 }
 0x3ca   :  { %v922_v40 = vsel %vm8045_vm13, %v920_v32, 0.0 }
 0x3cb   :  { %v945_v42 = vrot.slane %v922_v40, 3 }
 0x3cd   :  { %v954_v47 = vsel %vm8043_vm6, %v953_v46, %v945_v42 }
 0x3ce   :  { %v955_v49 = vsel %vm8042_vm7, %v954_v47, %v948_v45 }
 0x3cf   :  { %v956_v57 = vsel %vm8046_vm11, %v955_v49, %v931_v54 }
 0x3d0   :  { %v1275_v60 = vpop.permute.xlu2 %1274  ;;  %v959_v61 = vsel %vm8041_vm9, %v956_v57, 0  ;;  %vm8059_vm9 = vcmp.eq.f32.partialorder %v7068_v56, 0.0 }
 0x3d1   :  { %v982_v62 = vand.u32 4294901760, %v959_v61 }
 0x3d3   :  { %1018 = vmatmul.f32.vlgmr.msra.gmra.mxu1 %v982_v62  ;;  %v983_v63 = vsub.f32 %v959_v61, %v982_v62 }
 0x3d4   :  { %1220 = vmatpush.msra.mxu1 %v7108_v33 }
 0x3d5   :  { %1044 = vmatmul.f32.vlgmr.msrb.gmra.mxu2 %v983_v63  ;;  %v984_v5 = vand.u32 4294901760, %v983_v63 }
 0x3d6   :  { %1246 = vmatpush.msrb.mxu2 %v1171_v37  ;;  %v1276_v37 = vsel %vm523_vm1, %v1275_v60, 0 }
 0x3d7   :  { %1069 = vmatmul.f32.vlgmr.msrb.gmra.mxu3 %v984_v5  ;;  %v985_v6 = vsub.f32 %v983_v63, %v984_v5 }
 0x3d8   :  { %1268 = vmatpush.msrb.mxu3 %v7108_v33  ;;  %v1454_v7 = vpop.permute.xlu2 %1453  ;;  %v1295_v33 = vand.u32 4294901760, %v1276_v37 }
 0x3d9   :  { %v1459_v8 = vsel %vm523_vm1, %v1454_v7, 0  ;;  %v986_v9 = vand.u32 4294901760, %v985_v6 }
 0x3da   :  { %v1476_v10 = vand.u32 4294901760, %v1459_v8 }
 0x3db   :  { %987 = vmatmul.f32.vlgmr.msra.gmra.mxu0 %v986_v9  ;;  %1119 = vmatmul.f32.vlgmr.msrb.gmra.mxu1 %v982_v62 }
 0x3dc   :  { %v1503_v16 = vsub.f32 %v1459_v8, %v1476_v10  ;;  %1197 = vmatpush.msra.mxu0 %v7111_v36  ;;  %1324 = vmatpush.msrb.mxu1 %v7005_v17  ;;  %v1296_v36 = vsub.f32 %v1276_v37, %v1295_v33 }
 0x3dd   :  { %1150 = vmatmul.f32.vlgmr.msra.gmra.mxu2 %v1149_v11 }
 0x3de   :  { %v1504_v22 = vand.u32 4294901760, %v1503_v16  ;;  %1347 = vmatpush.msra.mxu2 %v6994_v14  ;;  %v1297_v26 = vand.u32 4294901760, %v1296_v36 }
 0x3df   :  { %1176 = vmatmul.f32.vlgmr.msra.gmra.mxu3 %v1145_v44 }
 0x3e0   :  { %1370 = vmatpush.msra.mxu3 %v6991_v13  ;;  %v1505_v24 = vsub.f32 %v1503_v16, %v1504_v22  ;;  %v1298_v27 = vsub.f32 %v1296_v36, %v1297_v26 }
 0x3e2   :  { %v1506_v25 = vand.u32 4294901760, %v1505_v24  ;;  %v1299_v29 = vand.u32 4294901760, %v1298_v27 }
 0x3e3   :  { %1096 = vmatmul.f32.vlgmr.msrb.gmra.mxu0 %v982_v62  ;;  %1224 = vmatmul.f32.vlgmr.msra.gmra.mxu1 %v1147_v0 }
 0x3e4   :  { %1418 = vmatpush.msra.mxu1 %v6991_v13  ;;  %1294 = vmatpush.msrb.mxu0 %v6991_v13 }
 0x3e5   :  { %1248 = vmatmul.f32.vlgmr.msrb.gmra.mxu2 %v1145_v44 }
 0x3e6   :  { %1477 = vmatpush.xpose.msrb.mxu2 %v1476_v10 }
 0x3e7   :  { %1270 = vmatmul.f32.vlgmr.msrb.gmra.mxu3 %v1145_v44 }
 0x3e8   :  { %1507 = vmatpush.xpose.msrb.mxu3 %v1506_v25 }
 0x3eb   :  { %1200 = vmatmul.f32.vlgmr.msra.gmra.mxu0 %v1146_v59  ;;  %1326 = vmatmul.f32.vlgmr.msrb.gmra.mxu1 %v1295_v33 }
 0x3ec   :  { %1553 = vmatpush.xpose.msrb.mxu1 %v1476_v10  ;;  %1396 = vmatpush.msra.mxu0 %v7000_v15 }
 0x3ed   :  { %1350 = vmatmul.f32.vlgmr.msra.gmra.mxu2 %v1296_v36 }
 0x3ee   :  { %1579 = vmatpush.xpose.msra.mxu2 %v1504_v22 }
 0x3ef   :  { %1374 = vmatmul.f32.vlgmr.msra.gmra.mxu3 %v1297_v26 }
 0x3f0   :  { %1601 = vmatpush.xpose.msra.mxu3 %v1476_v10 }
 0x3f3   :  { %1300 = vmatmul.f32.vlgmr.msrb.gmra.mxu0 %v1299_v29  ;;  %1420 = vmatmul.f32.vlgmr.msra.gmra.mxu1 %v1295_v33 }
 0x3f4   :  { %1530 = vmatpush.xpose.msrb.mxu0 %v1503_v16  ;;  %1738 = vmatpush.msra.mxu1 %v7139_v52 }
 0x3f5   :  { %1483 = vmatmul.f32.vlgmr.msrb.gmra.mxu2 %v1299_v29 }
 0x3f6   :  { %1744 = vmatpush.msra.mxu1 %v7145_v55  ;;  %1766 = vmatpush.msrb.mxu2 %v7087_v18 }
 0x3f7   :  { %1509 = vmatmul.f32.vlgmr.msrb.gmra.mxu3 %v1295_v33 }
 0x3f8   :  { %1769 = vmatpush.msrb.mxu2 %v7095_v21  ;;  %1791 = vmatpush.msrb.mxu3 %v7081_v12 }
 0x3fa   :  { %1793 = vmatpush.msrb.mxu3 %v7089_v19 }
 0x3fb   :  { %1398 = vmatmul.f32.vlgmr.msra.gmra.mxu0 %v1295_v33  ;;  %1557 = vmatmul.f32.vlgmr.msrb.gmra.mxu1 %v1297_v26 }
 0x3fc   :  { %1843 = vmatpush.msrb.mxu1 %v7081_v12  ;;  %1707 = vmatpush.msra.mxu0 %v7081_v12 }
 0x3fd   :  { %1581 = vmatmul.f32.vlgmr.msra.gmra.mxu2 %v1295_v33 }
 0x3fe   :  { %1845 = vmatpush.msrb.mxu1 %v7089_v19  ;;  %1709 = vmatpush.msra.mxu0 %v7089_v19 }
 0x3ff   :  { %1603 = vmatmul.f32.vlgmr.msra.gmra.mxu3 %v1295_v33 }
 0x403   :  { %1533 = vmatmul.f32.vlgmr.msrb.gmra.mxu0 %v1296_v36 }
 0x404   :  { %1818 = vmatpush.msrb.mxu0 %v7131_v48 }
 0x406   :  { %1822 = vmatpush.msrb.mxu0 %v7136_v51 }
 0x450   :  { %v7200_v30 = vpop.f32.mrf.mxu1 }
 0x451   :  { %8047 = vst [vmem:[#allocation5_spill] sm:$0xff] %v7200_v30 }
 0x458   :  { %v7202_v32 = vpop.f32.mrf.mxu0  ;;  %v7204_v38 = vpop.f32.mrf.mxu2 }
 0x459   :  { %8048 = vst [vmem:[#allocation6_spill] sm:$0xff] %v7202_v32  ;;  %v7208_v41 = vpop.f32.mrf.mxu1 }
 0x45a   :  { %8049 = vst [vmem:[#allocation7_spill] sm:$0xff] %v7204_v38  ;;  %v7206_v40 = vpop.f32.mrf.mxu3 }
 0x45b   :  { %8050 = vst [vmem:[#allocation8_spill] sm:$0xff] %v7206_v40 }
 0x45c   :  { %8051 = vst [vmem:[#allocation9_spill] sm:$0xff] %v7208_v41 }
 0x460   :  { %v7210_v42 = vpop.f32.mrf.mxu0  ;;  %v7212_v44 = vpop.f32.mrf.mxu2 }
 0x461   :  { %8052 = vst [vmem:[#allocation10_spill] sm:$0xff] %v7210_v42  ;;  %v7216_v46 = vpop.f32.mrf.mxu1 }
 0x462   :  { %8053 = vst [vmem:[#allocation11_spill] sm:$0xff] %v7212_v44  ;;  %v7214_v45 = vpop.f32.mrf.mxu3 }
 0x463   :  { %8054 = vst [vmem:[#allocation12_spill] sm:$0xff] %v7214_v45 }
 0x464   :  { %8055 = vst [vmem:[#allocation13_spill] sm:$0xff] %v7216_v46 }
 0x468   :  { %v7218_v47 = vpop.f32.mrf.mxu0  ;;  %v7220_v49 = vpop.f32.mrf.mxu2 }
 0x469   :  { %8056 = vst [vmem:[#allocation14_spill] sm:$0xff] %v7218_v47  ;;  %v1327_v57 = vpop.f32.mrf.mxu1 }
 0x46a   :  { %8057 = vst [vmem:[#allocation15_spill] sm:$0xff] %v7220_v49  ;;  %v7222_v54 = vpop.f32.mrf.mxu3 }
 0x46b   :  { %8058 = vst [vmem:[#allocation16_spill] sm:$0xff] %v7222_v54 }
 0x470   :  { %v1301_v59 = vpop.f32.mrf.mxu0  ;;  %v1351_v61 = vpop.f32.mrf.mxu2 }
 0x471   :  { %v1328_v60 = vadd.f32 %v1327_v57, %v1301_v59  ;;  %v1421_v28 = vpop.f32.mrf.mxu1 }
 0x472   :  { %v1375_v63 = vpop.f32.mrf.mxu3 }
 0x473   :  { %v1352_v62 = vadd.f32 %v1351_v61, %v1328_v60 }
 0x475   :  { %v1376_v0 = vadd.f32 %v1375_v63, %v1352_v62 }
 0x478   :  { %v1399_v5 = vpop.f32.mrf.mxu0  ;;  %v1484_v57 = vpop.f32.mrf.mxu2 }
 0x479   :  { %v1400_v6 = vadd.f32 %v1399_v5, %v1376_v0  ;;  %v1558_v5 = vpop.f32.mrf.mxu1 }
 0x47a   :  { %v1510_v59 = vpop.f32.mrf.mxu3 }
 0x47b   :  { %v1422_v7 = vadd.f32 %v1421_v28, %v1400_v6 }
 0x47d   :  { %1431 = vrot.lane.b32.xlu1 %v1422_v7, %s6755_s29  ;;  %1428 = vrot.lane.b32.xlu2 %v1422_v7, %s6759_s4 }
 0x47e   :  { %1425 = vrot.lane.b32.xlu0 %v1422_v7, %s6756_s30 }
 0x480   :  { %v1534_v63 = vpop.f32.mrf.mxu0  ;;  %v1582_v28 = vpop.f32.mrf.mxu2 }
 0x485   :  { %1440 = vrot.lane.b32.xlu1 %v1422_v7, %s6757_s13  ;;  %1437 = vrot.lane.b32.xlu2 %v1422_v7, %s6754_s28 }
 0x486   :  { %1434 = vrot.lane.b32.xlu0 %v1422_v7, %s6758_s14 }
 0x48e   :  { %1443 = vrot.lane.b32.xlu0 %v1422_v7, %s6760_s0 }
 0x4d7   :  { %v1429_v9 = vpop.permute.xlu2 %1428 }
 0x4df   :  { %v1438_v24 = vpop.permute.xlu2 %1437 }
 0x4ef   :  { %v1432_v11 = vpop.permute.xlu1 %1431 }
 0x4f0   :  { %v1426_v8 = vpop.permute.xlu0 %1425 }
 0x4f1   :  { %v1446_v10 = vsel %vm695_vm2, %v1422_v7, %v1426_v8  ;;  %v1604_v8 = vpop.f32.mrf.mxu3 }
 0x4f2   :  { %v1447_v16 = vsel %vm697_vm3, %v1446_v10, %v1429_v9 }
 0x4f3   :  { %v1448_v22 = vsel %vm699_vm4, %v1447_v16, %v1432_v11 }
 0x4f7   :  { %v1441_v25 = vpop.permute.xlu1 %1440 }
 0x4f8   :  { %v1435_v37 = vpop.permute.xlu0 %1434 }
 0x4f9   :  { %v1449_v33 = vsel %vm701_vm5, %v1448_v22, %v1435_v37 }
 0x4fa   :  { %v1450_v36 = vsel %vm8043_vm6, %v1449_v33, %v1438_v24  ;;  %vm8063_vm6 = vcmask 113664  }
 0x4fb   :  { %v1451_v27 = vsel %vm8042_vm7, %v1450_v36, %v1441_v25  ;;  %vm8062_vm7 = vcmask 31744  }
 0x500   :  { %v1444_v26 = vpop.permute.xlu0 %1443 }
 0x501   :  { %v1452_v29 = vsel %vm8046_vm11, %v1451_v27, %v1444_v26  ;;  %vm8061_vm11 = vcmask 39936  }
 0x502   :  { %1456 = vrot.lane.b32.xlu2 %v1452_v29, %s6762_s17 }
 0x55c   :  { %v1457_v60 = vpop.permute.xlu2 %1456 }
 0x55d   :  { %v1485_v61 = vadd.f32 %v1484_v57, %v1457_v60 }
 0x55f   :  { %v1511_v62 = vadd.f32 %v1510_v59, %v1485_v61 }
 0x561   :  { %v1535_v0 = vadd.f32 %v1534_v63, %v1511_v62 }
 0x563   :  { %v1559_v6 = vadd.f32 %v1558_v5, %v1535_v0 }
 0x565   :  { %v1583_v7 = vadd.f32 %v1582_v28, %v1559_v6 }
 0x567   :  { %v1605_v9 = vadd.f32 %v1604_v8, %v1583_v7 }
 0x569   :  { %v1607_v10 = vsel %vm8059_vm9, -10000.0, %v1605_v9  ;;  %vm8060_vm9 = vcmask 48128  }
 0x56a   :  { %v1608_v11 = vsel %vm523_vm1, %v1607_v10, -inf }
 0x56b   :  { %1609 = vmax.xlane.f32.xlu1 %v1608_v11 }
 0x5de   :  { %v1610_v16 = vpop.xlane.xlu1 %1609 }
 0x5df   :  { %v1611_v37 = vsub.f32 %v1607_v10, %v1610_v16 }
 0x5e1   :  { %v1612_v22 = vmul.f32 1.442695, %v1611_v37 }
 0x5e3   :  { %6697 = vpow2.f32 %v1612_v22 }
 0x5e9   :  { %v6698_v33 = vpop.eup %6697 }
 0x5ea   :  { %v1614_v24 = vsel %vm523_vm1, %v6698_v33, 0.0 }
 0x5eb   :  { %1615 = vadd.xlane.f32.xlu0 %v1614_v24 }
 0x65e   :  { %v1616_v36 = vpop.xlane.xlu0 %1615 }
 0x65f   :  { %6699 = vrcp.f32 %v1616_v36 }
 0x665   :  { %v6700_v25 = vpop.eup %6699 }
 0x666   :  { %v1618_v26 = vmul.f32 %v6700_v25, %v1616_v36 }
 0x668   :  { %v1619_v27 = vsub.f32 2.0, %v1618_v26 }
 0x66a   :  { %v1620_v29 = vmul.f32 %v6700_v25, %v1619_v27 }
 0x66c   :  { %v1621_v57 = vmul.f32 %v6698_v33, %v1620_v29 }
 0x66e   :  { %1623 = vrot.lane.b32.xlu2 %v1621_v57, %s6760_s0  ;;  %v1657_v59 = vrot.slane %v1621_v57, 6  ;;  %v1651_v60 = vrot.slane %v1621_v57, 5  ;;  %v1627_v61 = vrot.slane %v1621_v57, 1  ;;  %v1633_v62 = vrot.slane %v1621_v57, 2 }
 0x66f   :  { %v1639_v63 = vrot.slane %v1621_v57, 3  ;;  %v1645_v0 = vrot.slane %v1621_v57, 4 }
 0x670   :  { %1658 = vrot.lane.b32.xlu0 %v1657_v59, %s6756_s30  ;;  %1652 = vrot.lane.b32.xlu1 %v1651_v60, %s6759_s4 }
 0x676   :  { %1628 = vrot.lane.b32.xlu2 %v1627_v61, %s6757_s13 }
 0x67e   :  { %1634 = vrot.lane.b32.xlu2 %v1633_v62, %s6754_s28  ;;  %v1854_v62 = vsel %vm523_vm1, %v1621_v57, 0 }
 0x686   :  { %1640 = vrot.lane.b32.xlu2 %v1639_v63, %s6758_s14 }
 0x68e   :  { %1646 = vrot.lane.b32.xlu2 %v1645_v0, %s6755_s29 }
 0x696   :  { %1851 = vrot.lane.b32.xlu2 %v7035_v58, %s6765_s1 }
 0x69e   :  { %2002 = vrot.lane.b32.xlu2 %v7018_v34, %s6766_s24 }
 0x6a6   :  { %2181 = vrot.lane.b32.xlu2 %v7035_v58, %s6766_s24 }
 0x6c8   :  { %v1624_v5 = vpop.permute.xlu2 %1623 }
 0x6c9   :  { %v1626_v59 = vsel %vm881_vm10, 0.0, %v1624_v5 }
 0x6d0   :  { %v1629_v6 = vpop.permute.xlu2 %1628 }
 0x6d1   :  { %v1631_v7 = vsel %vm8060_vm9, 0.0, %v1629_v6  ;;  %vm8066_vm9 = vcmask 1044480  }
 0x6d2   :  { %v1632_v11 = vsel %vm8063_vm6, %v1631_v7, 0.0  ;;  %vm8064_vm6 = vcmask 72704  }
 0x6d3   :  { %v1665_v24 = vrot.slane %v1632_v11, 7 }
 0x6d5   :  { %v1682_v63 = vsel %vm695_vm2, %v1626_v59, %v1665_v24 }
 0x6d8   :  { %v1635_v28 = vpop.permute.xlu2 %1634 }
 0x6d9   :  { %v1637_v9 = vsel %vm8061_vm11, 0.0, %v1635_v28  ;;  %vm8067_vm11 = vcmask 1045504  }
 0x6da   :  { %v1638_v37 = vsel %vm897_vm15, %v1637_v9, 0.0 }
 0x6db   :  { %v1668_v25 = vrot.slane %v1638_v37, 6 }
 0x6dd   :  { %v1683_v28 = vsel %vm697_vm3, %v1682_v63, %v1668_v25 }
 0x6e0   :  { %v1641_v8 = vpop.permute.xlu2 %1640 }
 0x6e1   :  { %v1643_v10 = vsel %vm8062_vm7, 0.0, %v1641_v8  ;;  %vm8065_vm7 = vcmask 89088  }
 0x6e2   :  { %v1653_v16 = vpop.permute.xlu1 %1652  ;;  %v1659_v22 = vpop.permute.xlu0 %1658  ;;  %v1644_v33 = vsel %vm905_vm0, %v1643_v10, 0.0  ;;  %v1873_v10 = vand.u32 4294901760, %v1854_v62 }
 0x6e3   :  { %v1655_v36 = vsel %vm919_vm12, 0.0, %v1653_v16  ;;  %v1661_v26 = vsel %vm927_vm8, 0.0, %v1659_v22  ;;  %v1671_v27 = vrot.slane %v1644_v33, 5  ;;  %v1663_v22 = vsel %vm523_vm1, %v1621_v57, 0.0 }
 0x6e4   :  { %v1656_v60 = vsel %vm8045_vm13, %v1655_v36, 0.0  ;;  %v1662_v0 = vsel %vm8064_vm6, %v1661_v26, 0.0  ;;  %vm8068_vm6 = vcmask 1046528   ;;  %v1874_v36 = vsub.f32 %v1854_v62, %v1873_v10 }
 0x6e5   :  { %v1684_v8 = vsel %vm699_vm4, %v1683_v28, %v1671_v27  ;;  %v1677_v9 = vrot.slane %v1656_v60, 3  ;;  %v1680_v5 = vrot.slane %v1662_v0, 2 }
 0x6e6   :  { %v1875_v60 = vand.u32 4294901760, %v1874_v36 }
 0x6e8   :  { %v1647_v29 = vpop.permute.xlu2 %1646  ;;  %v1876_v28 = vsub.f32 %v1874_v36, %v1875_v60 }
 0x6e9   :  { %v1649_v61 = vsel %vm8044_vm14, 0.0, %v1647_v29 }
 0x6ea   :  { %v1650_v6 = vsel %vm8065_vm7, %v1649_v61, 0.0  ;;  %vm8069_vm7 = vcmask 121856  }
 0x6eb   :  { %v1674_v7 = vrot.slane %v1650_v6, 4 }
 0x6ed   :  { %v1685_v11 = vsel %vm701_vm5, %v1684_v8, %v1674_v7  ;;  %v1877_v8 = vand.u32 4294901760, %v1876_v28 }
 0x6ee   :  { %v1686_v16 = vsel %vm8066_vm9, %v1685_v11, %v1677_v9 }
 0x6ef   :  { %v1687_v37 = vsel %vm8067_vm11, %v1686_v16, %v1680_v5 }
 0x6f0   :  { %v1852_v33 = vpop.permute.xlu2 %1851  ;;  %v1688_v24 = vsel %vm8068_vm6, %v1687_v37, %v1663_v22 }
 0x6f1   :  { %v1871_v26 = vand.u32 4294901760, %v1852_v33  ;;  %v1690_v25 = vsel %vm8069_vm7, %v1688_v24, 0  ;;  %vm8074_vm7 = vcmp.eq.f32.partialorder %v7068_v56, 0.0 }
 0x6f2   :  { %v1710_v29 = vand.u32 4294901760, %v1690_v25 }
 0x6f3   :  { %v1898_v27 = vsub.f32 %v1852_v33, %v1871_v26  ;;  %1872 = vmatpush.msra.mxu2 %v1871_v26 }
 0x6f4   :  { %1746 = vmatmul.f32.vlgmr.msra.gmra.mxu1 %v1710_v29  ;;  %v1711_v59 = vsub.f32 %v1690_v25, %v1710_v29 }
 0x6f5   :  { %v1899_v61 = vand.u32 4294901760, %v1898_v27  ;;  %1948 = vmatpush.msra.mxu1 %v1871_v26 }
 0x6f6   :  { %1772 = vmatmul.f32.vlgmr.msrb.gmra.mxu2 %v1711_v59  ;;  %v1712_v63 = vand.u32 4294901760, %v1711_v59 }
 0x6f7   :  { %v1900_v0 = vsub.f32 %v1898_v27, %v1899_v61  ;;  %1974 = vmatpush.msrb.mxu2 %v1899_v61 }
 0x6f8   :  { %1797 = vmatmul.f32.vlgmr.msrb.gmra.mxu3 %v1712_v63  ;;  %v2003_v57 = vpop.permute.xlu2 %2002  ;;  %v1713_v6 = vsub.f32 %v1711_v59, %v1712_v63 }
 0x6f9   :  { %v1901_v62 = vand.u32 4294901760, %v1900_v0  ;;  %v2004_v9 = vsel %vm523_vm1, %v2003_v57, 0 }
 0x6fa   :  { %v1714_v7 = vand.u32 4294901760, %v1713_v6  ;;  %v2023_v16 = vand.u32 4294901760, %v2004_v9 }
 0x6fb   :  { %1902 = vmatpush.msra.mxu3 %v1901_v62 }
 0x6fc   :  { %1715 = vmatmul.f32.vlgmr.msra.gmra.mxu0 %v1714_v7  ;;  %1847 = vmatmul.f32.vlgmr.msrb.gmra.mxu1 %v1710_v29  ;;  %v2024_v33 = vsub.f32 %v2004_v9, %v2023_v16 }
 0x6fd   :  { %1925 = vmatpush.msra.mxu0 %v1898_v27  ;;  %1996 = vmatpush.msrb.mxu3 %v1871_v26 }
 0x6fe   :  { %1878 = vmatmul.f32.vlgmr.msra.gmra.mxu2 %v1877_v8  ;;  %2052 = vmatpush.msrb.mxu1 %v7005_v17  ;;  %v2025_v27 = vand.u32 4294901760, %v2024_v33 }
 0x6ff   :  { %2075 = vmatpush.msra.mxu2 %v6994_v14 }
 0x700   :  { %1904 = vmatmul.f32.vlgmr.msra.gmra.mxu3 %v1873_v10  ;;  %v2182_v5 = vpop.permute.xlu2 %2181 }
 0x701   :  { %v2187_v11 = vsel %vm523_vm1, %v2182_v5, 0  ;;  %2098 = vmatpush.msra.mxu3 %v6991_v13 }
 0x702   :  { %v2204_v37 = vand.u32 4294901760, %v2187_v11 }
 0x704   :  { %v2231_v22 = vsub.f32 %v2187_v11, %v2204_v37  ;;  %1824 = vmatmul.f32.vlgmr.msrb.gmra.mxu0 %v1710_v29  ;;  %1952 = vmatmul.f32.vlgmr.msra.gmra.mxu1 %v1875_v60  ;;  %v2026_v29 = vsub.f32 %v2024_v33, %v2025_v27 }
 0x705   :  { %2146 = vmatpush.msra.mxu1 %v6991_v13  ;;  %2022 = vmatpush.msrb.mxu0 %v6991_v13 }
 0x706   :  { %v2232_v24 = vand.u32 4294901760, %v2231_v22  ;;  %1976 = vmatmul.f32.vlgmr.msrb.gmra.mxu2 %v1873_v10  ;;  %v2027_v59 = vand.u32 4294901760, %v2026_v29 }
 0x707   :  { %2205 = vmatpush.xpose.msrb.mxu2 %v2204_v37 }
 0x708   :  { %v2233_v26 = vsub.f32 %v2231_v22, %v2232_v24  ;;  %1998 = vmatmul.f32.vlgmr.msrb.gmra.mxu3 %v1873_v10 }
 0x70a   :  { %v2234_v25 = vand.u32 4294901760, %v2233_v26 }
 0x70c   :  { %1928 = vmatmul.f32.vlgmr.msra.gmra.mxu0 %v1874_v36  ;;  %2054 = vmatmul.f32.vlgmr.msrb.gmra.mxu1 %v2023_v16 }
 0x70d   :  { %2235 = vmatpush.xpose.msrb.mxu3 %v2234_v25  ;;  %2281 = vmatpush.xpose.msrb.mxu1 %v2204_v37 }
 0x70e   :  { %2078 = vmatmul.f32.vlgmr.msra.gmra.mxu2 %v2024_v33  ;;  %2124 = vmatpush.msra.mxu0 %v7000_v15 }
 0x70f   :  { %2307 = vmatpush.xpose.msra.mxu2 %v2232_v24 }
 0x710   :  { %2102 = vmatmul.f32.vlgmr.msra.gmra.mxu3 %v2025_v27 }
 0x711   :  { %2329 = vmatpush.xpose.msra.mxu3 %v2204_v37 }
 0x714   :  { %2028 = vmatmul.f32.vlgmr.msrb.gmra.mxu0 %v2027_v59  ;;  %2148 = vmatmul.f32.vlgmr.msra.gmra.mxu1 %v2023_v16 }
 0x715   :  { %2258 = vmatpush.xpose.msrb.mxu0 %v2231_v22  ;;  %2466 = vmatpush.msra.mxu1 %v7139_v52 }
 0x716   :  { %2211 = vmatmul.f32.vlgmr.msrb.gmra.mxu2 %v2027_v59 }
 0x717   :  { %2472 = vmatpush.msra.mxu1 %v7145_v55  ;;  %2494 = vmatpush.msrb.mxu2 %v7087_v18 }
 0x718   :  { %2237 = vmatmul.f32.vlgmr.msrb.gmra.mxu3 %v2023_v16 }
 0x719   :  { %2497 = vmatpush.msrb.mxu2 %v7095_v21  ;;  %2519 = vmatpush.msrb.mxu3 %v7081_v12 }
 0x71b   :  { %2521 = vmatpush.msrb.mxu3 %v7089_v19 }
 0x71c   :  { %2126 = vmatmul.f32.vlgmr.msra.gmra.mxu0 %v2023_v16  ;;  %2285 = vmatmul.f32.vlgmr.msrb.gmra.mxu1 %v2025_v27 }
 0x71d   :  { %2571 = vmatpush.msrb.mxu1 %v7081_v12  ;;  %2435 = vmatpush.msra.mxu0 %v7081_v12 }
 0x71e   :  { %2309 = vmatmul.f32.vlgmr.msra.gmra.mxu2 %v2023_v16 }
 0x71f   :  { %2573 = vmatpush.msrb.mxu1 %v7089_v19  ;;  %2437 = vmatpush.msra.mxu0 %v7089_v19 }
 0x720   :  { %2331 = vmatmul.f32.vlgmr.msra.gmra.mxu3 %v2023_v16 }
 0x724   :  { %2261 = vmatmul.f32.vlgmr.msrb.gmra.mxu0 %v2024_v33 }
 0x725   :  { %2546 = vmatpush.msrb.mxu0 %v7131_v48 }
 0x727   :  { %2550 = vmatpush.msrb.mxu0 %v7136_v51 }
 0x771   :  { %v7299_v10 = vpop.f32.mrf.mxu1 }
 0x779   :  { %v7301_v36 = vpop.f32.mrf.mxu0  ;;  %v7303_v60 = vpop.f32.mrf.mxu2 }
 0x77a   :  { %v7307_v63 = vpop.f32.mrf.mxu1 }
 0x77b   :  { %v7305_v61 = vpop.f32.mrf.mxu3 }
 0x781   :  { %v7309_v0 = vpop.f32.mrf.mxu0  ;;  %v7311_v57 = vpop.f32.mrf.mxu2 }
 0x782   :  { %v7315_v28 = vpop.f32.mrf.mxu1 }
 0x783   :  { %v7313_v6 = vpop.f32.mrf.mxu3  ;;  %8070 = vst [vmem:[#allocation17_spill] sm:$0xff] %v7315_v28 }
 0x789   :  { %v7317_v62 = vpop.f32.mrf.mxu0  ;;  %v7319_v7 = vpop.f32.mrf.mxu2 }
 0x78a   :  { %8071 = vst [vmem:[#allocation18_spill] sm:$0xff] %v7317_v62  ;;  %v2055_v9 = vpop.f32.mrf.mxu1 }
 0x78b   :  { %8072 = vst [vmem:[#allocation19_spill] sm:$0xff] %v7319_v7  ;;  %v7321_v8 = vpop.f32.mrf.mxu3 }
 0x78c   :  { %8073 = vst [vmem:[#allocation20_spill] sm:$0xff] %v7321_v8 }
 0x791   :  { %v2029_v5 = vpop.f32.mrf.mxu0  ;;  %v2079_v16 = vpop.f32.mrf.mxu2 }
 0x792   :  { %v2056_v11 = vadd.f32 %v2055_v9, %v2029_v5  ;;  %v2149_v25 = vpop.f32.mrf.mxu1 }
 0x793   :  { %v2103_v22 = vpop.f32.mrf.mxu3 }
 0x794   :  { %v2080_v37 = vadd.f32 %v2079_v16, %v2056_v11 }
 0x796   :  { %v2104_v33 = vadd.f32 %v2103_v22, %v2080_v37 }
 0x799   :  { %v2127_v24 = vpop.f32.mrf.mxu0 }
 0x79a   :  { %v2128_v26 = vadd.f32 %v2127_v24, %v2104_v33 }
 0x79c   :  { %v2150_v27 = vadd.f32 %v2149_v25, %v2128_v26 }
 0x79e   :  { %2159 = vrot.lane.b32.xlu2 %v2150_v27, %s6755_s29  ;;  %2156 = vrot.lane.b32.xlu1 %v2150_v27, %s6759_s4 }
 0x79f   :  { %2153 = vrot.lane.b32.xlu0 %v2150_v27, %s6756_s30 }
 0x7a1   :  { %v2262_v47 = vpop.f32.mrf.mxu0 }
 0x7a6   :  { %2168 = vrot.lane.b32.xlu2 %v2150_v27, %s6757_s13  ;;  %2165 = vrot.lane.b32.xlu1 %v2150_v27, %s6754_s28 }
 0x7a7   :  { %2162 = vrot.lane.b32.xlu0 %v2150_v27, %s6758_s14 }
 0x7af   :  { %2171 = vrot.lane.b32.xlu0 %v2150_v27, %s6760_s0 }
 0x7f8   :  { %v2160_v5 = vpop.permute.xlu2 %2159 }
 0x800   :  { %v2169_v26 = vpop.permute.xlu2 %2168 }
 0x810   :  { %v2157_v29 = vpop.permute.xlu1 %2156 }
 0x811   :  { %v2154_v59 = vpop.permute.xlu0 %2153 }
 0x812   :  { %v2174_v9 = vsel %vm695_vm2, %v2150_v27, %v2154_v59  ;;  %v2212_v27 = vpop.f32.mrf.mxu2  ;;  %v2238_v59 = vpop.f32.mrf.mxu3 }
 0x813   :  { %v2175_v11 = vsel %vm697_vm3, %v2174_v9, %v2157_v29 }
 0x814   :  { %v2176_v37 = vsel %vm699_vm4, %v2175_v11, %v2160_v5  ;;  %v2286_v11 = vpop.f32.mrf.mxu1 }
 0x818   :  { %v2166_v22 = vpop.permute.xlu1 %2165 }
 0x819   :  { %v2163_v16 = vpop.permute.xlu0 %2162 }
 0x81a   :  { %v2177_v33 = vsel %vm701_vm5, %v2176_v37, %v2163_v16  ;;  %v2310_v16 = vpop.f32.mrf.mxu2 }
 0x81b   :  { %v2178_v24 = vsel %vm8066_vm9, %v2177_v33, %v2166_v22  ;;  %v2332_v22 = vpop.f32.mrf.mxu3  ;;  %vm8075_vm9 = vcmask 48128  }
 0x81c   :  { %v2179_v54 = vsel %vm8067_vm11, %v2178_v24, %v2169_v26  ;;  %vm8076_vm11 = vcmask 39936  }
 0x821   :  { %v2172_v25 = vpop.permute.xlu0 %2171 }
 0x822   :  { %v2180_v49 = vsel %vm8068_vm6, %v2179_v54, %v2172_v25  ;;  %vm8077_vm6 = vcmask 31744  }
 0x823   :  { %2184 = vrot.lane.b32.xlu1 %v2180_v49, %s6762_s17 }
 0x895   :  { %v2185_v46 = vpop.permute.xlu1 %2184 }
 0x896   :  { %v2213_v29 = vadd.f32 %v2212_v27, %v2185_v46 }
 0x898   :  { %v2239_v9 = vadd.f32 %v2238_v59, %v2213_v29 }
 0x89a   :  { %v2263_v5 = vadd.f32 %v2262_v47, %v2239_v9 }
 0x89c   :  { %v2287_v45 = vadd.f32 %v2286_v11, %v2263_v5 }
 0x89e   :  { %v2311_v37 = vadd.f32 %v2310_v16, %v2287_v45 }
 0x8a0   :  { %v2333_v33 = vadd.f32 %v2332_v22, %v2311_v37 }
 0x8a2   :  { %v2335_v24 = vsel %vm8074_vm7, -10000.0, %v2333_v33  ;;  %vm8078_vm7 = vcmask 113664  }
 0x8a3   :  { %v2336_v54 = vsel %vm523_vm1, %v2335_v24, -inf }
 0x8a4   :  { %2337 = vmax.xlane.f32.xlu2 %v2336_v54 }
 0x917   :  { %v2338_v49 = vpop.xlane.xlu2 %2337 }
 0x918   :  { %v2339_v26 = vsub.f32 %v2335_v24, %v2338_v49 }
 0x91a   :  { %v2340_v25 = vmul.f32 1.442695, %v2339_v26 }
 0x91c   :  { %6701 = vpow2.f32 %v2340_v25 }
 0x922   :  { %v6702_v46 = vpop.eup %6701 }
 0x923   :  { %v2342_v27 = vsel %vm523_vm1, %v6702_v46, 0.0 }
 0x924   :  { %2343 = vadd.xlane.f32.xlu0 %v2342_v27 }
 0x997   :  { %v2344_v47 = vpop.xlane.xlu0 %2343 }
 0x998   :  { %6703 = vrcp.f32 %v2344_v47 }
 0x99e   :  { %v6704_v59 = vpop.eup %6703 }
 0x99f   :  { %v2346_v45 = vmul.f32 %v6704_v59, %v2344_v47 }
 0x9a1   :  { %v2347_v29 = vsub.f32 2.0, %v2346_v45 }
 0x9a3   :  { %v2348_v9 = vmul.f32 %v6704_v59, %v2347_v29 }
 0x9a5   :  { %v2349_v5 = vmul.f32 %v6702_v46, %v2348_v9 }
 0x9a7   :  { %2351 = vrot.lane.b32.xlu1 %v2349_v5, %s6760_s0  ;;  %v2385_v11 = vrot.slane %v2349_v5, 6  ;;  %v2379_v16 = vrot.slane %v2349_v5, 5  ;;  %v2355_v37 = vrot.slane %v2349_v5, 1  ;;  %v2361_v22 = vrot.slane %v2349_v5, 2 }
 0x9a8   :  { %v2367_v33 = vrot.slane %v2349_v5, 3  ;;  %v2373_v24 = vrot.slane %v2349_v5, 4 }
 0x9a9   :  { %2386 = vrot.lane.b32.xlu0 %v2385_v11, %s6756_s30  ;;  %2380 = vrot.lane.b32.xlu2 %v2379_v16, %s6759_s4 }
 0x9af   :  { %2356 = vrot.lane.b32.xlu1 %v2355_v37, %s6757_s13 }
 0x9b7   :  { %2362 = vrot.lane.b32.xlu1 %v2361_v22, %s6754_s28 }
 0x9bf   :  { %2368 = vrot.lane.b32.xlu1 %v2367_v33, %s6758_s14 }
 0x9c7   :  { %2374 = vrot.lane.b32.xlu1 %v2373_v24, %s6755_s29 }
 0x9cf   :  { %2579 = vrot.lane.b32.xlu1 %v7035_v58, %s6767_s10 }
 0x9d7   :  { %2730 = vrot.lane.b32.xlu1 %v7018_v34, %s6768_s25 }
 0x9df   :  { %2909 = vrot.lane.b32.xlu1 %v7035_v58, %s6768_s25 }
 0xa03   :  { %v2381_v59 = vpop.permute.xlu2 %2380 }
 0xa04   :  { %v2383_v11 = vsel %vm919_vm12, 0.0, %v2381_v59 }
 0xa19   :  { %v2352_v54 = vpop.permute.xlu1 %2351 }
 0xa1b   :  { %v2387_v29 = vpop.permute.xlu0 %2386 }
 0xa1c   :  { %v2389_v37 = vsel %vm927_vm8, 0.0, %v2387_v29 }
 0xa21   :  { %v2357_v49 = vpop.permute.xlu1 %2356 }
 0xa22   :  { %v2359_v25 = vsel %vm8075_vm9, 0.0, %v2357_v49  ;;  %v2384_v49 = vsel %vm8045_vm13, %v2383_v11, 0.0  ;;  %vm8079_vm9 = vcmask 72704  }
 0xa23   :  { %v2360_v45 = vsel %vm8078_vm7, %v2359_v25, 0.0  ;;  %v2582_v25 = vsel %vm523_vm1, %v2349_v5, 0  ;;  %vm8082_vm7 = vcmask 1045504  }
 0xa24   :  { %v2393_v16 = vrot.slane %v2360_v45, 7  ;;  %v2601_v44 = vand.u32 4294901760, %v2582_v25 }
 0xa29   :  { %v2363_v26 = vpop.permute.xlu1 %2362 }
 0xa2a   :  { %v2365_v27 = vsel %vm8076_vm11, 0.0, %v2363_v26  ;;  %v2354_v26 = vsel %vm881_vm10, 0.0, %v2352_v54  ;;  %vm8080_vm11 = vcmask 89088  }
 0xa2b   :  { %v2366_v9 = vsel %vm897_vm15, %v2365_v27, 0.0  ;;  %v2390_v27 = vsel %vm8079_vm9, %v2389_v37, 0.0  ;;  %v2391_v37 = vsel %vm523_vm1, %v2349_v5, 0.0  ;;  %vm8083_vm9 = vcmask 1046528  }
 0xa2c   :  { %v2396_v22 = vrot.slane %v2366_v9, 6  ;;  %v2405_v9 = vrot.slane %v2384_v49, 3  ;;  %v2408_v11 = vrot.slane %v2390_v27, 2 }
 0xa31   :  { %v2369_v46 = vpop.permute.xlu1 %2368 }
 0xa32   :  { %v2371_v47 = vsel %vm8077_vm6, 0.0, %v2369_v46  ;;  %vm8081_vm6 = vcmask 1044480  }
 0xa33   :  { %v2372_v34 = vsel %vm905_vm0, %v2371_v47, 0.0  ;;  %v2410_v47 = vsel %vm695_vm2, %v2354_v26, %v2393_v16  ;;  %v2602_v26 = vsub.f32 %v2582_v25, %v2601_v44 }
 0xa34   :  { %v2399_v33 = vrot.slane %v2372_v34, 5  ;;  %v2411_v45 = vsel %vm697_vm3, %v2410_v47, %v2396_v22 }
 0xa35   :  { %v2603_v27 = vand.u32 4294901760, %v2602_v26 }
 0xa36   :  { %v2412_v34 = vsel %vm699_vm4, %v2411_v45, %v2399_v33 }
 0xa39   :  { %v2375_v24 = vpop.permute.xlu1 %2374 }
 0xa3a   :  { %v2377_v46 = vsel %vm8044_vm14, 0.0, %v2375_v24 }
 0xa3b   :  { %v2378_v59 = vsel %vm8080_vm11, %v2377_v46, 0.0  ;;  %vm8084_vm11 = vcmask 121856  }
 0xa3c   :  { %v2402_v29 = vrot.slane %v2378_v59, 4 }
 0xa3e   :  { %v2413_v54 = vsel %vm701_vm5, %v2412_v34, %v2402_v29 }
 0xa3f   :  { %v2414_v24 = vsel %vm8081_vm6, %v2413_v54, %v2405_v9 }
 0xa40   :  { %v2415_v41 = vsel %vm8082_vm7, %v2414_v24, %v2408_v11 }
 0xa41   :  { %v2580_v42 = vpop.permute.xlu1 %2579  ;;  %v2416_v16 = vsel %vm8083_vm9, %v2415_v41, %v2391_v37  ;;  %v2604_v41 = vsub.f32 %v2602_v26, %v2603_v27 }
 0xa42   :  { %v2599_v46 = vand.u32 4294901760, %v2580_v42  ;;  %v2418_v22 = vsel %vm8084_vm11, %v2416_v16, 0  ;;  %vm8091_vm11 = vcmp.eq.f32.partialorder %v7068_v56, 0.0 }
 0xa43   :  { %v2438_v49 = vand.u32 4294901760, %v2418_v22 }
 0xa44   :  { %v2626_v47 = vsub.f32 %v2580_v42, %v2599_v46  ;;  %2600 = vmatpush.msra.mxu2 %v2599_v46  ;;  %v2605_v42 = vand.u32 4294901760, %v2604_v41 }
 0xa45   :  { %2474 = vmatmul.f32.vlgmr.msra.gmra.mxu1 %v2438_v49  ;;  %v2439_v33 = vsub.f32 %v2418_v22, %v2438_v49 }
 0xa46   :  { %v2627_v59 = vand.u32 4294901760, %v2626_v47  ;;  %2676 = vmatpush.msra.mxu1 %v2599_v46 }
 0xa47   :  { %2500 = vmatmul.f32.vlgmr.msrb.gmra.mxu2 %v2439_v33  ;;  %v2440_v45 = vand.u32 4294901760, %v2439_v33 }
 0xa48   :  { %v2628_v29 = vsub.f32 %v2626_v47, %v2627_v59  ;;  %2702 = vmatpush.msrb.mxu2 %v2627_v59 }
 0xa49   :  { %2525 = vmatmul.f32.vlgmr.msrb.gmra.mxu3 %v2440_v45  ;;  %v2731_v5 = vpop.permute.xlu1 %2730  ;;  %v2441_v9 = vsub.f32 %v2439_v33, %v2440_v45 }
 0xa4a   :  { %v2629_v25 = vand.u32 4294901760, %v2628_v29  ;;  %v2732_v11 = vsel %vm523_vm1, %v2731_v5, 0 }
 0xa4b   :  { %v2442_v34 = vand.u32 4294901760, %v2441_v9  ;;  %v2751_v37 = vand.u32 4294901760, %v2732_v11 }
 0xa4c   :  { %2630 = vmatpush.msra.mxu3 %v2629_v25 }
 0xa4d   :  { %2443 = vmatmul.f32.vlgmr.msra.gmra.mxu0 %v2442_v34  ;;  %2575 = vmatmul.f32.vlgmr.msrb.gmra.mxu1 %v2438_v49 }
 0xa4e   :  { %2653 = vmatpush.msra.mxu0 %v2626_v47  ;;  %2724 = vmatpush.msrb.mxu3 %v2599_v46  ;;  %v2752_v46 = vsub.f32 %v2732_v11, %v2751_v37 }
 0xa4f   :  { %2606 = vmatmul.f32.vlgmr.msra.gmra.mxu2 %v2605_v42  ;;  %2780 = vmatpush.msrb.mxu1 %v7005_v17 }
 0xa50   :  { %2803 = vmatpush.msra.mxu2 %v6994_v14  ;;  %v2753_v59 = vand.u32 4294901760, %v2752_v46 }
 0xa51   :  { %2632 = vmatmul.f32.vlgmr.msra.gmra.mxu3 %v2601_v44  ;;  %v2910_v54 = vpop.permute.xlu1 %2909 }
 0xa52   :  { %v2915_v24 = vsel %vm523_vm1, %v2910_v54, 0  ;;  %2826 = vmatpush.msra.mxu3 %v6991_v13 }
 0xa53   :  { %v2932_v16 = vand.u32 4294901760, %v2915_v24 }
 0xa55   :  { %v2959_v22 = vsub.f32 %v2915_v24, %v2932_v16  ;;  %2552 = vmatmul.f32.vlgmr.msrb.gmra.mxu0 %v2438_v49  ;;  %2680 = vmatmul.f32.vlgmr.msra.gmra.mxu1 %v2603_v27  ;;  %v2754_v49 = vsub.f32 %v2752_v46, %v2753_v59 }
 0xa56   :  { %2874 = vmatpush.msra.mxu1 %v6991_v13  ;;  %2750 = vmatpush.msrb.mxu0 %v6991_v13 }
 0xa57   :  { %v2960_v47 = vand.u32 4294901760, %v2959_v22  ;;  %2704 = vmatmul.f32.vlgmr.msrb.gmra.mxu2 %v2601_v44  ;;  %v2755_v27 = vand.u32 4294901760, %v2754_v49 }
 0xa58   :  { %2933 = vmatpush.xpose.msrb.mxu2 %v2932_v16 }
 0xa59   :  { %v2961_v33 = vsub.f32 %v2959_v22, %v2960_v47  ;;  %2726 = vmatmul.f32.vlgmr.msrb.gmra.mxu3 %v2601_v44 }
 0xa5b   :  { %v2962_v45 = vand.u32 4294901760, %v2961_v33 }
 0xa5d   :  { %2656 = vmatmul.f32.vlgmr.msra.gmra.mxu0 %v2602_v26  ;;  %2782 = vmatmul.f32.vlgmr.msrb.gmra.mxu1 %v2751_v37 }
 0xa5e   :  { %2963 = vmatpush.xpose.msrb.mxu3 %v2962_v45  ;;  %3009 = vmatpush.xpose.msrb.mxu1 %v2932_v16 }
 0xa5f   :  { %2806 = vmatmul.f32.vlgmr.msra.gmra.mxu2 %v2752_v46  ;;  %2852 = vmatpush.msra.mxu0 %v7000_v15 }
 0xa60   :  { %3035 = vmatpush.xpose.msra.mxu2 %v2960_v47 }
 0xa61   :  { %2830 = vmatmul.f32.vlgmr.msra.gmra.mxu3 %v2753_v59 }
 0xa62   :  { %3057 = vmatpush.xpose.msra.mxu3 %v2932_v16 }
 0xa65   :  { %2756 = vmatmul.f32.vlgmr.msrb.gmra.mxu0 %v2755_v27  ;;  %2876 = vmatmul.f32.vlgmr.msra.gmra.mxu1 %v2751_v37 }
 0xa66   :  { %2986 = vmatpush.xpose.msrb.mxu0 %v2959_v22  ;;  %3194 = vmatpush.msra.mxu1 %v7139_v52 }
 0xa67   :  { %2939 = vmatmul.f32.vlgmr.msrb.gmra.mxu2 %v2755_v27 }
 0xa68   :  { %3222 = vmatpush.msrb.mxu2 %v7087_v18  ;;  %3200 = vmatpush.msra.mxu1 %v7145_v55 }
 0xa69   :  { %2965 = vmatmul.f32.vlgmr.msrb.gmra.mxu3 %v2751_v37 }
 0xa6a   :  { %3225 = vmatpush.msrb.mxu2 %v7095_v21  ;;  %3247 = vmatpush.msrb.mxu3 %v7081_v12 }
 0xa6c   :  { %3249 = vmatpush.msrb.mxu3 %v7089_v19 }
 0xa6d   :  { %2854 = vmatmul.f32.vlgmr.msra.gmra.mxu0 %v2751_v37  ;;  %3013 = vmatmul.f32.vlgmr.msrb.gmra.mxu1 %v2753_v59 }
 0xa6e   :  { %3299 = vmatpush.msrb.mxu1 %v7081_v12  ;;  %3163 = vmatpush.msra.mxu0 %v7081_v12 }
 0xa6f   :  { %3037 = vmatmul.f32.vlgmr.msra.gmra.mxu2 %v2751_v37 }
 0xa70   :  { %3301 = vmatpush.msrb.mxu1 %v7089_v19  ;;  %3165 = vmatpush.msra.mxu0 %v7089_v19 }
 0xa71   :  { %3059 = vmatmul.f32.vlgmr.msra.gmra.mxu3 %v2751_v37 }
 0xa75   :  { %2989 = vmatmul.f32.vlgmr.msrb.gmra.mxu0 %v2752_v46 }
 0xa76   :  { %3274 = vmatpush.msrb.mxu0 %v7131_v48 }
 0xa78   :  { %3278 = vmatpush.msrb.mxu0 %v7136_v51 }
 0xac2   :  { %v7398_v44 = vpop.f32.mrf.mxu1 }
 0xaca   :  { %v7400_v26 = vpop.f32.mrf.mxu0  ;;  %v7402_v29 = vpop.f32.mrf.mxu2 }
 0xacb   :  { %v7406_v9 = vpop.f32.mrf.mxu1 }
 0xacc   :  { %v7404_v5 = vpop.f32.mrf.mxu3 }
 0xad2   :  { %v7408_v41 = vpop.f32.mrf.mxu0  ;;  %v7410_v25 = vpop.f32.mrf.mxu2 }
 0xad3   :  { %8085 = vst [vmem:[#allocation21_spill] sm:$0xff] %v7410_v25  ;;  %v7414_v42 = vpop.f32.mrf.mxu1 }
 0xad4   :  { %v7412_v34 = vpop.f32.mrf.mxu3  ;;  %8087 = vst [vmem:[#allocation23_spill] sm:$0xff] %v7414_v42 }
 0xad5   :  { %8086 = vst [vmem:[#allocation22_spill] sm:$0xff] %v7412_v34 }
 0xada   :  { %v7416_v11 = vpop.f32.mrf.mxu0  ;;  %v7418_v54 = vpop.f32.mrf.mxu2 }
 0xadb   :  { %8088 = vst [vmem:[#allocation24_spill] sm:$0xff] %v7416_v11  ;;  %v2783_v37 = vpop.f32.mrf.mxu1 }
 0xadc   :  { %8089 = vst [vmem:[#allocation25_spill] sm:$0xff] %v7418_v54  ;;  %v7420_v24 = vpop.f32.mrf.mxu3 }
 0xadd   :  { %8090 = vst [vmem:[#allocation26_spill] sm:$0xff] %v7420_v24 }
 0xae2   :  { %v2757_v16 = vpop.f32.mrf.mxu0  ;;  %v2807_v46 = vpop.f32.mrf.mxu2 }
 0xae3   :  { %v2784_v22 = vadd.f32 %v2783_v37, %v2757_v16  ;;  %v2877_v27 = vpop.f32.mrf.mxu1 }
 0xae4   :  { %v2831_v33 = vpop.f32.mrf.mxu3 }
 0xae5   :  { %v2808_v47 = vadd.f32 %v2807_v46, %v2784_v22 }
 0xae7   :  { %v2832_v59 = vadd.f32 %v2831_v33, %v2808_v47 }
 0xaea   :  { %v2855_v45 = vpop.f32.mrf.mxu0  ;;  %v2940_v54 = vpop.f32.mrf.mxu2 }
 0xaeb   :  { %v2856_v49 = vadd.f32 %v2855_v45, %v2832_v59 }
 0xaec   :  { %v2966_v42 = vpop.f32.mrf.mxu3 }
 0xaed   :  { %v2878_v40 = vadd.f32 %v2877_v27, %v2856_v49 }
 0xaef   :  { %2887 = vrot.lane.b32.xlu1 %v2878_v40, %s6755_s29  ;;  %2884 = vrot.lane.b32.xlu0 %v2878_v40, %s6759_s4 }
 0xaf0   :  { %2881 = vrot.lane.b32.xlu2 %v2878_v40, %s6756_s30 }
 0xaf4   :  { %v3060_v11 = vpop.f32.mrf.mxu3 }
 0xaf7   :  { %2896 = vrot.lane.b32.xlu1 %v2878_v40, %s6757_s13  ;;  %2893 = vrot.lane.b32.xlu0 %v2878_v40, %s6754_s28 }
 0xaf8   :  { %2890 = vrot.lane.b32.xlu2 %v2878_v40, %s6758_s14 }
 0xb00   :  { %2899 = vrot.lane.b32.xlu2 %v2878_v40, %s6760_s0 }
 0xb4a   :  { %v2882_v37 = vpop.permute.xlu2 %2881 }
 0xb4b   :  { %v2902_v47 = vsel %vm695_vm2, %v2878_v40, %v2882_v37 }
 0xb52   :  { %v2891_v16 = vpop.permute.xlu2 %2890 }
 0xb5a   :  { %v2900_v30 = vpop.permute.xlu2 %2899 }
 0xb61   :  { %v2885_v22 = vpop.permute.xlu0 %2884  ;;  %v2888_v46 = vpop.permute.xlu1 %2887 }
 0xb62   :  { %v2903_v33 = vsel %vm697_vm3, %v2902_v47, %v2885_v22  ;;  %v2990_v47 = vpop.f32.mrf.mxu0 }
 0xb63   :  { %v2904_v59 = vsel %vm699_vm4, %v2903_v33, %v2888_v46  ;;  %v3014_v33 = vpop.f32.mrf.mxu1 }
 0xb64   :  { %v2905_v49 = vsel %vm701_vm5, %v2904_v59, %v2891_v16  ;;  %v3038_v16 = vpop.f32.mrf.mxu2 }
 0xb69   :  { %v2894_v45 = vpop.permute.xlu0 %2893  ;;  %v2897_v27 = vpop.permute.xlu1 %2896 }
 0xb6a   :  { %v2906_v38 = vsel %vm8081_vm6, %v2905_v49, %v2894_v45  ;;  %vm8092_vm6 = vcmask 48128  }
 0xb6b   :  { %v2907_v32 = vsel %vm8082_vm7, %v2906_v38, %v2897_v27  ;;  %vm8093_vm7 = vcmask 39936  }
 0xb6c   :  { %v2908_v24 = vsel %vm8083_vm9, %v2907_v32, %v2900_v30  ;;  %vm8094_vm9 = vcmask 31744  }
 0xb6d   :  { %2912 = vrot.lane.b32.xlu0 %v2908_v24, %s6762_s17 }
 0xbdf   :  { %v2913_v40 = vpop.permute.xlu0 %2912 }
 0xbe0   :  { %v2941_v37 = vadd.f32 %v2940_v54, %v2913_v40 }
 0xbe2   :  { %v2967_v22 = vadd.f32 %v2966_v42, %v2941_v37 }
 0xbe4   :  { %v2991_v46 = vadd.f32 %v2990_v47, %v2967_v22 }
 0xbe6   :  { %v3015_v8 = vadd.f32 %v3014_v33, %v2991_v46 }
 0xbe8   :  { %v3039_v59 = vadd.f32 %v3038_v16, %v3015_v8 }
 0xbea   :  { %v3061_v45 = vadd.f32 %v3060_v11, %v3039_v59 }
 0xbec   :  { %v3063_v38 = vsel %vm8091_vm11, -10000.0, %v3061_v45  ;;  %vm8095_vm11 = vcmask 113664  }
 0xbed   :  { %v3064_v30 = vsel %vm523_vm1, %v3063_v38, -inf }
 0xbee   :  { %3065 = vmax.xlane.f32.xlu1 %v3064_v30 }
 0xc61   :  { %v3066_v32 = vpop.xlane.xlu1 %3065 }
 0xc62   :  { %v3067_v24 = vsub.f32 %v3063_v38, %v3066_v32 }
 0xc64   :  { %v3068_v49 = vmul.f32 1.442695, %v3067_v24 }
 0xc66   :  { %6705 = vpow2.f32 %v3068_v49 }
 0xc6c   :  { %v6706_v54 = vpop.eup %6705 }
 0xc6d   :  { %v3070_v42 = vsel %vm523_vm1, %v6706_v54, 0.0 }
 0xc6e   :  { %3071 = vadd.xlane.f32.xlu2 %v3070_v42 }
 0xc86   :  { %3307 = vrot.lane.b32.xlu2 %v7035_v58, %s6769_s26 }
 0xce1   :  { %v3072_v8 = vpop.xlane.xlu2 %3071 }
 0xce2   :  { %6707 = vrcp.f32 %v3072_v8 }
 0xce8   :  { %v6708_v11 = vpop.eup %6707 }
 0xce9   :  { %v3074_v56 = vmul.f32 %v6708_v11, %v3072_v8  ;;  %v3308_v27 = vpop.permute.xlu2 %3307 }
 0xcea   :  { %v7443_v40 = vand.u32 4294901760, %v3308_v27 }
 0xceb   :  { %v3075_v37 = vsub.f32 2.0, %v3074_v56 }
 0xcec   :  { %v7446_v22 = vsub.f32 %v3308_v27, %v7443_v40  ;;  %3328 = vmatpush.msra.mxu2 %v7443_v40 }
 0xced   :  { %v3076_v47 = vmul.f32 %v6708_v11, %v3075_v37  ;;  %v6725_v11 = vld [vmem:[%s8026_s7] ss:$0 sm:$0xff] }
 0xcee   :  { %v3355_v46 = vand.u32 4294901760, %v7446_v22  ;;  %v334_v56 = vadd.f32 %v6725_v11, %v7031_v50 }
 0xcef   :  { %v3077_v33 = vmul.f32 %v6706_v54, %v3076_v47 }
 0xcf0   :  { %v3356_v58 = vsub.f32 %v7446_v22, %v3355_v46  ;;  %v379_v47 = vadd.f32 %v7033_v53, %v334_v56 }
 0xcf1   :  { %3079 = vrot.lane.b32.xlu0 %v3077_v33, %s6760_s0  ;;  %v3107_v16 = vrot.slane %v3077_v33, 5  ;;  %v3083_v45 = vrot.slane %v3077_v33, 1  ;;  %v3089_v38 = vrot.slane %v3077_v33, 2  ;;  %v3095_v30 = vrot.slane %v3077_v33, 3 }
 0xcf2   :  { %v3357_v59 = vand.u32 4294901760, %v3356_v58  ;;  %v3101_v32 = vrot.slane %v3077_v33, 4  ;;  %v3113_v24 = vrot.slane %v3077_v33, 6  ;;  %v414_v50 = vadd.f32 %v7039_v1, %v379_v47 }
 0xcf3   :  { %3108 = vrot.lane.b32.xlu1 %v3107_v16, %s6759_s4 }
 0xcf4   :  { %3358 = vmatpush.msra.mxu3 %v3357_v59 }
 0xcf9   :  { %3084 = vrot.lane.b32.xlu0 %v3083_v45, %s6757_s13 }
 0xd01   :  { %3090 = vrot.lane.b32.xlu0 %v3089_v38, %s6754_s28 }
 0xd09   :  { %3096 = vrot.lane.b32.xlu0 %v3095_v30, %s6758_s14 }
 0xd11   :  { %3102 = vrot.lane.b32.xlu0 %v3101_v32, %s6755_s29 }
 0xd19   :  { %3114 = vrot.lane.b32.xlu0 %v3113_v24, %s6756_s30 }
 0xd63   :  { %v3080_v49 = vpop.permute.xlu0 %3079 }
 0xd65   :  { %v3109_v38 = vpop.permute.xlu1 %3108 }
 0xd66   :  { %v3111_v53 = vsel %vm919_vm12, 0.0, %v3109_v38 }
 0xd67   :  { %v3112_v47 = vsel %vm8045_vm13, %v3111_v53, 0.0 }
 0xd6b   :  { %v3085_v54 = vpop.permute.xlu0 %3084 }
 0xd6c   :  { %v3087_v27 = vsel %vm8092_vm6, 0.0, %v3085_v54  ;;  %vm8096_vm6 = vcmask 89088  }
 0xd6d   :  { %v3088_v16 = vsel %vm8095_vm11, %v3087_v27, 0.0  ;;  %v3082_v27 = vsel %vm881_vm10, 0.0, %v3080_v49  ;;  %vm8099_vm11 = vcmask 1045504  }
 0xd6e   :  { %v3121_v24 = vrot.slane %v3088_v16, 7 }
 0xd70   :  { %v3138_v1 = vsel %vm695_vm2, %v3082_v27, %v3121_v24 }
 0xd73   :  { %v3091_v42 = vpop.permute.xlu0 %3090 }
 0xd74   :  { %v3093_v37 = vsel %vm8093_vm7, 0.0, %v3091_v42  ;;  %vm8097_vm7 = vcmask 72704  }
 0xd75   :  { %v3094_v59 = vsel %vm897_vm15, %v3093_v37, 0.0 }
 0xd76   :  { %v3124_v42 = vrot.slane %v3094_v59, 6  ;;  %v3310_v59 = vsel %vm523_vm1, %v3077_v33, 0 }
 0xd77   :  { %v3329_v24 = vand.u32 4294901760, %v3310_v59 }
 0xd78   :  { %v3139_v16 = vsel %vm697_vm3, %v3138_v1, %v3124_v42 }
 0xd79   :  { %v3330_v27 = vsub.f32 %v3310_v59, %v3329_v24 }
 0xd7b   :  { %v3097_v8 = vpop.permute.xlu0 %3096 }
 0xd7c   :  { %v3099_v58 = vsel %vm8094_vm9, 0.0, %v3097_v8  ;;  %v6726_v8 = vld [vmem:[%s8024_s5] ss:$0 sm:$0xff]  ;;  %vm8098_vm9 = vcmask 1044480  }
 0xd7d   :  { %v3100_v30 = vsel %vm905_vm0, %v3099_v58, 0.0  ;;  %v102_v56 = vadd.f32 %v6726_v8, %v7012_v20  ;;  %v447_v58 = vadd.f32 %v7041_v2, %v414_v50  ;;  %v3133_v2 = vrot.slane %v3112_v47, 3 }
 0xd7e   :  { %v3127_v11 = vrot.slane %v3100_v30, 5  ;;  %v3119_v8 = vsel %vm523_vm1, %v3077_v33, 0.0  ;;  %v3331_v47 = vand.u32 4294901760, %v3330_v27 }
 0xd7f   :  { %v147_v30 = vadd.f32 %v7014_v23, %v102_v56 }
 0xd83   :  { %v3103_v45 = vpop.permute.xlu0 %3102 }
 0xd84   :  { %v3105_v32 = vsel %vm8044_vm14, 0.0, %v3103_v45  ;;  %v3140_v45 = vsel %vm699_vm4, %v3139_v16, %v3127_v11  ;;  %vm8101_vm14 = vcmask 121856  }
 0xd85   :  { %v3106_v54 = vsel %vm8096_vm6, %v3105_v32, 0.0  ;;  %v484_v32 = vadd.f32 %v7043_v3, %v447_v58  ;;  %vm8100_vm6 = vcmask 1046528  }
 0xd86   :  { %v3130_v37 = vrot.slane %v3106_v54, 4  ;;  %v182_v54 = vadd.f32 %v7016_v31, %v147_v30 }
 0xd87   :  { %v7497_v56 = vadd.f32 %v7045_v4, %v484_v32 }
 0xd88   :  { %v3141_v20 = vsel %vm701_vm5, %v3140_v45, %v3130_v37  ;;  %v215_v11 = vadd.f32 %v7020_v35, %v182_v54  ;;  %v3332_v45 = vsub.f32 %v3330_v27, %v3331_v47 }
 0xd89   :  { %v3142_v53 = vsel %vm8098_vm9, %v3141_v20, %v3133_v2  ;;  %v3666_v35 = vsel %vm523_vm1, %v7497_v56, 0 }
 0xd8a   :  { %v252_v31 = vadd.f32 %v7027_v39, %v215_v11  ;;  %v3683_v16 = vand.u32 4294901760, %v3666_v35  ;;  %v3333_v20 = vand.u32 4294901760, %v3332_v45 }
 0xd8b   :  { %v3115_v38 = vpop.permute.xlu0 %3114 }
 0xd8c   :  { %v3117_v49 = vsel %vm927_vm8, 0.0, %v3115_v38  ;;  %v281_v4 = vadd.f32 %v7029_v43, %v252_v31  ;;  %v3710_v30 = vsub.f32 %v3666_v35, %v3683_v16 }
 0xd8d   :  { %v3118_v50 = vsel %vm8097_vm7, %v3117_v49, 0.0  ;;  %vm8103_vm7 = vmmov %vm8099_vm11 }
 0xd8e   :  { %v3136_v42 = vrot.slane %v3118_v50, 2  ;;  %v7509_v38 = vmul.f32 0.35355338, %v281_v4 }
 0xd90   :  { %v3143_v23 = vsel %vm8099_vm11, %v3142_v53, %v3136_v42  ;;  %v3484_v43 = vsel %vm523_vm1, %v7509_v38, 0 }
 0xd91   :  { %v3144_v3 = vsel %vm8100_vm6, %v3143_v23, %v3119_v8 }
 0xd92   :  { %v3146_v37 = vsel %vm8101_vm14, %v3144_v3, 0  ;;  %vm8102_vm14 = vmmov %vm8098_vm9 }
 0xd93   :  { %v3166_v58 = vand.u32 4294901760, %v3146_v37  ;;  %vm8104_vm9 = vmmov %vm8100_vm6  ;;  %vm8105_vm6 = vcmask 48128  }
 0xd95   :  { %v3167_v1 = vsub.f32 %v3146_v37, %v3166_v58  ;;  %3202 = vmatmul.f32.vlgmr.msra.gmra.mxu1 %v3166_v58 }
 0xd96   :  { %3404 = vmatpush.msra.mxu1 %v7443_v40 }
 0xd97   :  { %3228 = vmatmul.f32.vlgmr.msrb.gmra.mxu2 %v3167_v1  ;;  %v3168_v33 = vand.u32 4294901760, %v3167_v1 }
 0xd98   :  { %3430 = vmatpush.msrb.mxu2 %v3355_v46  ;;  %v3711_v46 = vand.u32 4294901760, %v3710_v30 }
 0xd99   :  { %3253 = vmatmul.f32.vlgmr.msrb.gmra.mxu3 %v3168_v33  ;;  %v3169_v59 = vsub.f32 %v3167_v1, %v3168_v33 }
 0xd9a   :  { %3452 = vmatpush.msrb.mxu3 %v7443_v40  ;;  %v3503_v40 = vand.u32 4294901760, %v3484_v43  ;;  %v3712_v49 = vsub.f32 %v3710_v30, %v3711_v46 }
 0xd9b   :  { %v3170_v39 = vand.u32 4294901760, %v3169_v59 }
 0xd9c   :  { %v3713_v32 = vand.u32 4294901760, %v3712_v49 }
 0xd9d   :  { %3171 = vmatmul.f32.vlgmr.msra.gmra.mxu0 %v3170_v39  ;;  %3303 = vmatmul.f32.vlgmr.msrb.gmra.mxu1 %v3166_v58 }
 0xd9e   :  { %3381 = vmatpush.msra.mxu0 %v7446_v22  ;;  %3532 = vmatpush.msrb.mxu1 %v7005_v17  ;;  %v3504_v22 = vsub.f32 %v3484_v43, %v3503_v40 }
 0xd9f   :  { %3334 = vmatmul.f32.vlgmr.msra.gmra.mxu2 %v3333_v20 }
 0xda0   :  { %3555 = vmatpush.msra.mxu2 %v6994_v14  ;;  %v3505_v2 = vand.u32 4294901760, %v3504_v22 }
 0xda1   :  { %3360 = vmatmul.f32.vlgmr.msra.gmra.mxu3 %v3329_v24 }
 0xda2   :  { %3578 = vmatpush.msra.mxu3 %v6991_v13  ;;  %v3506_v50 = vsub.f32 %v3504_v22, %v3505_v2 }
 0xda4   :  { %v3507_v54 = vand.u32 4294901760, %v3506_v50 }
 0xda5   :  { %3280 = vmatmul.f32.vlgmr.msrb.gmra.mxu0 %v3166_v58  ;;  %3408 = vmatmul.f32.vlgmr.msra.gmra.mxu1 %v3331_v47 }
 0xda6   :  { %3626 = vmatpush.msra.mxu1 %v6991_v13  ;;  %3502 = vmatpush.msrb.mxu0 %v6991_v13 }
 0xda7   :  { %3432 = vmatmul.f32.vlgmr.msrb.gmra.mxu2 %v3329_v24 }
 0xda8   :  { %3684 = vmatpush.xpose.msrb.mxu2 %v3683_v16 }
 0xda9   :  { %3454 = vmatmul.f32.vlgmr.msrb.gmra.mxu3 %v3329_v24 }
 0xdaa   :  { %3714 = vmatpush.xpose.msrb.mxu3 %v3713_v32 }
 0xdad   :  { %3384 = vmatmul.f32.vlgmr.msra.gmra.mxu0 %v3330_v27  ;;  %3534 = vmatmul.f32.vlgmr.msrb.gmra.mxu1 %v3503_v40 }
 0xdae   :  { %3760 = vmatpush.xpose.msrb.mxu1 %v3683_v16  ;;  %3604 = vmatpush.msra.mxu0 %v7000_v15 }
 0xdaf   :  { %3558 = vmatmul.f32.vlgmr.msra.gmra.mxu2 %v3504_v22 }
 0xdb0   :  { %3786 = vmatpush.xpose.msra.mxu2 %v3711_v46  ;;  %v47_v46 = vld [vmem:[%s8021_s2 + $0x8] sm:$0xff] }
 0xdb1   :  { %3582 = vmatmul.f32.vlgmr.msra.gmra.mxu3 %v3505_v2 }
 0xdb2   :  { %3808 = vmatpush.xpose.msra.mxu3 %v3683_v16 }
 0xdb5   :  { %3508 = vmatmul.f32.vlgmr.msrb.gmra.mxu0 %v3507_v54  ;;  %3628 = vmatmul.f32.vlgmr.msra.gmra.mxu1 %v3503_v40 }
 0xdb6   :  { %3737 = vmatpush.xpose.msrb.mxu0 %v3710_v30  ;;  %3945 = vmatpush.msra.mxu1 %v7139_v52 }
 0xdb7   :  { %3690 = vmatmul.f32.vlgmr.msrb.gmra.mxu2 %v3507_v54 }
 0xdb8   :  { %3951 = vmatpush.msra.mxu1 %v7145_v55  ;;  %3973 = vmatpush.msrb.mxu2 %v7087_v18 }
 0xdb9   :  { %3716 = vmatmul.f32.vlgmr.msrb.gmra.mxu3 %v3503_v40 }
 0xdba   :  { %3976 = vmatpush.msrb.mxu2 %v7095_v21  ;;  %3998 = vmatpush.msrb.mxu3 %v7081_v12 }
 0xdbc   :  { %4000 = vmatpush.msrb.mxu3 %v7089_v19 }
 0xdbd   :  { %3606 = vmatmul.f32.vlgmr.msra.gmra.mxu0 %v3503_v40  ;;  %3764 = vmatmul.f32.vlgmr.msrb.gmra.mxu1 %v3505_v2 }
 0xdbe   :  { %4050 = vmatpush.msrb.mxu1 %v7081_v12  ;;  %3914 = vmatpush.msra.mxu0 %v7081_v12 }
 0xdbf   :  { %3788 = vmatmul.f32.vlgmr.msra.gmra.mxu2 %v3503_v40 }
 0xdc0   :  { %4052 = vmatpush.msrb.mxu1 %v7089_v19  ;;  %3916 = vmatpush.msra.mxu0 %v7089_v19 }
 0xdc1   :  { %3810 = vmatmul.f32.vlgmr.msra.gmra.mxu3 %v3503_v40 }
 0xdc5   :  { %3740 = vmatmul.f32.vlgmr.msrb.gmra.mxu0 %v3504_v22 }
 0xdc6   :  { %4025 = vmatpush.msrb.mxu0 %v7131_v48 }
 0xdc8   :  { %4029 = vmatpush.msrb.mxu0 %v7136_v51 }
 0xe12   :  { %v7532_v24 = vpop.f32.mrf.mxu1 }
 0xe1a   :  { %v7534_v42 = vpop.f32.mrf.mxu0  ;;  %v7536_v53 = vpop.f32.mrf.mxu2 }
 0xe1b   :  { %v7540_v8 = vpop.f32.mrf.mxu1 }
 0xe1c   :  { %v7538_v11 = vpop.f32.mrf.mxu3 }
 0xe22   :  { %v7542_v23 = vpop.f32.mrf.mxu0  ;;  %v7544_v3 = vpop.f32.mrf.mxu2 }
 0xe23   :  { %v7548_v37 = vpop.f32.mrf.mxu1 }
 0xe24   :  { %v7546_v27 = vpop.f32.mrf.mxu3 }
 0xe2a   :  { %v7550_v58 = vpop.f32.mrf.mxu0  ;;  %v7552_v31 = vpop.f32.mrf.mxu2 }
 0xe2b   :  { %v3535_v47 = vpop.f32.mrf.mxu1 }
 0xe2c   :  { %v7554_v1 = vpop.f32.mrf.mxu3 }
 0xe32   :  { %v3509_v35 = vpop.f32.mrf.mxu0  ;;  %v3559_v4 = vpop.f32.mrf.mxu2 }
 0xe33   :  { %v3536_v33 = vadd.f32 %v3535_v47, %v3509_v35  ;;  %v3629_v20 = vpop.f32.mrf.mxu1 }
 0xe34   :  { %v3583_v59 = vpop.f32.mrf.mxu3 }
 0xe35   :  { %v3560_v16 = vadd.f32 %v3559_v4, %v3536_v33 }
 0xe37   :  { %v3584_v45 = vadd.f32 %v3583_v59, %v3560_v16 }
 0xe3a   :  { %v3607_v39 = vpop.f32.mrf.mxu0 }
 0xe3b   :  { %v3608_v30 = vadd.f32 %v3607_v39, %v3584_v45  ;;  %v3691_v39 = vpop.f32.mrf.mxu2 }
 0xe3d   :  { %v3630_v43 = vadd.f32 %v3629_v20, %v3608_v30  ;;  %v3717_v30 = vpop.f32.mrf.mxu3 }
 0xe3f   :  { %3645 = vrot.lane.b32.xlu2 %v3630_v43, %s6754_s28  ;;  %3639 = vrot.lane.b32.xlu1 %v3630_v43, %s6755_s29 }
 0xe40   :  { %3633 = vrot.lane.b32.xlu0 %v3630_v43, %s6756_s30 }
 0xe47   :  { %3648 = vrot.lane.b32.xlu1 %v3630_v43, %s6757_s13 }
 0xe48   :  { %3636 = vrot.lane.b32.xlu0 %v3630_v43, %s6759_s4 }
 0xe4f   :  { %3477 = vperm.xlu1 %6688, %v47_v46   ;;  %v6727_v46 = vld [vmem:[%s8022_s3] sm:$0x3]  ;;  %s6770_s3 = smov 8  }
 0xe50   :  { %3642 = vrot.lane.b32.xlu0 %v3630_v43, %s6758_s14 }
 0xe58   :  { %3651 = vrot.lane.b32.xlu0 %v3630_v43, %s6760_s0 }
 0xe99   :  { %v3646_v35 = vpop.permute.xlu2 %3645 }
 0xeb1   :  { %v3640_v22 = vpop.permute.xlu1 %3639 }
 0xeb2   :  { %v3634_v40 = vpop.permute.xlu0 %3633 }
 0xeb3   :  { %v3654_v32 = vsel %vm695_vm2, %v3630_v43, %v3634_v40  ;;  %v3480_v40 = vperm.slane %v6727_v46, 1 }
 0xeb9   :  { %v3649_v4 = vpop.permute.xlu1 %3648 }
 0xeba   :  { %v3637_v49 = vpop.permute.xlu0 %3636 }
 0xebb   :  { %v3655_v2 = vsel %vm697_vm3, %v3654_v32, %v3637_v49  ;;  %v3741_v32 = vpop.f32.mrf.mxu0 }
 0xebc   :  { %v3656_v54 = vsel %vm699_vm4, %v3655_v2, %v3640_v22 }
 0xec1   :  { %v3478_v22 = vpop.permute.xlu1 %3477 }
 0xec2   :  { %v3643_v50 = vpop.permute.xlu0 %3642 }
 0xec3   :  { %v3657_v47 = vsel %vm701_vm5, %v3656_v54, %v3643_v50  ;;  %v3765_v50 = vpop.f32.mrf.mxu1  ;;  %v7577_v54 = vmul.f32 %v3480_v40, %v3478_v22 }
 0xec4   :  { %v3658_v33 = vsel %vm8102_vm14, %v3657_v47, %v3646_v35  ;;  %v3789_v35 = vpop.f32.mrf.mxu2  ;;  %vm8106_vm14 = vcmask 39936  }
 0xec5   :  { %v3659_v59 = vsel %vm8103_vm7, %v3658_v33, %v3649_v4  ;;  %v3811_v4 = vpop.f32.mrf.mxu3  ;;  %vm3482_vm11 = vcmp.eq.f32.partialorder %v7577_v54, 0.0  ;;  %vm8107_vm7 = vcmask 31744  }
 0xeca   :  { %v3652_v16 = vpop.permute.xlu0 %3651 }
 0xecb   :  { %v3660_v45 = vsel %vm8104_vm9, %v3659_v59, %v3652_v16  ;;  %vm8108_vm9 = vcmask 113664  }
 0xecc   :  { %3662 = vrot.lane.b32.xlu2 %v3660_v45, %s6762_s17 }
 0xf26   :  { %v3663_v20 = vpop.permute.xlu2 %3662 }
 0xf27   :  { %v3692_v43 = vadd.f32 %v3691_v39, %v3663_v20 }
 0xf29   :  { %v3718_v49 = vadd.f32 %v3717_v30, %v3692_v43 }
 0xf2b   :  { %v3742_v2 = vadd.f32 %v3741_v32, %v3718_v49 }
 0xf2d   :  { %v3766_v47 = vadd.f32 %v3765_v50, %v3742_v2 }
 0xf2f   :  { %v3790_v33 = vadd.f32 %v3789_v35, %v3766_v47 }
 0xf31   :  { %v3812_v16 = vadd.f32 %v3811_v4, %v3790_v33 }
 0xf33   :  { %v3814_v59 = vsel %vm3482_vm11, -10000.0, %v3812_v16 }
 0xf34   :  { %v3815_v45 = vsel %vm523_vm1, %v3814_v59, -inf }
 0xf35   :  { %3816 = vmax.xlane.f32.xlu0 %v3815_v45 }
 0xfa8   :  { %v3817_v39 = vpop.xlane.xlu0 %3816 }
 0xfa9   :  { %v3818_v30 = vsub.f32 %v3814_v59, %v3817_v39 }
 0xfab   :  { %v3819_v20 = vmul.f32 1.442695, %v3818_v30 }
 0xfad   :  { %6709 = vpow2.f32 %v3819_v20 }
 0xfb3   :  { %v6710_v43 = vpop.eup %6709 }
 0xfb4   :  { %v3821_v46 = vsel %vm523_vm1, %v6710_v43, 0.0 }
 0xfb5   :  { %3822 = vadd.xlane.f32.xlu2 %v3821_v46 }
0x1028   :  { %v3823_v40 = vpop.xlane.xlu2 %3822 }
0x1029   :  { %6711 = vrcp.f32 %v3823_v40 }
0x102f   :  { %v6712_v49 = vpop.eup %6711 }
0x1030   :  { %v3825_v22 = vmul.f32 %v6712_v49, %v3823_v40 }
0x1032   :  { %v3826_v32 = vsub.f32 2.0, %v3825_v22 }
0x1034   :  { %v3827_v2 = vmul.f32 %v6712_v49, %v3826_v32 }
0x1036   :  { %v3828_v50 = vmul.f32 %v6710_v43, %v3827_v2 }
0x1038   :  { %3830 = vrot.lane.b32.xlu1 %v3828_v50, %s6760_s0  ;;  %v3864_v47 = vrot.slane %v3828_v50, 6  ;;  %v3858_v35 = vrot.slane %v3828_v50, 5  ;;  %v3834_v33 = vrot.slane %v3828_v50, 1  ;;  %v3840_v4 = vrot.slane %v3828_v50, 2 }
0x1039   :  { %v3846_v16 = vrot.slane %v3828_v50, 3  ;;  %v3852_v59 = vrot.slane %v3828_v50, 4  ;;  %v3870_v28 = vsel %vm523_vm1, %v3828_v50, 0.0 }
0x103a   :  { %3865 = vrot.lane.b32.xlu0 %v3864_v47, %s6756_s30  ;;  %3859 = vrot.lane.b32.xlu2 %v3858_v35, %s6759_s4 }
0x1040   :  { %3835 = vrot.lane.b32.xlu1 %v3834_v33, %s6757_s13 }
0x1042   :  { %4388 = vrot.lane.b32.xlu0 %v7497_v56, %s6764_s11 }
0x1048   :  { %3841 = vrot.lane.b32.xlu1 %v3840_v4, %s6754_s28 }
0x1050   :  { %3847 = vrot.lane.b32.xlu1 %v3846_v16, %s6758_s14 }
0x1058   :  { %3853 = vrot.lane.b32.xlu1 %v3852_v59, %s6755_s29 }
0x1060   :  { %4058 = vrot.lane.b32.xlu1 %v7497_v56, %s6763_s20 }
0x1068   :  { %4209 = vrot.lane.b32.xlu1 %v7509_v38, %s6764_s11 }
0x1094   :  { %v3860_v49 = vpop.permute.xlu2 %3859 }
0x1095   :  { %v3862_v35 = vsel %vm919_vm12, 0.0, %v3860_v49 }
0x10aa   :  { %v3831_v45 = vpop.permute.xlu1 %3830 }
0x10ac   :  { %v3866_v32 = vpop.permute.xlu0 %3865 }
0x10ad   :  { %v3868_v4 = vsel %vm927_vm8, 0.0, %v3866_v32 }
0x10b2   :  { %v3836_v39 = vpop.permute.xlu1 %3835 }
0x10b3   :  { %v3838_v20 = vsel %vm8105_vm6, 0.0, %v3836_v39  ;;  %vm8109_vm6 = vcmask 23552  }
0x10b4   :  { %v3839_v22 = vsel %vm8108_vm9, %v3838_v20, 0.0  ;;  %v4061_v20 = vsel %vm523_vm1, %v3828_v50, 0  ;;  %vm8112_vm9 = vcmask 1044480   ;;  %v4389_v25 = vpop.permute.xlu0 %4388 }
0x10b5   :  { %v3872_v33 = vrot.slane %v3839_v22, 7  ;;  %v4080_v34 = vand.u32 4294901760, %v4061_v20 }
0x10ba   :  { %v3842_v30 = vpop.permute.xlu1 %3841 }
0x10bb   :  { %v3844_v46 = vsel %vm8106_vm14, 0.0, %v3842_v30  ;;  %v3863_v30 = vsel %vm8045_vm13, %v3862_v35, 0.0  ;;  %vm8110_vm14 = vcmask 72704  }
0x10bc   :  { %v3845_v2 = vsel %vm897_vm15, %v3844_v46, 0.0  ;;  %v3869_v46 = vsel %vm8110_vm14, %v3868_v4, 0.0  ;;  %vm8114_vm14 = vcmask 1046528  }
0x10bd   :  { %v3875_v16 = vrot.slane %v3845_v2, 6  ;;  %v3884_v2 = vrot.slane %v3863_v30, 3  ;;  %v3887_v35 = vrot.slane %v3869_v46, 2  ;;  %v4394_v46 = vsel %vm523_vm1, %v4389_v25, 0 }
0x10c2   :  { %v3848_v43 = vpop.permute.xlu1 %3847 }
0x10c3   :  { %v3850_v40 = vsel %vm8107_vm7, 0.0, %v3848_v43  ;;  %v3833_v43 = vsel %vm881_vm10, 0.0, %v3831_v45  ;;  %vm8111_vm7 = vcmask 89088  }
0x10c4   :  { %v3851_v47 = vsel %vm905_vm0, %v3850_v40, 0.0  ;;  %v3889_v40 = vsel %vm695_vm2, %v3833_v43, %v3872_v33 }
0x10c5   :  { %v3878_v59 = vrot.slane %v3851_v47, 5  ;;  %v3890_v22 = vsel %vm697_vm3, %v3889_v40, %v3875_v16 }
0x10c7   :  { %v3891_v47 = vsel %vm699_vm4, %v3890_v22, %v3878_v59 }
0x10ca   :  { %v3854_v39 = vpop.permute.xlu1 %3853 }
0x10cb   :  { %v3856_v7 = vsel %vm8109_vm6, 0.0, %v3854_v39  ;;  %vm8113_vm6 = vcmask 1045504  }
0x10cc   :  { %v3857_v49 = vsel %vm8111_vm7, %v3856_v7, 0.0  ;;  %v4081_v7 = vsub.f32 %v4061_v20, %v4080_v34  ;;  %vm8115_vm7 = vcmask 121856  }
0x10cd   :  { %v3881_v32 = vrot.slane %v3857_v49, 4 }
0x10ce   :  { %v4082_v22 = vand.u32 4294901760, %v4081_v7 }
0x10cf   :  { %v3892_v45 = vsel %vm701_vm5, %v3891_v47, %v3881_v32 }
0x10d0   :  { %v3893_v39 = vsel %vm8112_vm9, %v3892_v45, %v3884_v2  ;;  %v4411_v2 = vand.u32 4294901760, %v4394_v46  ;;  %v4083_v47 = vsub.f32 %v4081_v7, %v4082_v22 }
0x10d1   :  { %v3894_v4 = vsel %vm8113_vm6, %v3893_v39, %v3887_v35 }
0x10d2   :  { %v3895_v33 = vsel %vm8114_vm14, %v3894_v4, %v3870_v28  ;;  %v4059_v43 = vpop.permute.xlu1 %4058  ;;  %v4438_v39 = vsub.f32 %v4394_v46, %v4411_v2  ;;  %v4084_v25 = vand.u32 4294901760, %v4083_v47 }
0x10d3   :  { %v4078_v16 = vand.u32 4294901760, %v4059_v43  ;;  %v3897_v30 = vsel %vm8115_vm7, %v3895_v33, 0  ;;  %vm8117_vm7 = vcmask 48128  }
0x10d4   :  { %v3917_v40 = vand.u32 4294901760, %v3897_v30  ;;  %v4439_v33 = vand.u32 4294901760, %v4438_v39 }
0x10d5   :  { %v4105_v59 = vsub.f32 %v4059_v43, %v4078_v16  ;;  %4079 = vmatpush.msra.mxu2 %v4078_v16 }
0x10d6   :  { %3953 = vmatmul.f32.vlgmr.msra.gmra.mxu1 %v3917_v40  ;;  %v3918_v49 = vsub.f32 %v3897_v30, %v3917_v40  ;;  %v4440_v46 = vsub.f32 %v4438_v39, %v4439_v33 }
0x10d7   :  { %v4106_v32 = vand.u32 4294901760, %v4105_v59  ;;  %4155 = vmatpush.msra.mxu1 %v4078_v16 }
0x10d8   :  { %3979 = vmatmul.f32.vlgmr.msrb.gmra.mxu2 %v3918_v49  ;;  %v3919_v50 = vand.u32 4294901760, %v3918_v49 }
0x10d9   :  { %v4107_v28 = vsub.f32 %v4105_v59, %v4106_v32  ;;  %4181 = vmatpush.msrb.mxu2 %v4106_v32 }
0x10da   :  { %4004 = vmatmul.f32.vlgmr.msrb.gmra.mxu3 %v3919_v50  ;;  %v3920_v20 = vsub.f32 %v3918_v49, %v3919_v50  ;;  %v4210_v4 = vpop.permute.xlu1 %4209 }
0x10db   :  { %v4108_v35 = vand.u32 4294901760, %v4107_v28  ;;  %v4211_v43 = vsel %vm523_vm1, %v4210_v4, 0 }
0x10dc   :  { %v3921_v45 = vand.u32 4294901760, %v3920_v20  ;;  %v4230_v30 = vand.u32 4294901760, %v4211_v43 }
0x10dd   :  { %4109 = vmatpush.msra.mxu3 %v4108_v35 }
0x10de   :  { %3922 = vmatmul.f32.vlgmr.msra.gmra.mxu0 %v3921_v45  ;;  %4054 = vmatmul.f32.vlgmr.msrb.gmra.mxu1 %v3917_v40 }
0x10df   :  { %4132 = vmatpush.msra.mxu0 %v4105_v59  ;;  %4203 = vmatpush.msrb.mxu3 %v4078_v16  ;;  %v4231_v16 = vsub.f32 %v4211_v43, %v4230_v30  ;;  %v4441_v59 = vand.u32 4294901760, %v4440_v46 }
0x10e0   :  { %4085 = vmatmul.f32.vlgmr.msra.gmra.mxu2 %v4084_v25  ;;  %4259 = vmatpush.msrb.mxu1 %v7005_v17 }
0x10e1   :  { %4282 = vmatpush.msra.mxu2 %v6994_v14  ;;  %v4232_v49 = vand.u32 4294901760, %v4231_v16 }
0x10e2   :  { %4111 = vmatmul.f32.vlgmr.msra.gmra.mxu3 %v4080_v34 }
0x10e3   :  { %4305 = vmatpush.msra.mxu3 %v6991_v13  ;;  %v4233_v32 = vsub.f32 %v4231_v16, %v4232_v49 }
0x10e6   :  { %4031 = vmatmul.f32.vlgmr.msrb.gmra.mxu0 %v3917_v40  ;;  %4159 = vmatmul.f32.vlgmr.msra.gmra.mxu1 %v4082_v22  ;;  %v4234_v40 = vand.u32 4294901760, %v4233_v32 }
0x10e7   :  { %4353 = vmatpush.msra.mxu1 %v6991_v13  ;;  %4229 = vmatpush.msrb.mxu0 %v6991_v13 }
0x10e8   :  { %4183 = vmatmul.f32.vlgmr.msrb.gmra.mxu2 %v4080_v34 }
0x10e9   :  { %4412 = vmatpush.xpose.msrb.mxu2 %v4411_v2 }
0x10ea   :  { %4205 = vmatmul.f32.vlgmr.msrb.gmra.mxu3 %v4080_v34 }
0x10eb   :  { %4442 = vmatpush.xpose.msrb.mxu3 %v4441_v59 }
0x10ee   :  { %4135 = vmatmul.f32.vlgmr.msra.gmra.mxu0 %v4081_v7  ;;  %4261 = vmatmul.f32.vlgmr.msrb.gmra.mxu1 %v4230_v30 }
0x10ef   :  { %4488 = vmatpush.xpose.msrb.mxu1 %v4411_v2  ;;  %4331 = vmatpush.msra.mxu0 %v7000_v15 }
0x10f0   :  { %4285 = vmatmul.f32.vlgmr.msra.gmra.mxu2 %v4231_v16 }
0x10f1   :  { %4514 = vmatpush.xpose.msra.mxu2 %v4439_v33 }
0x10f2   :  { %4309 = vmatmul.f32.vlgmr.msra.gmra.mxu3 %v4232_v49 }
0x10f3   :  { %4536 = vmatpush.xpose.msra.mxu3 %v4411_v2 }
0x10f6   :  { %4235 = vmatmul.f32.vlgmr.msrb.gmra.mxu0 %v4234_v40  ;;  %4355 = vmatmul.f32.vlgmr.msra.gmra.mxu1 %v4230_v30 }
0x10f7   :  { %4465 = vmatpush.xpose.msrb.mxu0 %v4438_v39  ;;  %4673 = vmatpush.msra.mxu1 %v7139_v52 }
0x10f8   :  { %4418 = vmatmul.f32.vlgmr.msrb.gmra.mxu2 %v4234_v40 }
0x10f9   :  { %4679 = vmatpush.msra.mxu1 %v7145_v55  ;;  %4701 = vmatpush.msrb.mxu2 %v7087_v18 }
0x10fa   :  { %4444 = vmatmul.f32.vlgmr.msrb.gmra.mxu3 %v4230_v30 }
0x10fb   :  { %4704 = vmatpush.msrb.mxu2 %v7095_v21  ;;  %4726 = vmatpush.msrb.mxu3 %v7081_v12 }
0x10fd   :  { %4728 = vmatpush.msrb.mxu3 %v7089_v19 }
0x10fe   :  { %4333 = vmatmul.f32.vlgmr.msra.gmra.mxu0 %v4230_v30  ;;  %4492 = vmatmul.f32.vlgmr.msrb.gmra.mxu1 %v4232_v49 }
0x10ff   :  { %4778 = vmatpush.msrb.mxu1 %v7081_v12  ;;  %4642 = vmatpush.msra.mxu0 %v7081_v12 }
0x1100   :  { %4516 = vmatmul.f32.vlgmr.msra.gmra.mxu2 %v4230_v30 }
0x1101   :  { %4780 = vmatpush.msrb.mxu1 %v7089_v19  ;;  %4644 = vmatpush.msra.mxu0 %v7089_v19 }
0x1102   :  { %4538 = vmatmul.f32.vlgmr.msra.gmra.mxu3 %v4230_v30 }
0x1106   :  { %4468 = vmatmul.f32.vlgmr.msrb.gmra.mxu0 %v4231_v16 }
0x1107   :  { %4753 = vmatpush.msrb.mxu0 %v7131_v48 }
0x1109   :  { %4757 = vmatpush.msrb.mxu0 %v7136_v51 }
0x1153   :  { %v3954_v34 = vpop.f32.mrf.mxu1 }
0x115b   :  { %v3923_v7 = vpop.f32.mrf.mxu0  ;;  %v3980_v22 = vpop.f32.mrf.mxu2 }
0x115c   :  { %v3955_v50 = vadd.f32 %v3954_v34, %v3923_v7  ;;  %v4055_v20 = vpop.f32.mrf.mxu1 }
0x115d   :  { %v4005_v2 = vpop.f32.mrf.mxu3 }
0x115e   :  { %v3981_v28 = vadd.f32 %v3980_v22, %v3955_v50 }
0x1160   :  { %v4006_v47 = vadd.f32 %v4005_v2, %v3981_v28 }
0x1163   :  { %v4032_v35 = vpop.f32.mrf.mxu0  ;;  %v4086_v45 = vpop.f32.mrf.mxu2 }
0x1164   :  { %v4033_v39 = vadd.f32 %v4032_v35, %v4006_v47  ;;  %v4160_v43 = vpop.f32.mrf.mxu1 }
0x1165   :  { %v4112_v4 = vpop.f32.mrf.mxu3 }
0x1166   :  { %v4056_v25 = vadd.f32 %v4055_v20, %v4033_v39 }
0x1168   :  { %v4087_v33 = vadd.f32 %v4086_v45, %v4056_v25 }
0x116a   :  { %v4113_v30 = vadd.f32 %v4112_v4, %v4087_v33 }
0x116b   :  { %v4136_v46 = vpop.f32.mrf.mxu0  ;;  %v4184_v16 = vpop.f32.mrf.mxu2 }
0x116c   :  { %v4137_v59 = vadd.f32 %v4136_v46, %v4113_v30  ;;  %v4262_v34 = vpop.f32.mrf.mxu1 }
0x116d   :  { %v4206_v32 = vpop.f32.mrf.mxu3 }
0x116e   :  { %v4161_v49 = vadd.f32 %v4160_v43, %v4137_v59 }
0x1170   :  { %v4185_v40 = vadd.f32 %v4184_v16, %v4161_v49 }
0x1172   :  { %v7640_v62 = vadd.f32 %v4206_v32, %v4185_v40 }
0x1173   :  { %v4236_v7 = vpop.f32.mrf.mxu0  ;;  %v4286_v50 = vpop.f32.mrf.mxu2 }
0x1174   :  { %8116 = vst [vmem:[#allocation27_spill] sm:$0xff] %v7640_v62  ;;  %v4263_v22 = vadd.f32 %v4262_v34, %v4236_v7  ;;  %v4356_v45 = vpop.f32.mrf.mxu1 }
0x1175   :  { %v4310_v28 = vpop.f32.mrf.mxu3 }
0x1176   :  { %v4287_v2 = vadd.f32 %v4286_v50, %v4263_v22 }
0x1178   :  { %v4311_v47 = vadd.f32 %v4310_v28, %v4287_v2 }
0x117b   :  { %v4334_v35 = vpop.f32.mrf.mxu0  ;;  %v4419_v50 = vpop.f32.mrf.mxu2 }
0x117c   :  { %v4335_v20 = vadd.f32 %v4334_v35, %v4311_v47 }
0x117d   :  { %v4445_v2 = vpop.f32.mrf.mxu3 }
0x117e   :  { %v4357_v39 = vadd.f32 %v4356_v45, %v4335_v20 }
0x1180   :  { %4366 = vrot.lane.b32.xlu0 %v4357_v39, %s6755_s29  ;;  %4363 = vrot.lane.b32.xlu2 %v4357_v39, %s6759_s4 }
0x1181   :  { %4360 = vrot.lane.b32.xlu1 %v4357_v39, %s6756_s30 }
0x1183   :  { %v4469_v20 = vpop.f32.mrf.mxu0 }
0x1188   :  { %4375 = vrot.lane.b32.xlu0 %v4357_v39, %s6757_s13  ;;  %4372 = vrot.lane.b32.xlu2 %v4357_v39, %s6754_s28 }
0x1189   :  { %4369 = vrot.lane.b32.xlu1 %v4357_v39, %s6758_s14 }
0x1191   :  { %4378 = vrot.lane.b32.xlu1 %v4357_v39, %s6760_s0 }
0x11da   :  { %v4364_v25 = vpop.permute.xlu2 %4363 }
0x11e2   :  { %v4373_v49 = vpop.permute.xlu2 %4372 }
0x11f2   :  { %v4367_v43 = vpop.permute.xlu0 %4366 }
0x11f3   :  { %v4361_v4 = vpop.permute.xlu1 %4360 }
0x11f4   :  { %v4381_v33 = vsel %vm695_vm2, %v4357_v39, %v4361_v4  ;;  %v4493_v39 = vpop.f32.mrf.mxu1 }
0x11f5   :  { %v4382_v30 = vsel %vm697_vm3, %v4381_v33, %v4364_v25  ;;  %v4517_v25 = vpop.f32.mrf.mxu2 }
0x11f6   :  { %v4383_v16 = vsel %vm699_vm4, %v4382_v30, %v4367_v43  ;;  %v4539_v43 = vpop.f32.mrf.mxu3 }
0x11fa   :  { %v4376_v40 = vpop.permute.xlu0 %4375 }
0x11fb   :  { %v4370_v46 = vpop.permute.xlu1 %4369 }
0x11fc   :  { %v4384_v59 = vsel %vm701_vm5, %v4383_v16, %v4370_v46 }
0x11fd   :  { %v4385_v32 = vsel %vm8112_vm9, %v4384_v59, %v4373_v49  ;;  %vm8118_vm9 = vcmask 39936  }
0x11fe   :  { %v4386_v7 = vsel %vm8113_vm6, %v4385_v32, %v4376_v40  ;;  %vm8119_vm6 = vcmask 31744  }
0x1203   :  { %v4379_v34 = vpop.permute.xlu1 %4378 }
0x1204   :  { %v4387_v22 = vsel %vm8114_vm14, %v4386_v7, %v4379_v34  ;;  %vm8120_vm14 = vcmask 113664  }
0x1205   :  { %4391 = vrot.lane.b32.xlu2 %v4387_v22, %s6762_s17 }
0x125f   :  { %v4392_v28 = vpop.permute.xlu2 %4391 }
0x1260   :  { %v4420_v47 = vadd.f32 %v4419_v50, %v4392_v28 }
0x1262   :  { %v4446_v35 = vadd.f32 %v4445_v2, %v4420_v47 }
0x1264   :  { %v4470_v45 = vadd.f32 %v4469_v20, %v4446_v35 }
0x1266   :  { %v4494_v4 = vadd.f32 %v4493_v39, %v4470_v45 }
0x1268   :  { %v4518_v33 = vadd.f32 %v4517_v25, %v4494_v4 }
0x126a   :  { %v4540_v30 = vadd.f32 %v4539_v43, %v4518_v33 }
0x126c   :  { %v4542_v46 = vsel %vm3482_vm11, -10000.0, %v4540_v30 }
0x126d   :  { %v4543_v16 = vsel %vm523_vm1, %v4542_v46, -inf }
0x126e   :  { %4544 = vmax.xlane.f32.xlu0 %v4543_v16 }
0x12e1   :  { %v4545_v59 = vpop.xlane.xlu0 %4544 }
0x12e2   :  { %v4546_v49 = vsub.f32 %v4542_v46, %v4545_v59 }
0x12e4   :  { %v4547_v32 = vmul.f32 1.442695, %v4546_v49 }
0x12e6   :  { %6713 = vpow2.f32 %v4547_v32 }
0x12ec   :  { %v6714_v40 = vpop.eup %6713 }
0x12ed   :  { %v4549_v34 = vsel %vm523_vm1, %v6714_v40, 0.0 }
0x12ee   :  { %4550 = vadd.xlane.f32.xlu1 %v4549_v34 }
0x1361   :  { %v4551_v7 = vpop.xlane.xlu1 %4550 }
0x1362   :  { %6715 = vrcp.f32 %v4551_v7 }
0x1368   :  { %v6716_v22 = vpop.eup %6715 }
0x1369   :  { %v4553_v50 = vmul.f32 %v6716_v22, %v4551_v7 }
0x136b   :  { %v4554_v2 = vsub.f32 2.0, %v4553_v50 }
0x136d   :  { %v4555_v28 = vmul.f32 %v6716_v22, %v4554_v2 }
0x136f   :  { %v4556_v47 = vmul.f32 %v6714_v40, %v4555_v28 }
0x1371   :  { %4558 = vrot.lane.b32.xlu2 %v4556_v47, %s6760_s0  ;;  %v4592_v35 = vrot.slane %v4556_v47, 6  ;;  %v4586_v20 = vrot.slane %v4556_v47, 5  ;;  %v4562_v45 = vrot.slane %v4556_v47, 1  ;;  %v4568_v39 = vrot.slane %v4556_v47, 2 }
0x1372   :  { %v4574_v4 = vrot.slane %v4556_v47, 3  ;;  %v4580_v25 = vrot.slane %v4556_v47, 4 }
0x1373   :  { %4593 = vrot.lane.b32.xlu1 %v4592_v35, %s6756_s30  ;;  %4587 = vrot.lane.b32.xlu0 %v4586_v20, %s6759_s4 }
0x1379   :  { %4563 = vrot.lane.b32.xlu2 %v4562_v45, %s6757_s13 }
0x1381   :  { %4569 = vrot.lane.b32.xlu2 %v4568_v39, %s6754_s28 }
0x1389   :  { %4575 = vrot.lane.b32.xlu2 %v4574_v4, %s6758_s14 }
0x1391   :  { %4581 = vrot.lane.b32.xlu2 %v4580_v25, %s6755_s29 }
0x1399   :  { %4786 = vrot.lane.b32.xlu2 %v7497_v56, %s6765_s1  ;;  %s6646_s1 = sshll.u32 %s8031_s12, 4  ;;  %s6647_s1 = int_to_ptr.hbm [resolvable:$true] %s6646_s1 }
0x13a1   :  { %4937 = vrot.lane.b32.xlu2 %v7509_v38, %s6766_s24 }
0x13a9   :  { %5116 = vrot.lane.b32.xlu2 %v7497_v56, %s6766_s24  ;;  %s6774_s24 = smov 128  }
0x13cb   :  { %v4559_v33 = vpop.permute.xlu2 %4558 }
0x13cc   :  { %v4561_v39 = vsel %vm881_vm10, 0.0, %v4559_v33 }
0x13d3   :  { %v4564_v43 = vpop.permute.xlu2 %4563 }
0x13d4   :  { %v4566_v46 = vsel %vm8117_vm7, 0.0, %v4564_v43  ;;  %vm8121_vm7 = vcmask 23552   ;;  %v4789_v43 = vsel %vm523_vm1, %v4556_v47, 0 }
0x13d5   :  { %v4567_v32 = vsel %vm8120_vm14, %v4566_v46, 0.0  ;;  %vm8124_vm14 = vcmask 1044480  }
0x13d6   :  { %v4600_v50 = vrot.slane %v4567_v32, 7 }
0x13db   :  { %v4570_v30 = vpop.permute.xlu2 %4569 }
0x13dc   :  { %v4572_v59 = vsel %vm8118_vm9, 0.0, %v4570_v30  ;;  %v4617_v30 = vsel %vm695_vm2, %v4561_v39, %v4600_v50  ;;  %vm8122_vm9 = vcmask 72704  }
0x13dd   :  { %v4573_v34 = vsel %vm897_vm15, %v4572_v59, 0.0 }
0x13de   :  { %v4603_v28 = vrot.slane %v4573_v34, 6  ;;  %v4808_v34 = vand.u32 4294901760, %v4789_v43 }
0x13e0   :  { %v4618_v59 = vsel %vm697_vm3, %v4617_v30, %v4603_v28  ;;  %v4809_v39 = vsub.f32 %v4789_v43, %v4808_v34 }
0x13e3   :  { %v4576_v16 = vpop.permute.xlu2 %4575 }
0x13e4   :  { %v4578_v49 = vsel %vm8119_vm6, 0.0, %v4576_v16  ;;  %vm8123_vm6 = vcmask 89088  }
0x13e5   :  { %v4588_v40 = vpop.permute.xlu0 %4587  ;;  %v4594_v7 = vpop.permute.xlu1 %4593  ;;  %v4579_v22 = vsel %vm905_vm0, %v4578_v49, 0.0 }
0x13e6   :  { %v4590_v2 = vsel %vm919_vm12, 0.0, %v4588_v40  ;;  %v4596_v35 = vsel %vm927_vm8, 0.0, %v4594_v7  ;;  %v4606_v20 = vrot.slane %v4579_v22, 5 }
0x13e7   :  { %v4591_v4 = vsel %vm8045_vm13, %v4590_v2, 0.0  ;;  %v4597_v46 = vsel %vm8122_vm9, %v4596_v35, 0.0  ;;  %v4598_v2 = vsel %vm523_vm1, %v4556_v47, 0.0  ;;  %vm8126_vm13 = vcmask 1046528  }
0x13e8   :  { %v4619_v32 = vsel %vm699_vm4, %v4618_v59, %v4606_v20  ;;  %v4612_v40 = vrot.slane %v4591_v4, 3  ;;  %v4615_v33 = vrot.slane %v4597_v46, 2  ;;  %vm8127_vm9 = vcmask 121856  }
0x13e9   :  { %v4810_v46 = vand.u32 4294901760, %v4809_v39 }
0x13eb   :  { %v4582_v45 = vpop.permute.xlu2 %4581 }
0x13ec   :  { %v4584_v25 = vsel %vm8121_vm7, 0.0, %v4582_v45  ;;  %vm8125_vm7 = vcmask 1045504  }
0x13ed   :  { %v4585_v16 = vsel %vm8123_vm6, %v4584_v25, 0.0  ;;  %vm8129_vm6 = vmmov %vm8125_vm7 }
0x13ee   :  { %v4609_v49 = vrot.slane %v4585_v16, 4 }
0x13f0   :  { %v4620_v7 = vsel %vm701_vm5, %v4619_v32, %v4609_v49 }
0x13f1   :  { %v4621_v22 = vsel %vm8124_vm14, %v4620_v7, %v4612_v40  ;;  %v4811_v40 = vsub.f32 %v4809_v39, %v4810_v46 }
0x13f2   :  { %v4622_v50 = vsel %vm8125_vm7, %v4621_v22, %v4615_v33  ;;  %vm8131_vm7 = vcmask 48128  }
0x13f3   :  { %v4623_v35 = vsel %vm8126_vm13, %v4622_v50, %v4598_v2  ;;  %v4787_v45 = vpop.permute.xlu2 %4786  ;;  %v4812_v7 = vand.u32 4294901760, %v4811_v40  ;;  %vm8128_vm13 = vmmov %vm8124_vm14  ;;  %vm8130_vm14 = vcmask 1046528  }
0x13f4   :  { %v4806_v25 = vand.u32 4294901760, %v4787_v45  ;;  %v4625_v28 = vsel %vm8127_vm9, %v4623_v35, 0  ;;  %vm8132_vm9 = vcmask 39936  }
0x13f5   :  { %v4645_v30 = vand.u32 4294901760, %v4625_v28 }
0x13f6   :  { %v4833_v20 = vsub.f32 %v4787_v45, %v4806_v25  ;;  %4807 = vmatpush.msra.mxu2 %v4806_v25 }
0x13f7   :  { %4681 = vmatmul.f32.vlgmr.msra.gmra.mxu1 %v4645_v30  ;;  %v4646_v4 = vsub.f32 %v4625_v28, %v4645_v30 }
0x13f8   :  { %v4834_v16 = vand.u32 4294901760, %v4833_v20  ;;  %4883 = vmatpush.msra.mxu1 %v4806_v25 }
0x13f9   :  { %4707 = vmatmul.f32.vlgmr.msrb.gmra.mxu2 %v4646_v4  ;;  %v4647_v59 = vand.u32 4294901760, %v4646_v4 }
0x13fa   :  { %v4835_v47 = vsub.f32 %v4833_v20, %v4834_v16  ;;  %4909 = vmatpush.msrb.mxu2 %v4834_v16 }
0x13fb   :  { %4732 = vmatmul.f32.vlgmr.msrb.gmra.mxu3 %v4647_v59  ;;  %v4938_v49 = vpop.permute.xlu2 %4937  ;;  %v4648_v32 = vsub.f32 %v4646_v4, %v4647_v59 }
0x13fc   :  { %v4836_v43 = vand.u32 4294901760, %v4835_v47  ;;  %v4939_v22 = vsel %vm523_vm1, %v4938_v49, 0 }
0x13fd   :  { %v4649_v33 = vand.u32 4294901760, %v4648_v32  ;;  %v4958_v35 = vand.u32 4294901760, %v4939_v22 }
0x13fe   :  { %4837 = vmatpush.msra.mxu3 %v4836_v43 }
0x13ff   :  { %4650 = vmatmul.f32.vlgmr.msra.gmra.mxu0 %v4649_v33  ;;  %4782 = vmatmul.f32.vlgmr.msrb.gmra.mxu1 %v4645_v30 }
0x1400   :  { %4860 = vmatpush.msra.mxu0 %v4833_v20  ;;  %4931 = vmatpush.msrb.mxu3 %v4806_v25  ;;  %v4959_v25 = vsub.f32 %v4939_v22, %v4958_v35 }
0x1401   :  { %4813 = vmatmul.f32.vlgmr.msra.gmra.mxu2 %v4812_v7  ;;  %4987 = vmatpush.msrb.mxu1 %v7005_v17 }
0x1402   :  { %5010 = vmatpush.msra.mxu2 %v6994_v14  ;;  %v4960_v16 = vand.u32 4294901760, %v4959_v25 }
0x1403   :  { %4839 = vmatmul.f32.vlgmr.msra.gmra.mxu3 %v4808_v34  ;;  %v5117_v2 = vpop.permute.xlu2 %5116 }
0x1404   :  { %v5122_v50 = vsel %vm523_vm1, %v5117_v2, 0  ;;  %5033 = vmatpush.msra.mxu3 %v6991_v13  ;;  %v4961_v47 = vsub.f32 %v4959_v25, %v4960_v16 }
0x1405   :  { %v5139_v45 = vand.u32 4294901760, %v5122_v50 }
0x1407   :  { %v5166_v28 = vsub.f32 %v5122_v50, %v5139_v45  ;;  %4759 = vmatmul.f32.vlgmr.msrb.gmra.mxu0 %v4645_v30  ;;  %4887 = vmatmul.f32.vlgmr.msra.gmra.mxu1 %v4810_v46  ;;  %v4962_v30 = vand.u32 4294901760, %v4961_v47 }
0x1408   :  { %5081 = vmatpush.msra.mxu1 %v6991_v13  ;;  %4957 = vmatpush.msrb.mxu0 %v6991_v13 }
0x1409   :  { %v5167_v20 = vand.u32 4294901760, %v5166_v28  ;;  %4911 = vmatmul.f32.vlgmr.msrb.gmra.mxu2 %v4808_v34 }
0x140a   :  { %5140 = vmatpush.xpose.msrb.mxu2 %v5139_v45 }
0x140b   :  { %v5168_v4 = vsub.f32 %v5166_v28, %v5167_v20  ;;  %4933 = vmatmul.f32.vlgmr.msrb.gmra.mxu3 %v4808_v34 }
0x140d   :  { %v5169_v59 = vand.u32 4294901760, %v5168_v4 }
0x140f   :  { %4863 = vmatmul.f32.vlgmr.msra.gmra.mxu0 %v4809_v39  ;;  %4989 = vmatmul.f32.vlgmr.msrb.gmra.mxu1 %v4958_v35 }
0x1410   :  { %5170 = vmatpush.xpose.msrb.mxu3 %v5169_v59  ;;  %5216 = vmatpush.xpose.msrb.mxu1 %v5139_v45 }
0x1411   :  { %5013 = vmatmul.f32.vlgmr.msra.gmra.mxu2 %v4959_v25  ;;  %5059 = vmatpush.msra.mxu0 %v7000_v15 }
0x1412   :  { %5242 = vmatpush.xpose.msra.mxu2 %v5167_v20 }
0x1413   :  { %5037 = vmatmul.f32.vlgmr.msra.gmra.mxu3 %v4960_v16 }
0x1414   :  { %5264 = vmatpush.xpose.msra.mxu3 %v5139_v45 }
0x1417   :  { %4963 = vmatmul.f32.vlgmr.msrb.gmra.mxu0 %v4962_v30  ;;  %5083 = vmatmul.f32.vlgmr.msra.gmra.mxu1 %v4958_v35 }
0x1418   :  { %5193 = vmatpush.xpose.msrb.mxu0 %v5166_v28  ;;  %5401 = vmatpush.msra.mxu1 %v7139_v52 }
0x1419   :  { %5146 = vmatmul.f32.vlgmr.msrb.gmra.mxu2 %v4962_v30 }
0x141a   :  { %5407 = vmatpush.msra.mxu1 %v7145_v55  ;;  %5429 = vmatpush.msrb.mxu2 %v7087_v18 }
0x141b   :  { %5172 = vmatmul.f32.vlgmr.msrb.gmra.mxu3 %v4958_v35 }
0x141c   :  { %5432 = vmatpush.msrb.mxu2 %v7095_v21  ;;  %5454 = vmatpush.msrb.mxu3 %v7081_v12 }
0x141e   :  { %5456 = vmatpush.msrb.mxu3 %v7089_v19 }
0x141f   :  { %5061 = vmatmul.f32.vlgmr.msra.gmra.mxu0 %v4958_v35  ;;  %5220 = vmatmul.f32.vlgmr.msrb.gmra.mxu1 %v4960_v16 }
0x1420   :  { %5506 = vmatpush.msrb.mxu1 %v7081_v12  ;;  %5370 = vmatpush.msra.mxu0 %v7081_v12 }
0x1421   :  { %5244 = vmatmul.f32.vlgmr.msra.gmra.mxu2 %v4958_v35 }
0x1422   :  { %5508 = vmatpush.msrb.mxu1 %v7089_v19  ;;  %5372 = vmatpush.msra.mxu0 %v7089_v19 }
0x1423   :  { %5266 = vmatmul.f32.vlgmr.msra.gmra.mxu3 %v4958_v35 }
0x1427   :  { %5196 = vmatmul.f32.vlgmr.msrb.gmra.mxu0 %v4959_v25 }
0x1428   :  { %5481 = vmatpush.msrb.mxu0 %v7131_v48 }
0x142a   :  { %5485 = vmatpush.msrb.mxu0 %v7136_v51 }
0x1474   :  { %v4682_v34 = vpop.f32.mrf.mxu1 }
0x147c   :  { %v4651_v39 = vpop.f32.mrf.mxu0  ;;  %v4708_v46 = vpop.f32.mrf.mxu2 }
0x147d   :  { %v4683_v49 = vadd.f32 %v4682_v34, %v4651_v39  ;;  %v4783_v43 = vpop.f32.mrf.mxu1 }
0x147e   :  { %v4733_v32 = vpop.f32.mrf.mxu3 }
0x147f   :  { %v4709_v40 = vadd.f32 %v4708_v46, %v4683_v49 }
0x1481   :  { %v4734_v33 = vadd.f32 %v4733_v32, %v4709_v40 }
0x1484   :  { %v4760_v7 = vpop.f32.mrf.mxu0  ;;  %v4814_v22 = vpop.f32.mrf.mxu2 }
0x1485   :  { %v4761_v2 = vadd.f32 %v4760_v7, %v4734_v33  ;;  %v4888_v35 = vpop.f32.mrf.mxu1 }
0x1486   :  { %v4840_v50 = vpop.f32.mrf.mxu3 }
0x1487   :  { %v4784_v45 = vadd.f32 %v4783_v43, %v4761_v2 }
0x1489   :  { %v4815_v28 = vadd.f32 %v4814_v22, %v4784_v45 }
0x148b   :  { %v4841_v25 = vadd.f32 %v4840_v50, %v4815_v28 }
0x148c   :  { %v4864_v20 = vpop.f32.mrf.mxu0  ;;  %v4912_v4 = vpop.f32.mrf.mxu2 }
0x148d   :  { %v4865_v16 = vadd.f32 %v4864_v20, %v4841_v25  ;;  %v4990_v34 = vpop.f32.mrf.mxu1 }
0x148e   :  { %v4934_v47 = vpop.f32.mrf.mxu3 }
0x148f   :  { %v4889_v59 = vadd.f32 %v4888_v35, %v4865_v16 }
0x1491   :  { %v4913_v30 = vadd.f32 %v4912_v4, %v4889_v59 }
0x1493   :  { %v7717_v62 = vadd.f32 %v4934_v47, %v4913_v30 }
0x1494   :  { %v4964_v39 = vpop.f32.mrf.mxu0  ;;  %v5014_v49 = vpop.f32.mrf.mxu2 }
0x1495   :  { %v4991_v46 = vadd.f32 %v4990_v34, %v4964_v39  ;;  %v5084_v22 = vpop.f32.mrf.mxu1 }
0x1496   :  { %v5038_v40 = vpop.f32.mrf.mxu3 }
0x1497   :  { %v5015_v32 = vadd.f32 %v5014_v49, %v4991_v46 }
0x1499   :  { %v5039_v33 = vadd.f32 %v5038_v40, %v5015_v32 }
0x149c   :  { %v5062_v7 = vpop.f32.mrf.mxu0  ;;  %v5147_v49 = vpop.f32.mrf.mxu2 }
0x149d   :  { %v5063_v43 = vadd.f32 %v5062_v7, %v5039_v33 }
0x149e   :  { %v5173_v32 = vpop.f32.mrf.mxu3 }
0x149f   :  { %v5085_v2 = vadd.f32 %v5084_v22, %v5063_v43 }
0x14a1   :  { %5094 = vrot.lane.b32.xlu1 %v5085_v2, %s6755_s29  ;;  %5091 = vrot.lane.b32.xlu2 %v5085_v2, %s6759_s4 }
0x14a2   :  { %5088 = vrot.lane.b32.xlu0 %v5085_v2, %s6756_s30 }
0x14a4   :  { %v5197_v43 = vpop.f32.mrf.mxu0 }
0x14a9   :  { %5103 = vrot.lane.b32.xlu1 %v5085_v2, %s6757_s13  ;;  %5100 = vrot.lane.b32.xlu2 %v5085_v2, %s6754_s28 }
0x14aa   :  { %5097 = vrot.lane.b32.xlu0 %v5085_v2, %s6758_s14 }
0x14b2   :  { %5106 = vrot.lane.b32.xlu0 %v5085_v2, %s6760_s0 }
0x14fb   :  { %v5092_v45 = vpop.permute.xlu2 %5091 }
0x1503   :  { %v5101_v59 = vpop.permute.xlu2 %5100 }
0x1513   :  { %v5095_v35 = vpop.permute.xlu1 %5094 }
0x1514   :  { %v5089_v50 = vpop.permute.xlu0 %5088 }
0x1515   :  { %v5109_v28 = vsel %vm695_vm2, %v5085_v2, %v5089_v50  ;;  %v5221_v2 = vpop.f32.mrf.mxu1 }
0x1516   :  { %v5110_v25 = vsel %vm697_vm3, %v5109_v28, %v5092_v45  ;;  %v5245_v45 = vpop.f32.mrf.mxu2 }
0x1517   :  { %v5111_v4 = vsel %vm699_vm4, %v5110_v25, %v5095_v35  ;;  %v5267_v35 = vpop.f32.mrf.mxu3 }
0x151b   :  { %v5104_v30 = vpop.permute.xlu1 %5103 }
0x151c   :  { %v5098_v20 = vpop.permute.xlu0 %5097 }
0x151d   :  { %v5112_v16 = vsel %vm701_vm5, %v5111_v4, %v5098_v20 }
0x151e   :  { %v5113_v47 = vsel %vm8128_vm13, %v5112_v16, %v5101_v59  ;;  %vm8133_vm13 = vcmask 31744  }
0x151f   :  { %v5114_v39 = vsel %vm8129_vm6, %v5113_v47, %v5104_v30  ;;  %vm8134_vm6 = vcmask 113664  }
0x1524   :  { %v5107_v34 = vpop.permute.xlu0 %5106 }
0x1525   :  { %v5115_v46 = vsel %vm8130_vm14, %v5114_v39, %v5107_v34  ;;  %vm8135_vm14 = vcmask 80896  }
0x1526   :  { %5119 = vrot.lane.b32.xlu2 %v5115_v46, %s6762_s17 }
0x1580   :  { %v5120_v40 = vpop.permute.xlu2 %5119 }
0x1581   :  { %v5148_v33 = vadd.f32 %v5147_v49, %v5120_v40 }
0x1583   :  { %v5174_v7 = vadd.f32 %v5173_v32, %v5148_v33 }
0x1585   :  { %v5198_v22 = vadd.f32 %v5197_v43, %v5174_v7 }
0x1587   :  { %v5222_v50 = vadd.f32 %v5221_v2, %v5198_v22 }
0x1589   :  { %v5246_v28 = vadd.f32 %v5245_v45, %v5222_v50 }
0x158b   :  { %v5268_v25 = vadd.f32 %v5267_v35, %v5246_v28 }
0x158d   :  { %v5270_v20 = vsel %vm3482_vm11, -10000.0, %v5268_v25 }
0x158e   :  { %v5271_v4 = vsel %vm523_vm1, %v5270_v20, -inf }
0x158f   :  { %5272 = vmax.xlane.f32.xlu1 %v5271_v4 }
0x1602   :  { %v5273_v16 = vpop.xlane.xlu1 %5272 }
0x1603   :  { %v5274_v59 = vsub.f32 %v5270_v20, %v5273_v16 }
0x1605   :  { %v5275_v47 = vmul.f32 1.442695, %v5274_v59 }
0x1607   :  { %6717 = vpow2.f32 %v5275_v47 }
0x160d   :  { %v6718_v30 = vpop.eup %6717 }
0x160e   :  { %v5277_v34 = vsel %vm523_vm1, %v6718_v30, 0.0 }
0x160f   :  { %5278 = vadd.xlane.f32.xlu0 %v5277_v34 }
0x1682   :  { %v5279_v39 = vpop.xlane.xlu0 %5278 }
0x1683   :  { %6719 = vrcp.f32 %v5279_v39 }
0x1689   :  { %v6720_v46 = vpop.eup %6719 }
0x168a   :  { %v5281_v49 = vmul.f32 %v6720_v46, %v5279_v39 }
0x168c   :  { %v5282_v32 = vsub.f32 2.0, %v5281_v49 }
0x168e   :  { %v5283_v40 = vmul.f32 %v6720_v46, %v5282_v32 }
0x1690   :  { %v5284_v33 = vmul.f32 %v6718_v30, %v5283_v40 }
0x1692   :  { %5286 = vrot.lane.b32.xlu2 %v5284_v33, %s6760_s0  ;;  %v5320_v7 = vrot.slane %v5284_v33, 6  ;;  %v5314_v43 = vrot.slane %v5284_v33, 5  ;;  %v5290_v22 = vrot.slane %v5284_v33, 1  ;;  %v5296_v2 = vrot.slane %v5284_v33, 2 }
0x1693   :  { %v5302_v50 = vrot.slane %v5284_v33, 3  ;;  %v5308_v45 = vrot.slane %v5284_v33, 4 }
0x1694   :  { %5321 = vrot.lane.b32.xlu0 %v5320_v7, %s6756_s30  ;;  %5315 = vrot.lane.b32.xlu1 %v5314_v43, %s6759_s4 }
0x169a   :  { %5291 = vrot.lane.b32.xlu2 %v5290_v22, %s6757_s13 }
0x16a2   :  { %5297 = vrot.lane.b32.xlu2 %v5296_v2, %s6754_s28 }
0x16aa   :  { %5303 = vrot.lane.b32.xlu2 %v5302_v50, %s6758_s14 }
0x16b2   :  { %5309 = vrot.lane.b32.xlu2 %v5308_v45, %s6755_s29  ;;  %v5517_v45 = vsel %vm523_vm1, %v5284_v33, 0 }
0x16ba   :  { %5514 = vrot.lane.b32.xlu2 %v7497_v56, %s6767_s10 }
0x16c2   :  { %5665 = vrot.lane.b32.xlu2 %v7509_v38, %s6768_s25 }
0x16ca   :  { %5844 = vrot.lane.b32.xlu2 %v7497_v56, %s6768_s25 }
0x16ec   :  { %v5287_v28 = vpop.permute.xlu2 %5286 }
0x16ed   :  { %v5289_v22 = vsel %vm881_vm10, 0.0, %v5287_v28 }
0x16f4   :  { %v5292_v35 = vpop.permute.xlu2 %5291 }
0x16f5   :  { %v5294_v20 = vsel %vm8131_vm7, 0.0, %v5292_v35  ;;  %vm8136_vm7 = vcmask 23552  }
0x16f6   :  { %v5295_v47 = vsel %vm8134_vm6, %v5294_v20, 0.0  ;;  %vm8139_vm6 = vcmask 1044480  }
0x16f7   :  { %v5328_v46 = vrot.slane %v5295_v47, 7 }
0x16f9   :  { %v5345_v35 = vsel %vm695_vm2, %v5289_v22, %v5328_v46 }
0x16fc   :  { %v5298_v25 = vpop.permute.xlu2 %5297 }
0x16fd   :  { %v5300_v16 = vsel %vm8132_vm9, 0.0, %v5298_v25  ;;  %vm8137_vm9 = vcmask 72704  }
0x16fe   :  { %v5301_v34 = vsel %vm897_vm15, %v5300_v16, 0.0 }
0x16ff   :  { %v5331_v32 = vrot.slane %v5301_v34, 6 }
0x1704   :  { %v5304_v4 = vpop.permute.xlu2 %5303 }
0x1705   :  { %v5306_v59 = vsel %vm8133_vm13, 0.0, %v5304_v4  ;;  %vm8138_vm13 = vcmask 89088   ;;  %v5346_v4 = vsel %vm697_vm3, %v5345_v35, %v5331_v32 }
0x1706   :  { %v5316_v30 = vpop.permute.xlu1 %5315  ;;  %v5322_v39 = vpop.permute.xlu0 %5321  ;;  %v5307_v38 = vsel %vm905_vm0, %v5306_v59, 0.0 }
0x1707   :  { %v5318_v49 = vsel %vm919_vm12, 0.0, %v5316_v30  ;;  %v5324_v40 = vsel %vm927_vm8, 0.0, %v5322_v39  ;;  %v5334_v7 = vrot.slane %v5307_v38, 5  ;;  %v5536_v30 = vand.u32 4294901760, %v5517_v45 }
0x1708   :  { %v5319_v2 = vsel %vm8135_vm14, %v5318_v49, 0.0  ;;  %v5325_v25 = vsel %vm8137_vm9, %v5324_v40, 0.0  ;;  %v5326_v38 = vsel %vm523_vm1, %v5284_v33, 0.0  ;;  %vm8140_vm14 = vcmask 1045504  }
0x1709   :  { %v5347_v59 = vsel %vm699_vm4, %v5346_v4, %v5334_v7  ;;  %v5340_v47 = vrot.slane %v5319_v2, 3  ;;  %v5343_v28 = vrot.slane %v5325_v25, 2  ;;  %vm8142_vm9 = vcmask 121856  }
0x170c   :  { %v5310_v43 = vpop.permute.xlu2 %5309 }
0x170d   :  { %v5312_v50 = vsel %vm8136_vm7, 0.0, %v5310_v43  ;;  %vm8141_vm7 = vcmask 1046528   ;;  %v5537_v43 = vsub.f32 %v5517_v45, %v5536_v30 }
0x170e   :  { %v5313_v20 = vsel %vm8138_vm13, %v5312_v50, 0.0  ;;  %vm8143_vm13 = vmmov %vm8139_vm6 }
0x170f   :  { %v5337_v16 = vrot.slane %v5313_v20, 4  ;;  %v5538_v35 = vand.u32 4294901760, %v5537_v43 }
0x1711   :  { %v5348_v34 = vsel %vm701_vm5, %v5347_v59, %v5337_v16  ;;  %v5539_v59 = vsub.f32 %v5537_v43, %v5538_v35 }
0x1712   :  { %v5349_v39 = vsel %vm8139_vm6, %v5348_v34, %v5340_v47  ;;  %vm8144_vm6 = vmmov %vm8140_vm14 }
0x1713   :  { %v5350_v46 = vsel %vm8140_vm14, %v5349_v39, %v5343_v28  ;;  %v5540_v28 = vand.u32 4294901760, %v5539_v59  ;;  %vm8145_vm14 = vmmov %vm8141_vm7 }
0x1714   :  { %v5351_v49 = vsel %vm8141_vm7, %v5350_v46, %v5326_v38  ;;  %v5515_v40 = vpop.permute.xlu2 %5514  ;;  %vm8162_vm7 = vcmask 39936  }
0x1715   :  { %v5534_v22 = vand.u32 4294901760, %v5515_v40  ;;  %v5353_v32 = vsel %vm8142_vm9, %v5351_v49, 0  ;;  %vm8163_vm9 = vcmask 31744  }
0x1716   :  { %v5373_v50 = vand.u32 4294901760, %v5353_v32 }
0x1717   :  { %v5561_v7 = vsub.f32 %v5515_v40, %v5534_v22  ;;  %5535 = vmatpush.msra.mxu2 %v5534_v22 }
0x1718   :  { %5409 = vmatmul.f32.vlgmr.msra.gmra.mxu1 %v5373_v50  ;;  %v5374_v2 = vsub.f32 %v5353_v32, %v5373_v50 }
0x1719   :  { %v5562_v25 = vand.u32 4294901760, %v5561_v7  ;;  %5611 = vmatpush.msra.mxu1 %v5534_v22 }
0x171a   :  { %5435 = vmatmul.f32.vlgmr.msrb.gmra.mxu2 %v5374_v2  ;;  %v5375_v20 = vand.u32 4294901760, %v5374_v2 }
0x171b   :  { %v5563_v33 = vsub.f32 %v5561_v7, %v5562_v25  ;;  %5637 = vmatpush.msrb.mxu2 %v5562_v25 }
0x171c   :  { %5460 = vmatmul.f32.vlgmr.msrb.gmra.mxu3 %v5375_v20  ;;  %v5666_v4 = vpop.permute.xlu2 %5665  ;;  %v5376_v16 = vsub.f32 %v5374_v2, %v5375_v20 }
0x171d   :  { %v5564_v45 = vand.u32 4294901760, %v5563_v33  ;;  %v5667_v34 = vsel %vm523_vm1, %v5666_v4, 0 }
0x171e   :  { %v5377_v47 = vand.u32 4294901760, %v5376_v16  ;;  %v5686_v46 = vand.u32 4294901760, %v5667_v34 }
0x171f   :  { %5565 = vmatpush.msra.mxu3 %v5564_v45 }
0x1720   :  { %5378 = vmatmul.f32.vlgmr.msra.gmra.mxu0 %v5377_v47  ;;  %5510 = vmatmul.f32.vlgmr.msrb.gmra.mxu1 %v5373_v50 }
0x1721   :  { %5588 = vmatpush.msra.mxu0 %v5561_v7  ;;  %5659 = vmatpush.msrb.mxu3 %v5534_v22 }
0x1722   :  { %5541 = vmatmul.f32.vlgmr.msra.gmra.mxu2 %v5540_v28  ;;  %5715 = vmatpush.msrb.mxu1 %v7005_v17  ;;  %v5687_v17 = vsub.f32 %v5667_v34, %v5686_v46 }
0x1723   :  { %5738 = vmatpush.msra.mxu2 %v6994_v14 }
0x1724   :  { %5567 = vmatmul.f32.vlgmr.msra.gmra.mxu3 %v5536_v30  ;;  %v5845_v39 = vpop.permute.xlu2 %5844  ;;  %v5688_v32 = vand.u32 4294901760, %v5687_v17 }
0x1725   :  { %v5850_v38 = vsel %vm523_vm1, %v5845_v39, 0  ;;  %5761 = vmatpush.msra.mxu3 %v6991_v13 }
0x1726   :  { %v5867_v49 = vand.u32 4294901760, %v5850_v38  ;;  %v5689_v2 = vsub.f32 %v5687_v17, %v5688_v32 }
0x1728   :  { %v5894_v40 = vsub.f32 %v5850_v38, %v5867_v49  ;;  %5487 = vmatmul.f32.vlgmr.msrb.gmra.mxu0 %v5373_v50  ;;  %5615 = vmatmul.f32.vlgmr.msra.gmra.mxu1 %v5538_v35 }
0x1729   :  { %5809 = vmatpush.msra.mxu1 %v6991_v13  ;;  %5685 = vmatpush.msrb.mxu0 %v6991_v13  ;;  %v5690_v13 = vand.u32 4294901760, %v5689_v2 }
0x172a   :  { %v5895_v22 = vand.u32 4294901760, %v5894_v40  ;;  %5639 = vmatmul.f32.vlgmr.msrb.gmra.mxu2 %v5536_v30 }
0x172b   :  { %5868 = vmatpush.xpose.msrb.mxu2 %v5867_v49 }
0x172c   :  { %v5896_v14 = vsub.f32 %v5894_v40, %v5895_v22  ;;  %5661 = vmatmul.f32.vlgmr.msrb.gmra.mxu3 %v5536_v30 }
0x172e   :  { %v5897_v7 = vand.u32 4294901760, %v5896_v14 }
0x1730   :  { %5591 = vmatmul.f32.vlgmr.msra.gmra.mxu0 %v5537_v43  ;;  %5717 = vmatmul.f32.vlgmr.msrb.gmra.mxu1 %v5686_v46 }
0x1731   :  { %5898 = vmatpush.xpose.msrb.mxu3 %v5897_v7  ;;  %5944 = vmatpush.xpose.msrb.mxu1 %v5867_v49 }
0x1732   :  { %5741 = vmatmul.f32.vlgmr.msra.gmra.mxu2 %v5687_v17  ;;  %5787 = vmatpush.msra.mxu0 %v7000_v15 }
0x1733   :  { %5970 = vmatpush.xpose.msra.mxu2 %v5895_v22 }
0x1734   :  { %5765 = vmatmul.f32.vlgmr.msra.gmra.mxu3 %v5688_v32 }
0x1735   :  { %5992 = vmatpush.xpose.msra.mxu3 %v5867_v49 }
0x1738   :  { %5691 = vmatmul.f32.vlgmr.msrb.gmra.mxu0 %v5690_v13  ;;  %5811 = vmatmul.f32.vlgmr.msra.gmra.mxu1 %v5686_v46 }
0x1739   :  { %5921 = vmatpush.xpose.msrb.mxu0 %v5894_v40  ;;  %6129 = vmatpush.msra.mxu1 %v7139_v52 }
0x173a   :  { %5874 = vmatmul.f32.vlgmr.msrb.gmra.mxu2 %v5690_v13 }
0x173b   :  { %6135 = vmatpush.msra.mxu1 %v7145_v55  ;;  %6157 = vmatpush.msrb.mxu2 %v7087_v18 }
0x173c   :  { %5900 = vmatmul.f32.vlgmr.msrb.gmra.mxu3 %v5686_v46 }
0x173d   :  { %6160 = vmatpush.msrb.mxu2 %v7095_v21  ;;  %6182 = vmatpush.msrb.mxu3 %v7081_v12 }
0x173f   :  { %6184 = vmatpush.msrb.mxu3 %v7089_v19 }
0x1740   :  { %5789 = vmatmul.f32.vlgmr.msra.gmra.mxu0 %v5686_v46  ;;  %5948 = vmatmul.f32.vlgmr.msrb.gmra.mxu1 %v5688_v32 }
0x1741   :  { %6234 = vmatpush.msrb.mxu1 %v7081_v12  ;;  %6098 = vmatpush.msra.mxu0 %v7081_v12 }
0x1742   :  { %5972 = vmatmul.f32.vlgmr.msra.gmra.mxu2 %v5686_v46 }
0x1743   :  { %6236 = vmatpush.msrb.mxu1 %v7089_v19  ;;  %6100 = vmatpush.msra.mxu0 %v7089_v19 }
0x1744   :  { %5994 = vmatmul.f32.vlgmr.msra.gmra.mxu3 %v5686_v46 }
0x1748   :  { %5924 = vmatmul.f32.vlgmr.msrb.gmra.mxu0 %v5687_v17 }
0x1749   :  { %6209 = vmatpush.msrb.mxu0 %v7131_v48 }
0x174b   :  { %6213 = vmatpush.msrb.mxu0 %v7136_v51 }
0x1795   :  { %v5410_v15 = vpop.f32.mrf.mxu1 }
0x179d   :  { %v5379_v18 = vpop.f32.mrf.mxu0  ;;  %v5436_v21 = vpop.f32.mrf.mxu2 }
0x179e   :  { %v5411_v52 = vadd.f32 %v5410_v15, %v5379_v18  ;;  %v5511_v43 = vpop.f32.mrf.mxu1 }
0x179f   :  { %v5461_v55 = vpop.f32.mrf.mxu3 }
0x17a0   :  { %v5437_v30 = vadd.f32 %v5436_v21, %v5411_v52 }
0x17a2   :  { %v5462_v50 = vadd.f32 %v5461_v55, %v5437_v30 }
0x17a5   :  { %v5488_v12 = vpop.f32.mrf.mxu0  ;;  %v5542_v35 = vpop.f32.mrf.mxu2 }
0x17a6   :  { %v5489_v25 = vadd.f32 %v5488_v12, %v5462_v50  ;;  %v5616_v4 = vpop.f32.mrf.mxu1 }
0x17a7   :  { %v5568_v20 = vpop.f32.mrf.mxu3 }
0x17a8   :  { %v5512_v33 = vadd.f32 %v5511_v43, %v5489_v25 }
0x17aa   :  { %v5543_v19 = vadd.f32 %v5542_v35, %v5512_v33 }
0x17ac   :  { %v5569_v16 = vadd.f32 %v5568_v20, %v5543_v19 }
0x17ad   :  { %v5592_v59 = vpop.f32.mrf.mxu0  ;;  %v5640_v48 = vpop.f32.mrf.mxu2 }
0x17ae   :  { %v5593_v45 = vadd.f32 %v5592_v59, %v5569_v16  ;;  %v5718_v39 = vpop.f32.mrf.mxu1 }
0x17af   :  { %v5662_v47 = vpop.f32.mrf.mxu3 }
0x17b0   :  { %v5617_v51 = vadd.f32 %v5616_v4, %v5593_v45 }
0x17b2   :  { %v5641_v28 = vadd.f32 %v5640_v48, %v5617_v51 }
0x17b4   :  { %v7794_v34 = vadd.f32 %v5662_v47, %v5641_v28 }
0x17b5   :  { %v5692_v38 = vpop.f32.mrf.mxu0  ;;  %v5742_v49 = vpop.f32.mrf.mxu2 }
0x17b6   :  { %v5719_v46 = vadd.f32 %v5718_v39, %v5692_v38  ;;  %v5812_v7 = vpop.f32.mrf.mxu1 }
0x17b7   :  { %v5766_v17 = vpop.f32.mrf.mxu3 }
0x17b8   :  { %v5743_v40 = vadd.f32 %v5742_v49, %v5719_v46 }
0x17ba   :  { %v5767_v22 = vadd.f32 %v5766_v17, %v5743_v40 }
0x17bd   :  { %v5790_v14 = vpop.f32.mrf.mxu0  ;;  %v5875_v19 = vpop.f32.mrf.mxu2 }
0x17be   :  { %v5791_v32 = vadd.f32 %v5790_v14, %v5767_v22  ;;  %v5949_v47 = vpop.f32.mrf.mxu1 }
0x17bf   :  { %v5901_v4 = vpop.f32.mrf.mxu3 }
0x17c0   :  { %v5813_v2 = vadd.f32 %v5812_v7, %v5791_v32 }
0x17c2   :  { %5822 = vrot.lane.b32.xlu2 %v5813_v2, %s6755_s29  ;;  %5819 = vrot.lane.b32.xlu1 %v5813_v2, %s6759_s4 }
0x17c3   :  { %5816 = vrot.lane.b32.xlu0 %v5813_v2, %s6756_s30 }
0x17c5   :  { %v5925_v45 = vpop.f32.mrf.mxu0  ;;  %v5973_v39 = vpop.f32.mrf.mxu2 }
0x17c7   :  { %v5995_v46 = vpop.f32.mrf.mxu3 }
0x17ca   :  { %5831 = vrot.lane.b32.xlu2 %v5813_v2, %s6757_s13  ;;  %5828 = vrot.lane.b32.xlu1 %v5813_v2, %s6754_s28 }
0x17cb   :  { %5825 = vrot.lane.b32.xlu0 %v5813_v2, %s6758_s14 }
0x17d3   :  { %5834 = vrot.lane.b32.xlu0 %v5813_v2, %s6760_s0 }
0x181c   :  { %v5823_v21 = vpop.permute.xlu2 %5822 }
0x1824   :  { %v5832_v35 = vpop.permute.xlu2 %5831 }
0x1834   :  { %v5820_v13 = vpop.permute.xlu1 %5819 }
0x1835   :  { %v5817_v15 = vpop.permute.xlu0 %5816 }
0x1836   :  { %v5837_v18 = vsel %vm695_vm2, %v5813_v2, %v5817_v15 }
0x1837   :  { %v5838_v52 = vsel %vm697_vm3, %v5837_v18, %v5820_v13  ;;  %v3204_v13 = vadd.f32 %v7532_v24, %v7534_v42 }
0x1838   :  { %v5839_v30 = vsel %vm699_vm4, %v5838_v52, %v5823_v21 }
0x1839   :  { %v3230_v15 = vadd.f32 %v7536_v53, %v3204_v13  ;;  %v8159_v13 = vld [vmem:[#allocation8_spill] sm:$0xff] }
0x183b   :  { %v3255_v18 = vadd.f32 %v7538_v11, %v3230_v15 }
0x183c   :  { %v5829_v43 = vpop.permute.xlu1 %5828 }
0x183d   :  { %v5826_v55 = vpop.permute.xlu0 %5825  ;;  %v3282_v54 = vadd.f32 %v7542_v23, %v3255_v18  ;;  %v8160_v18 = vld [vmem:[#allocation10_spill] sm:$0xff] }
0x183e   :  { %v5840_v50 = vsel %vm701_vm5, %v5839_v30, %v5826_v55 }
0x183f   :  { %v5841_v12 = vsel %vm8143_vm13, %v5840_v50, %v5829_v43  ;;  %v3305_v21 = vadd.f32 %v7540_v8, %v3282_v54  ;;  %vm8164_vm13 = vcmask 113664  }
0x1840   :  { %v5842_v20 = vsel %vm8144_vm6, %v5841_v12, %v5832_v35  ;;  %vm8167_vm6 = vcmask 80896  }
0x1841   :  { %v3336_v55 = vadd.f32 %v7544_v3, %v3305_v21 }
0x1843   :  { %v3362_v43 = vadd.f32 %v7546_v27, %v3336_v55  ;;  %v1748_v27 = vadd.f32 %v7299_v10, %v7301_v36  ;;  %v2476_v10 = vadd.f32 %v7398_v44, %v7400_v26 }
0x1845   :  { %v5835_v25 = vpop.permute.xlu0 %5834  ;;  %v3386_v35 = vadd.f32 %v7550_v58, %v3362_v43  ;;  %v1774_v58 = vadd.f32 %v7303_v60, %v1748_v27  ;;  %v6411_v27 = vld [vmem:[%s8027_s8 + $0x18] sm:$0xff] }
0x1846   :  { %v5843_v33 = vsel %vm8145_vm14, %v5842_v20, %v5835_v25 }
0x1847   :  { %5847 = vrot.lane.b32.xlu1 %v5843_v33, %s6762_s17  ;;  %v3410_v53 = vadd.f32 %v7548_v37, %v3386_v35  ;;  %v1799_v25 = vadd.f32 %v7305_v61, %v1774_v58 }
0x1849   :  { %v3434_v23 = vadd.f32 %v7552_v31, %v3410_v53  ;;  %v1826_v36 = vadd.f32 %v7309_v0, %v1799_v25 }
0x184b   :  { %v3456_v37 = vadd.f32 %v7554_v1, %v3434_v23  ;;  %v2502_v1 = vadd.f32 %v7402_v29, %v2476_v10  ;;  %v8146_v29 = vld [vmem:[#allocation18_spill] sm:$0xff] }
0x184d   :  { %v2527_v33 = vadd.f32 %v7404_v5, %v2502_v1 }
0x184f   :  { %v2554_v61 = vadd.f32 %v7408_v41, %v2527_v33 }
0x1851   :  { %v2577_v26 = vadd.f32 %v7406_v9, %v2554_v61  ;;  %v8152_v9 = vld [vmem:[#allocation20_spill] sm:$0xff] }
0x18b9   :  { %v5848_v16 = vpop.permute.xlu1 %5847 }
0x18ba   :  { %v5876_v59 = vadd.f32 %v5875_v19, %v5848_v16  ;;  %v8147_v19 = vld [vmem:[#allocation21_spill] sm:$0xff] }
0x18bb   :  { %v8148_v16 = vld [vmem:[#allocation17_spill] sm:$0xff] }
0x18bc   :  { %v5902_v48 = vadd.f32 %v5901_v4, %v5876_v59  ;;  %v2608_v4 = vadd.f32 %v8147_v19, %v2577_v26  ;;  %v8149_v59 = vld [vmem:[#allocation22_spill] sm:$0xff] }
0x18be   :  { %v5926_v51 = vadd.f32 %v5925_v45, %v5902_v48  ;;  %v2634_v48 = vadd.f32 %v8149_v59, %v2608_v4 }
0x18c0   :  { %v5950_v28 = vadd.f32 %v5949_v47, %v5926_v51  ;;  %v8153_v47 = vld [vmem:[#allocation23_spill] sm:$0xff] }
0x18c2   :  { %v5974_v38 = vadd.f32 %v5973_v39, %v5950_v28  ;;  %v8154_v39 = vld [vmem:[#allocation25_spill] sm:$0xff] }
0x18c4   :  { %v5996_v49 = vadd.f32 %v5995_v46, %v5974_v38  ;;  %v8155_v46 = vld [vmem:[#allocation26_spill] sm:$0xff] }
0x18c6   :  { %v5998_v40 = vsel %vm3482_vm11, -10000.0, %v5996_v49  ;;  %vm8161_vm11 = vcmask 48128  }
0x18c7   :  { %v5999_v17 = vsel %vm523_vm1, %v5998_v40, -inf }
0x18c8   :  { %6000 = vmax.xlane.f32.xlu2 %v5999_v17  ;;  %v8156_v17 = vld [vmem:[#allocation6_spill] sm:$0xff] }
0x193b   :  { %v6001_v22 = vpop.xlane.xlu2 %6000 }
0x193c   :  { %v6002_v14 = vsub.f32 %v5998_v40, %v6001_v22  ;;  %v8157_v22 = vld [vmem:[#allocation5_spill] sm:$0xff] }
0x193e   :  { %v6003_v32 = vmul.f32 1.442695, %v6002_v14  ;;  %v1020_v14 = vadd.f32 %v8157_v22, %v8156_v17  ;;  %v8176_v17 = vld [vmem:[#allocation14_spill] sm:$0xff] }
0x1940   :  { %6721 = vpow2.f32 %v6003_v32 }
0x1946   :  { %v6722_v7 = vpop.eup %6721 }
0x1947   :  { %v6005_v2 = vsel %vm523_vm1, %v6722_v7, 0.0 }
0x1948   :  { %6006 = vadd.xlane.f32.xlu0 %v6005_v2 }
0x19bb   :  { %v6007_v52 = vpop.xlane.xlu0 %6006 }
0x19bc   :  { %6723 = vrcp.f32 %v6007_v52 }
0x19c2   :  { %v6724_v30 = vpop.eup %6723 }
0x19c3   :  { %v6009_v50 = vmul.f32 %v6724_v30, %v6007_v52 }
0x19c5   :  { %v6010_v12 = vsub.f32 2.0, %v6009_v50  ;;  %v8165_v50 = vld [vmem:[#allocation9_spill] sm:$0xff] }
0x19c7   :  { %v6011_v24 = vmul.f32 %v6724_v30, %v6010_v12 }
0x19c9   :  { %v7824_v42 = vmul.f32 %v6722_v7, %v6011_v24  ;;  %v8158_v7 = vld [vmem:[#allocation7_spill] sm:$0xff] }
0x19ca   :  { %v1046_v2 = vadd.f32 %v8158_v7, %v1020_v14 }
0x19cb   :  { %6014 = vrot.lane.b32.xlu1 %v7824_v42, %s6760_s0  ;;  %v6048_v11 = vrot.slane %v7824_v42, 6  ;;  %v6042_v8 = vrot.slane %v7824_v42, 5  ;;  %v6018_v3 = vrot.slane %v7824_v42, 1  ;;  %s6771_s0 = smov 24   ;;  %v6024_v31 = vrot.slane %v7824_v42, 2 }
0x19cc   :  { %v6030_v20 = vrot.slane %v7824_v42, 3  ;;  %v6036_v0 = vrot.slane %v7824_v42, 4  ;;  %v1071_v15 = vadd.f32 %v8159_v13, %v1046_v2 }
0x19cd   :  { %6049 = vrot.lane.b32.xlu0 %v6048_v11, %s6756_s30  ;;  %6043 = vrot.lane.b32.xlu2 %v6042_v8, %s6759_s4 }
0x19ce   :  { %v1098_v54 = vadd.f32 %v8160_v18, %v1071_v15 }
0x19d0   :  { %v1121_v12 = vadd.f32 %v8165_v50, %v1098_v54 }
0x19d3   :  { %6019 = vrot.lane.b32.xlu1 %v6018_v3, %s6757_s13 }
0x19d5   :  { %6394 = vrot.lane.b32.xlu2 %v7717_v62, %s6770_s3  ;;  %3467 = vrot.lane.b32.xlu0 %v3456_v37, %s6771_s0  ;;  %v1849_v62 = vadd.f32 %v7307_v63, %v1826_v36  ;;  %v8166_v37 = vld [vmem:[#allocation11_spill] sm:$0xff] }
0x19d6   :  { %v1152_v58 = vadd.f32 %v8166_v37, %v1121_v12 }
0x19d7   :  { %v1880_v60 = vadd.f32 %v7311_v57, %v1849_v62  ;;  %v8150_v57 = vld [vmem:[#allocation19_spill] sm:$0xff]  ;;  %v6245_v62 = vsel %vm523_vm1, %v7824_v42, 0 }
0x19d8   :  { %v7910_v4 = vand.u32 4294901760, %v6245_v62 }
0x19d9   :  { %v1906_v44 = vadd.f32 %v7313_v6, %v1880_v60  ;;  %v8151_v6 = vld [vmem:[#allocation24_spill] sm:$0xff] }
0x19da   :  { %v2658_v45 = vadd.f32 %v8151_v6, %v2634_v48  ;;  %v8171_v48 = vld [vmem:[#allocation12_spill] sm:$0xff] }
0x19db   :  { %6025 = vrot.lane.b32.xlu1 %v6024_v31, %s6754_s28  ;;  %v1930_v63 = vadd.f32 %v8146_v29, %v1906_v44  ;;  %s6772_s28 = smov 16   ;;  %v7903_v44 = vand.u32 4294901760, %v6411_v27  ;;  %v6409_v29 = vld [vmem:[%s8027_s8 + $0x8] sm:$0xff] }
0x19dc   :  { %v2682_v28 = vadd.f32 %v8153_v47, %v2658_v45  ;;  %v7920_v45 = vand.u32 4294901760, %v6409_v29 }
0x19dd   :  { %v1954_v5 = vadd.f32 %v8148_v16, %v1930_v63  ;;  %v7918_v6 = vsub.f32 %v6411_v27, %v7903_v44 }
0x19de   :  { %v2706_v38 = vadd.f32 %v8154_v39, %v2682_v28 }
0x19df   :  { %v1978_v41 = vadd.f32 %v8150_v57, %v1954_v5  ;;  %v1178_v57 = vadd.f32 %v8171_v48, %v1152_v58 }
0x19e0   :  { %v2728_v49 = vadd.f32 %v8155_v46, %v2706_v38  ;;  %v7930_v38 = vsub.f32 %v6245_v62, %v7910_v4 }
0x19e1   :  { %v2000_v51 = vadd.f32 %v8152_v9, %v1978_v41  ;;  %v6408_v9 = vld [vmem:[%s8027_s8] sm:$0xff]  ;;  %v1202_v22 = vadd.f32 %v8176_v17, %v1178_v57 }
0x19e2   :  { %v6266_v13 = vand.u32 4294901760, %v7930_v38 }
0x19e3   :  { %6031 = vrot.lane.b32.xlu1 %v6030_v20, %s6758_s14  ;;  %v6410_v20 = vld [vmem:[%s8027_s8 + $0x10] sm:$0xff] }
0x19e4   :  { %v7912_v16 = vand.u32 4294901760, %v6410_v20 }
0x19e6   :  { %v7933_v46 = vsub.f32 %v6410_v20, %v7912_v16 }
0x19e8   :  { %v6479_v15 = vand.u32 4294901760, %v7933_v46 }
0x19eb   :  { %6037 = vrot.lane.b32.xlu1 %v6036_v0, %s6755_s29 }
0x19f3   :  { %6242 = vrot.lane.b32.xlu1 %v7497_v56, %s6769_s26 }
0x19fb   :  { %3459 = vrot.lane.b32.xlu1 %v2000_v51, %s6770_s3  ;;  %v6054_v51 = vsel %vm523_vm1, %v7824_v42, 0.0  ;;  %v6473_v42 = vand.u32 4294901760, %v7918_v6 }
0x1a03   :  { %3463 = vrot.lane.b32.xlu1 %v2728_v49, %s6772_s28 }
0x1a0b   :  { %6398 = vrot.lane.b32.xlu1 %v7794_v34, %s6772_s28 }
0x1a27   :  { %v6044_v34 = vpop.permute.xlu2 %6043 }
0x1a28   :  { %v6046_v11 = vsel %vm919_vm12, 0.0, %v6044_v34  ;;  %vm3473_vm12 = vcmask 195584  }
0x1a29   :  { %v6047_v10 = vsel %vm8167_vm6, %v6046_v11, 0.0 }
0x1a2a   :  { %v6068_v63 = vrot.slane %v6047_v10, 3  ;;  %v8179_v10 = vld [vmem:[#allocation16_spill] sm:$0xff] }
0x1a3d   :  { %v6015_v40 = vpop.permute.xlu1 %6014 }
0x1a3e   :  { %v6017_v36 = vsel %vm881_vm10, 0.0, %v6015_v40  ;;  %vm3471_vm10 = vcmask 130048  }
0x1a3f   :  { %v6050_v35 = vpop.permute.xlu0 %6049 }
0x1a40   :  { %v6052_v23 = vsel %vm927_vm8, 0.0, %v6050_v35  ;;  %vm8170_vm8 = vcmask 89088   ;;  %v6267_v35 = vsub.f32 %v7930_v38, %v6266_v13 }
0x1a42   :  { %v6268_v58 = vand.u32 4294901760, %v6267_v35  ;;  %v6692_v35 = vld [vmem:[%s8028_s9] ss:$0 sm:$0xff]  ;;  %s6773_s9 = smov [#allocation2]  }
0x1a43   :  { %s6644_s6 = sshll.u32 %s6773_s9, 4  ;;  %s6645_s6 = int_to_ptr.vmem [resolvable:$true] %s6644_s6 }
0x1a45   :  { %v6020_v56 = vpop.permute.xlu1 %6019 }
0x1a46   :  { %v6022_v21 = vsel %vm8161_vm11, 0.0, %v6020_v56  ;;  %v7936_v56 = vand.u32 4294901760, %v6408_v9 }
0x1a47   :  { %v6023_v43 = vsel %vm8164_vm13, %v6022_v21, 0.0  ;;  %v8177_v21 = vld [vmem:[#allocation13_spill] sm:$0xff] }
0x1a48   :  { %v6056_v8 = vrot.slane %v6023_v43, 7  ;;  %v7946_v54 = vsub.f32 %v6408_v9, %v7936_v56 }
0x1a4a   :  { %v6073_v60 = vsel %vm695_vm2, %v6017_v36, %v6056_v8  ;;  %vm8172_vm2 = vcmask 1044480   ;;  %v6491_v11 = vand.u32 4294901760, %v7946_v54  ;;  %v8178_v8 = vld [vmem:[#allocation15_spill] sm:$0xff] }
0x1a4d   :  { %v6026_v32 = vpop.permute.xlu1 %6025 }
0x1a4e   :  { %v6028_v55 = vsel %vm8162_vm7, 0.0, %v6026_v32  ;;  %v7941_v32 = vsub.f32 %v6409_v29, %v7920_v45 }
0x1a4f   :  { %v6029_v24 = vsel %vm897_vm15, %v6028_v55, 0.0  ;;  %vm8168_vm15 = vcmask 23552  }
0x1a50   :  { %v6059_v3 = vrot.slane %v6029_v24, 6  ;;  %v6485_v34 = vand.u32 4294901760, %v7941_v32  ;;  %v6480_v24 = vsub.f32 %v7933_v46, %v6479_v15 }
0x1a52   :  { %v6074_v26 = vsel %vm697_vm3, %v6073_v60, %v6059_v3  ;;  %vm8173_vm3 = vcmask 1045504   ;;  %v6486_v37 = vsub.f32 %v7941_v32, %v6485_v34 }
0x1a55   :  { %v6032_v52 = vpop.permute.xlu1 %6031 }
0x1a56   :  { %v6034_v30 = vsel %vm8163_vm9, 0.0, %v6032_v52  ;;  %v1226_v52 = vadd.f32 %v8177_v21, %v1202_v22 }
0x1a57   :  { %v6035_v53 = vsel %vm905_vm0, %v6034_v30, 0.0  ;;  %vm8169_vm0 = vcmask 72704   ;;  %v6474_v30 = vsub.f32 %v7918_v6, %v6473_v42 }
0x1a58   :  { %v6062_v31 = vrot.slane %v6035_v53, 5  ;;  %v6053_v33 = vsel %vm8169_vm0, %v6052_v23, 0.0  ;;  %v1250_v23 = vadd.f32 %v8178_v8, %v1226_v52 }
0x1a59   :  { %v6071_v5 = vrot.slane %v6053_v33, 2  ;;  %v6475_v27 = vand.u32 4294901760, %v6474_v30  ;;  %v3468_v33 = vpop.permute.xlu0 %3467 }
0x1a5a   :  { %v6075_v19 = vsel %vm699_vm4, %v6074_v26, %v6062_v31  ;;  %vm8174_vm4 = vmmov %vm8145_vm14  ;;  %v6481_v31 = vand.u32 4294901760, %v6480_v24  ;;  %v1272_v36 = vadd.f32 %v8179_v10, %v1250_v23  ;;  %vm8180_vm14 = vcmask 261120  }
0x1a5d   :  { %v6038_v25 = vpop.permute.xlu1 %6037 }
0x1a5e   :  { %v6040_v1 = vsel %vm8168_vm15, 0.0, %v6038_v25  ;;  %v6492_v25 = vsub.f32 %v7946_v54, %v6491_v11 }
0x1a5f   :  { %v6041_v61 = vsel %vm8170_vm8, %v6040_v1, 0.0  ;;  %v6487_v1 = vand.u32 4294901760, %v6486_v37 }
0x1a60   :  { %v6065_v0 = vrot.slane %v6041_v61, 4  ;;  %v6493_v61 = vand.u32 4294901760, %v6492_v25 }
0x1a62   :  { %v6076_v59 = vsel %vm701_vm5, %v6075_v19, %v6065_v0  ;;  %vm8175_vm5 = vcmask 121856  }
0x1a63   :  { %v6077_v41 = vsel %vm8172_vm2, %v6076_v59, %v6068_v63  ;;  %v6395_v63 = vpop.permute.xlu2 %6394 }
0x1a64   :  { %v6078_v47 = vsel %vm8173_vm3, %v6077_v41, %v6071_v5  ;;  %v8181_v5 = vld [vmem:[#allocation27_spill] sm:$0xff] }
0x1a65   :  { %v6079_v28 = vsel %vm8174_vm4, %v6078_v47, %v6054_v51  ;;  %v6243_v39 = vpop.permute.xlu1 %6242  ;;  %v6405_v59 = vsel %vm523_vm1, %v8181_v5, %v6395_v63 }
0x1a66   :  { %v6262_v49 = vand.u32 4294901760, %v6243_v39  ;;  %v6081_v40 = vsel %vm8175_vm5, %v6079_v28, 0 }
0x1a67   :  { %v6101_v14 = vand.u32 4294901760, %v6081_v40 }
0x1a68   :  { %v6289_v7 = vsub.f32 %v6243_v39, %v6262_v49  ;;  %6263 = vmatpush.msra.mxu2 %v6262_v49 }
0x1a69   :  { %6137 = vmatmul.f32.vlgmr.msra.gmra.mxu1 %v6101_v14  ;;  %v6102_v2 = vsub.f32 %v6081_v40, %v6101_v14 }
0x1a6a   :  { %v6290_v18 = vand.u32 4294901760, %v6289_v7  ;;  %6339 = vmatpush.msra.mxu1 %v6262_v49 }
0x1a6b   :  { %6163 = vmatmul.f32.vlgmr.msrb.gmra.mxu2 %v6102_v2  ;;  %v6103_v55 = vand.u32 4294901760, %v6102_v2 }
0x1a6c   :  { %v6291_v43 = vsub.f32 %v6289_v7, %v6290_v18  ;;  %6365 = vmatpush.msrb.mxu2 %v6290_v18 }
0x1a6d   :  { %6188 = vmatmul.f32.vlgmr.msrb.gmra.mxu3 %v6103_v55  ;;  %v3460_v50 = vpop.permute.xlu1 %3459  ;;  %v6104_v12 = vsub.f32 %v6102_v2, %v6103_v55 }
0x1a6e   :  { %v6292_v53 = vand.u32 4294901760, %v6291_v43  ;;  %v3470_v62 = vsel %vm523_vm1, %v1272_v36, %v3460_v50  ;;  %vm8182_vm1 = vmmov %vm8180_vm14 }
0x1a6f   :  { %v6105_v3 = vand.u32 4294901760, %v6104_v12  ;;  %vm8183_vm11 = vmmov %vm8182_vm1 }
0x1a70   :  { %6293 = vmatpush.msra.mxu3 %v6292_v53  ;;  %vm8184_vm7 = vmmov %vm8182_vm1 }
0x1a71   :  { %6106 = vmatmul.f32.vlgmr.msra.gmra.mxu0 %v6105_v3  ;;  %6238 = vmatmul.f32.vlgmr.msrb.gmra.mxu1 %v6101_v14 }
0x1a72   :  { %6316 = vmatpush.msra.mxu0 %v6289_v7  ;;  %6387 = vmatpush.msrb.mxu3 %v6262_v49 }
0x1a73   :  { %6269 = vmatmul.f32.vlgmr.msra.gmra.mxu2 %v6268_v58  ;;  %6476 = vmatpush.msrb.mxu1 %v6475_v27 }
0x1a74   :  { %6518 = vmatpush.msra.mxu2 %v7918_v6 }
0x1a75   :  { %6295 = vmatmul.f32.vlgmr.msra.gmra.mxu3 %v7910_v4  ;;  %v3464_v20 = vpop.permute.xlu1 %3463  ;;  %6482 = vmatpush.msrb.mxu1 %v6481_v31 }
0x1a76   :  { %v3472_v60 = vsel %vm3471_vm10, %v3470_v62, %v3464_v20  ;;  %6521 = vmatpush.msra.mxu2 %v7933_v46  ;;  %6552 = vmatpush.msra.mxu3 %v7903_v44 }
0x1a77   :  { %v3474_v26 = vsel %vm3473_vm12, %v3472_v60, %v3468_v33  ;;  %6488 = vmatpush.msrb.mxu1 %v6487_v1 }
0x1a78   :  { %v6417_v0 = vsel %vm8180_vm14, %v3474_v26, 0  ;;  %6524 = vmatpush.msra.mxu2 %v7941_v32  ;;  %6554 = vmatpush.msra.mxu3 %v7912_v16 }
0x1a79   :  { %v7976_v29 = vand.u32 4294901760, %v6417_v0  ;;  %6215 = vmatmul.f32.vlgmr.msrb.gmra.mxu0 %v6101_v14  ;;  %6343 = vmatmul.f32.vlgmr.msra.gmra.mxu1 %v6266_v13 }
0x1a7a   :  { %6494 = vmatpush.msrb.mxu1 %v6493_v61  ;;  %6435 = vmatpush.msrb.mxu0 %v7903_v44 }
0x1a7b   :  { %v6443_v19 = vsub.f32 %v6417_v0, %v7976_v29  ;;  %6367 = vmatmul.f32.vlgmr.msrb.gmra.mxu2 %v7910_v4  ;;  %6556 = vmatpush.msra.mxu3 %v7920_v45 }
0x1a7c   :  { %6527 = vmatpush.msra.mxu2 %v7946_v54  ;;  %6437 = vmatpush.msrb.mxu0 %v7912_v16 }
0x1a7d   :  { %6389 = vmatmul.f32.vlgmr.msrb.gmra.mxu3 %v7910_v4  ;;  %v6399_v48 = vpop.permute.xlu1 %6398  ;;  %6622 = vmatpush.msra.mxu1 %v7903_v44  ;;  %v6444_v41 = vand.u32 4294901760, %v6443_v19 }
0x1a7e   :  { %v6406_v57 = vsel %vm3471_vm10, %v6405_v59, %v6399_v48  ;;  %6558 = vmatpush.msra.mxu3 %v7936_v56  ;;  %6439 = vmatpush.msrb.mxu0 %v7920_v45 }
0x1a7f   :  { %6624 = vmatpush.msra.mxu1 %v7912_v16  ;;  %v6445_v44 = vsub.f32 %v6443_v19, %v6444_v41 }
0x1a80   :  { %6441 = vmatpush.msrb.mxu0 %v7936_v56 }
0x1a81   :  { %6319 = vmatmul.f32.vlgmr.msra.gmra.mxu0 %v7930_v38  ;;  %6496 = vmatmul.f32.vlgmr.msrb.gmra.mxu1 %v7976_v29  ;;  %v6446_v4 = vand.u32 4294901760, %v6445_v44 }
0x1a82   :  { %6587 = vmatpush.msra.mxu0 %v6473_v42  ;;  %6626 = vmatpush.msra.mxu1 %v7920_v45 }
0x1a83   :  { %6530 = vmatmul.f32.vlgmr.msra.gmra.mxu2 %v6443_v19 }
0x1a84   :  { %6591 = vmatpush.msra.mxu0 %v6479_v15  ;;  %6628 = vmatpush.msra.mxu1 %v7936_v56 }
0x1a85   :  { %6562 = vmatmul.f32.vlgmr.msra.gmra.mxu3 %v6444_v41 }
0x1a86   :  { %6595 = vmatpush.msra.mxu0 %v6485_v34 }
0x1a88   :  { %6599 = vmatpush.msra.mxu0 %v6491_v11 }
0x1a89   :  { %6447 = vmatmul.f32.vlgmr.msrb.gmra.mxu0 %v6446_v4 }
0x1ae6   :  { %v6138_v16 = vpop.f32.mrf.mxu1 }
0x1aee   :  { %v6107_v6 = vpop.f32.mrf.mxu0  ;;  %v6164_v9 = vpop.f32.mrf.mxu2 }
0x1aef   :  { %v6139_v45 = vadd.f32 %v6138_v16, %v6107_v6  ;;  %v6239_v39 = vpop.f32.mrf.mxu1 }
0x1af0   :  { %v6189_v51 = vpop.f32.mrf.mxu3 }
0x1af1   :  { %v6165_v47 = vadd.f32 %v6164_v9, %v6139_v45 }
0x1af3   :  { %v6190_v28 = vadd.f32 %v6189_v51, %v6165_v47 }
0x1af6   :  { %v6216_v38 = vpop.f32.mrf.mxu0  ;;  %v6270_v49 = vpop.f32.mrf.mxu2 }
0x1af7   :  { %v6217_v46 = vadd.f32 %v6216_v38, %v6190_v28  ;;  %v6344_v32 = vpop.f32.mrf.mxu1 }
0x1af8   :  { %v6296_v56 = vpop.f32.mrf.mxu3 }
0x1af9   :  { %v6240_v40 = vadd.f32 %v6239_v39, %v6217_v46 }
0x1afb   :  { %v6271_v17 = vadd.f32 %v6270_v49, %v6240_v40 }
0x1afd   :  { %v6297_v22 = vadd.f32 %v6296_v56, %v6271_v17 }
0x1afe   :  { %v6320_v14 = vpop.f32.mrf.mxu0  ;;  %v6368_v2 = vpop.f32.mrf.mxu2 }
0x1aff   :  { %v6321_v42 = vadd.f32 %v6320_v14, %v6297_v22  ;;  %v6497_v12 = vpop.f32.mrf.mxu1 }
0x1b00   :  { %v6390_v15 = vpop.f32.mrf.mxu3 }
0x1b01   :  { %v6345_v7 = vadd.f32 %v6344_v32, %v6321_v42 }
0x1b03   :  { %v6369_v13 = vadd.f32 %v6368_v2, %v6345_v7 }
0x1b05   :  { %v6391_v18 = vadd.f32 %v6390_v15, %v6369_v13 }
0x1b06   :  { %v6448_v24 = vpop.f32.mrf.mxu0  ;;  %v6531_v3 = vpop.f32.mrf.mxu2 }
0x1b07   :  { %6402 = vrot.lane.b32.xlu0 %v6391_v18, %s6771_s0  ;;  %v6449_v53 = vadd.f32 %v6692_v35, %v6448_v24 }
0x1b08   :  { %v6563_v58 = vpop.f32.mrf.mxu3 }
0x1b09   :  { %v6498_v8 = vadd.f32 %v6497_v12, %v6449_v53 }
0x1b0b   :  { %v6532_v27 = vadd.f32 %v6531_v3, %v6498_v8 }
0x1b0d   :  { %v6564_v31 = vadd.f32 %v6563_v58, %v6532_v27 }
0x1b79   :  { %v6403_v54 = vpop.permute.xlu0 %6402 }
0x1b7a   :  { %v6407_v21 = vsel %vm3473_vm12, %v6406_v57, %v6403_v54 }
0x1b7b   :  { %v6420_v52 = vsel %vm8182_vm1, %v6407_v21, 0 }
0x1b7c   :  { %v6450_v55 = vand.u32 4294901760, %v6420_v52 }
0x1b7e   :  { %v6451_v30 = vsub.f32 %v6420_v52, %v6450_v55  ;;  %6500 = vmatmul.f32.gmra.mxu1 %v6450_v55 }
0x1b80   :  { %6535 = vmatmul.f32.gmra.mxu2 %v6451_v30  ;;  %v6452_v34 = vand.u32 4294901760, %v6451_v30 }
0x1b82   :  { %6568 = vmatmul.f32.gmra.mxu3 %v6452_v34  ;;  %v6453_v43 = vsub.f32 %v6451_v30, %v6452_v34 }
0x1b84   :  { %v6454_v50 = vand.u32 4294901760, %v6453_v43 }
0x1b86   :  { %6455 = vmatmul.f32.gmra.mxu0 %v6454_v50  ;;  %6630 = vmatmul.f32.vlgmr.msra.gmra.mxu1 %v7976_v29 }
0x1b8e   :  { %6601 = vmatmul.f32.vlgmr.msra.gmra.mxu0 %v7976_v29  ;;  %6634 = vmatmul.f32.gmra.mxu1 %v6450_v55 }
0x1b96   :  { %6605 = vmatmul.f32.gmra.mxu0 %v6450_v55 }
0x1bfb   :  { %v6501_v11 = vpop.f32.mrf.mxu1 }
0x1c03   :  { %v6456_v23 = vpop.f32.mrf.mxu0  ;;  %v6631_v10 = vpop.f32.mrf.mxu1 }
0x1c04   :  { %v6457_v37 = vadd.f32 %v6692_v35, %v6456_v23  ;;  %v6536_v62 = vpop.f32.mrf.mxu2 }
0x1c05   :  { %v6569_v60 = vpop.f32.mrf.mxu3 }
0x1c06   :  { %v6502_v25 = vadd.f32 %v6501_v11, %v6457_v37 }
0x1c08   :  { %v6537_v20 = vadd.f32 %v6536_v62, %v6502_v25 }
0x1c0a   :  { %v6570_v61 = vadd.f32 %v6569_v60, %v6537_v20 }
0x1c0b   :  { %v6602_v36 = vpop.f32.mrf.mxu0  ;;  %v6635_v29 = vpop.f32.mrf.mxu1 }
0x1c0c   :  { %v6603_v1 = vadd.f32 %v6602_v36, %v6564_v31 }
0x1c0e   :  { %v6632_v33 = vadd.f32 %v6631_v10, %v6603_v1 }
0x1c10   :  { %6638 = vst.msk [vmem:[#allocation2] sm:$0xff] %vm8183_vm11, %v6632_v33 }
0x1c13   :  { %v6606_v26 = vpop.f32.mrf.mxu0 }
0x1c14   :  { %v6607_v0 = vadd.f32 %v6606_v26, %v6570_v61 }
0x1c16   :  { %v6636_v63 = vadd.f32 %v6635_v29, %v6607_v0 }
0x1c18   :  { %6639 = vst.msk [vmem:[#allocation2 + $0x8] sm:$0xff] %vm8184_vm7, %v6636_v63 }
0x1c19   :  { %6652 = dma.vmem_to_hbm [thread:$0]  %s6645_s6, 256, %s6647_s1, [#allocation3], %s6774_s24, %s6774_s24, %s6770_s3  }
0x1c1a   :  { %6752 = dma.done.wait [#allocation3], 256  }
0x1c1b   :  { %6753 = vsyncadd [#allocation3], 4294967040 }
0x1c1c   :  { %6657 = vsyncpa [#allocation3], 1 }

</bundles_post_ra>
